<compile_context>
chip_gen: v7x
topology: tpu7x:2x2x1
jax: 0.10.0
libtpu: 0.0.40
codegen_flags: <defaults>
</compile_context>

<pallas_src>
import math
from functools import partial

import jax
import jax.numpy as jnp
from jax.experimental import pallas as pl
from jax.experimental.pallas import tpu as pltpu


# ----------------------------------------------------------------- helpers --

def _round_up(n, m):
    return ((n + m - 1) // m) * m


def _pick_tile(n, target, quantum):
    """Largest multiple of `quantum` that divides n and is <= target; else n (full extent).

    Full extent is always (8,128)-legal for a BlockSpec, so the fallback is safe."""
    if n <= target:
        return n
    top = (target // quantum) * quantum
    for cand in range(top, quantum - 1, -quantum):
        if n % cand == 0:
            return cand
    return n


def _vmem_cap():
    """3/4 of physical VMEM (headroom for Mosaic scratch / semaphores / pipeline)."""
    try:
        cap = int(pltpu.get_tpu_info().vmem_capacity_bytes)
    except Exception:
        cap = 128 << 20
    return max(32 << 20, (cap * 3) // 4)          # ~48 MiB on v7x, ~96 MiB on v5e/v6e


def _clamp_vmem(est_bytes):
    return int(min(_vmem_cap(), max(32 << 20, est_bytes)))


def _layernorm_f32(x32, g, b, eps=1e-5):
    mean = jnp.mean(x32, axis=-1, keepdims=True)
    var = jnp.mean(jnp.square(x32 - mean), axis=-1, keepdims=True)
    return (x32 - mean) * jax.lax.rsqrt(var + eps) * g + b


def _split_heads(x2d, heads, dh):
    """(R, heads*dh) -> (heads, R, dh) via static lane slices (no lane-splitting reshape)."""
    return jnp.concatenate([x2d[:, h * dh:(h + 1) * dh][None] for h in range(heads)], axis=0)


def _merge_heads(x3d, heads):
    """(heads, R, dh) -> (R, heads*dh); head h occupies lanes [h*dh, (h+1)*dh)."""
    return jnp.concatenate([x3d[h] for h in range(heads)], axis=-1)


def _mha(q3, k3, v3, mask, heads):
    """Batched-head attention. q3:(H,tq,dh) bf16 pre-scaled; k3/v3:(H,Lk,dh) bf16;
    mask:(tq,Lk) bool. Returns merged (tq, H*dh) f32 context."""
    s = jax.lax.dot_general(q3, k3, (((2,), (2,)), ((0,), (0,))),
                            preferred_element_type=jnp.float32)       # (H, tq, Lk)
    s = jnp.where(mask[None], s, -1e30)
    m = jnp.max(s, axis=-1, keepdims=True)
    e = jnp.exp(s - m) * mask[None].astype(jnp.float32)               # fold post-softmax mask
    inv = pl.reciprocal(jnp.sum(e, axis=-1, keepdims=True) + 1e-30, approx=True)
    p = (e * inv).astype(jnp.bfloat16)                                # fully-masked rows -> 0
    ctx = jax.lax.dot_general(p, v3, (((2,), (1,)), ((0,), (0,))),
                              preferred_element_type=jnp.float32)     # (H, tq, dh)
    return _merge_heads(ctx, heads)


# ------------------------------------------------------------ dense kernel --

def _dense_kernel(x_ref, w_ref, b_ref, o_ref):
    acc = jnp.dot(x_ref[...], w_ref[...], preferred_element_type=jnp.float32)
    o_ref[...] = (acc + b_ref[...].astype(jnp.float32)).astype(o_ref.dtype)


def dense(x2d, w, b, out_dtype=None, tile_m=512, tile_n=512):
    """x2d:(M,K) bf16, w:(K,N) bf16, b:(1,N)/(N,) f32 -> (M,N); N padded to 128-multiple."""
    M, K = x2d.shape
    N = w.shape[1]
    out_dtype = out_dtype or x2d.dtype
    Np = _round_up(N, 128)
    b = b.reshape(1, N)
    if Np != N:
        w = jnp.pad(w, ((0, 0), (0, Np - N)))
        b = jnp.pad(b, ((0, 0), (0, Np - N)))
    tm = _pick_tile(M, tile_m, 8)
    tn = _pick_tile(Np, tile_n, 128)
    est = _clamp_vmem(2 * 2 * (tm * K + K * tn + tn)
                      + 2 * tm * tn * jnp.dtype(out_dtype).itemsize
                      + 4 * tm * tn + (2 << 20))
    out = pl.pallas_call(
        _dense_kernel,
        out_shape=jax.ShapeDtypeStruct((M, Np), out_dtype),
        grid=(M // tm, Np // tn),
        in_specs=[pl.BlockSpec((tm, K), lambda i, j: (i, 0)),
                  pl.BlockSpec((K, tn), lambda i, j: (0, j)),
                  pl.BlockSpec((1, tn), lambda i, j: (0, j))],
        out_specs=pl.BlockSpec((tm, tn), lambda i, j: (i, j)),
        compiler_params=pltpu.CompilerParams(
            dimension_semantics=("parallel", "parallel"),
            vmem_limit_bytes=est),
    )(x2d, w, b)
    return out if Np == N else out[:, :N]


# ------------------------------------------------ fused decoder-layer kernel --

def _decoder_layer_kernel(
        ys_lens_ref, mem_lens_ref,                       # scalar prefetch (SMEM)
        x_ref, mem_ref,                                  # (1,L,D) / (1,Lm,D) bf16
        g1_ref, bln1_ref,
        wq1_ref, bq1_ref, wk1_ref, bk1_ref, wv1_ref, bv1_ref, wo1_ref, bo1_ref,
        g2_ref, bln2_ref,
        wq2_ref, bq2_ref, wk2_ref, bk2_ref, wv2_ref, bv2_ref, wo2_ref, bo2_ref,
        g3_ref, bln3_ref,
        wf1_ref, bf1_ref, wf2_ref, bf2_ref,
        o_ref,                                           # (1,tq,D) output tile
        k1_s, v1_s, k2_s, v2_s,                          # head-split K/V VMEM scratch
        *, heads, tq):
    b = pl.program_id(0)
    qi = pl.program_id(1)
    L, D = x_ref.shape[1], x_ref.shape[2]
    Lm = mem_ref.shape[1]
    dh = D // heads
    scale = 1.0 / math.sqrt(dh)

    # ---- once per batch element: K/V projections for self- and cross-attention ----
    @pl.when(qi == 0)
    def _():
        xn_all = _layernorm_f32(x_ref[0].astype(jnp.float32),
                                g1_ref[...], bln1_ref[...]).astype(jnp.bfloat16)
        k1 = (jnp.dot(xn_all, wk1_ref[...], preferred_element_type=jnp.float32)
              + bk1_ref[...]).astype(jnp.bfloat16)
        v1 = (jnp.dot(xn_all, wv1_ref[...], preferred_element_type=jnp.float32)
              + bv1_ref[...]).astype(jnp.bfloat16)
        k1_s[...] = _split_heads(k1, heads, dh)
        v1_s[...] = _split_heads(v1, heads, dh)
        mem = mem_ref[0]
        k2 = (jnp.dot(mem, wk2_ref[...], preferred_element_type=jnp.float32)
              + bk2_ref[...]).astype(jnp.bfloat16)
        v2 = (jnp.dot(mem, wv2_ref[...], preferred_element_type=jnp.float32)
              + bv2_ref[...]).astype(jnp.bfloat16)
        k2_s[...] = _split_heads(k2, heads, dh)
        v2_s[...] = _split_heads(v2, heads, dh)

    row0 = pl.multiple_of(qi * tq, tq)
    x_t = x_ref[0, pl.ds(row0, tq), :].astype(jnp.float32)             # (tq, D)

    # ---- self-attention (pre-norm, residual) ----
    xn1 = _layernorm_f32(x_t, g1_ref[...], bln1_ref[...]).astype(jnp.bfloat16)
    q1 = (jnp.dot(xn1, wq1_ref[...], preferred_element_type=jnp.float32)
          + bq1_ref[...]) * scale
    q1 = _split_heads(q1.astype(jnp.bfloat16), heads, dh)              # (H, tq, dh)

    limit_t = ys_lens_ref[b]
    rows = row0 + jax.lax.broadcasted_iota(jnp.int32, (tq, L), 0)
    cols = jax.lax.broadcasted_iota(jnp.int32, (tq, L), 1)
    mask1 = (cols <= rows) & (cols < limit_t)

    ctx1 = _mha(q1, k1_s[...], v1_s[...], mask1, heads)                # (tq, D) f32
    x1 = x_t + (jnp.dot(ctx1.astype(jnp.bfloat16), wo1_ref[...],
                        preferred_element_type=jnp.float32) + bo1_ref[...])

    # ---- cross-attention over encoder memory ----
    xn2 = _layernorm_f32(x1, g2_ref[...], bln2_ref[...]).astype(jnp.bfloat16)
    q2 = (jnp.dot(xn2, wq2_ref[...], preferred_element_type=jnp.float32)
          + bq2_ref[...]) * scale
    q2 = _split_heads(q2.astype(jnp.bfloat16), heads, dh)
    mask2 = jax.lax.broadcasted_iota(jnp.int32, (tq, Lm), 1) < mem_lens_ref[b]
    ctx2 = _mha(q2, k2_s[...], v2_s[...], mask2, heads)
    x2 = x1 + (jnp.dot(ctx2.astype(jnp.bfloat16), wo2_ref[...],
                       preferred_element_type=jnp.float32) + bo2_ref[...])

    # ---- position-wise feed-forward ----
    xn3 = _layernorm_f32(x2, g3_ref[...], bln3_ref[...]).astype(jnp.bfloat16)
    h = jnp.maximum(jnp.dot(xn3, wf1_ref[...], preferred_element_type=jnp.float32)
                    + bf1_ref[...], 0.0)
    y = (jnp.dot(h.astype(jnp.bfloat16), wf2_ref[...],
                 preferred_element_type=jnp.float32) + bf2_ref[...])
    o_ref[0] = (x2 + y).astype(o_ref.dtype)


def decoder_layer(x, memory, ys_in_lens, mem_lens, p, heads, tq):
    B, L, D = x.shape
    Lm = memory.shape[1]
    F = p["ff1"]["w"].shape[1]
    dh = D // heads
    nq = L // tq

    weight_args = [
        p["ln1"]["g"], p["ln1"]["b"],
        p["self_q"]["w"], p["self_q"]["b"], p["self_k"]["w"], p["self_k"]["b"],
        p["self_v"]["w"], p["self_v"]["b"], p["self_o"]["w"], p["self_o"]["b"],
        p["ln2"]["g"], p["ln2"]["b"],
        p["src_q"]["w"], p["src_q"]["b"], p["src_k"]["w"], p["src_k"]["b"],
        p["src_v"]["w"], p["src_v"]["b"], p["src_o"]["w"], p["src_o"]["b"],
        p["ln3"]["g"], p["ln3"]["b"],
        p["ff1"]["w"], p["ff1"]["b"], p["ff2"]["w"], p["ff2"]["b"],
    ]

    def _const_spec(shape):
        nd = len(shape)
        return pl.BlockSpec(shape, lambda *args: (0,) * nd)

    weight_specs = [_const_spec(a.shape) for a in weight_args]

    # VMEM estimate: x2 for double-buffered weights, blocks, scratch, f32 intermediates.
    w_bytes = sum(int(a.size) * a.dtype.itemsize for a in weight_args)
    act_bytes = (2 * (L + Lm) * D * 2 * 2                        # x / memory blocks (bf16, x2)
                 + 2 * tq * D * 2                                # output tile (bf16, x2)
                 + 2 * (L + Lm) * heads * max(dh, 128) * 2       # K/V scratch (lane-padded)
                 + 6 * heads * tq * max(L, Lm) * 4               # score / prob block (f32)
                 + 2 * tq * F * 4                                # FFN hidden (f32)
                 + 12 * tq * D * 4)                              # misc f32 tiles
    vmem = _clamp_vmem(2 * w_bytes + act_bytes + (2 << 20))

    grid_spec = pltpu.PrefetchScalarGridSpec(
        num_scalar_prefetch=2,
        grid=(B, nq),
        in_specs=[pl.BlockSpec((1, L, D), lambda b, q, *_: (b, 0, 0)),
                  pl.BlockSpec((1, Lm, D), lambda b, q, *_: (b, 0, 0)),
                  *weight_specs],
        out_specs=pl.BlockSpec((1, tq, D), lambda b, q, *_: (b, q, 0)),
        scratch_shapes=[pltpu.VMEM((heads, L, dh), jnp.bfloat16),
                        pltpu.VMEM((heads, L, dh), jnp.bfloat16),
                        pltpu.VMEM((heads, Lm, dh), jnp.bfloat16),
                        pltpu.VMEM((heads, Lm, dh), jnp.bfloat16)])

    # q-tile axis must stay "arbitrary": the KV scratch is filled at q-tile 0 and reused.
    return pl.pallas_call(
        partial(_decoder_layer_kernel, heads=heads, tq=tq),
        out_shape=jax.ShapeDtypeStruct((B, L, D), x.dtype),
        grid_spec=grid_spec,
        compiler_params=pltpu.CompilerParams(
            dimension_semantics=("parallel", "arbitrary"),
            vmem_limit_bytes=vmem),
    )(ys_in_lens, mem_lens, x, memory, *weight_args)


# ------------------------- fused after_norm + ContextualAttention (reconstr) --

def _conatt_kernel(x_ref, g_ref, beta_ref, wq_ref, bq_ref, kctx_ref, vals_ref,
                   need_ref, xn_ref, rep_ref, *, scale):
    x32 = x_ref[0].astype(jnp.float32)                      # (L, D)
    xn = _layernorm_f32(x32, g_ref[...], beta_ref[...])     # after_norm
    xn_b = xn.astype(jnp.bfloat16)

    q = ((jnp.dot(xn_b, wq_ref[...], preferred_element_type=jnp.float32)
          + bq_ref[...]) * scale).astype(jnp.bfloat16)      # (L, A)
    s = jax.lax.dot_general(q, kctx_ref[...], (((1,), (1,)), ((), ())),
                            preferred_element_type=jnp.float32)        # (L, Nc)
    m = jnp.max(s, axis=-1, keepdims=True)
    e = jnp.exp(s - m)
    p = e * pl.reciprocal(jnp.sum(e, axis=-1, keepdims=True), approx=True)
    rep = jnp.dot(p.astype(jnp.bfloat16), vals_ref[...],
                  preferred_element_type=jnp.float32)       # (L, Cc)
    rep = jnp.where(need_ref[0] > 0, rep, 0.0)

    # two lane-dense outputs (no packed [x|ctx] slab -> no masked partial stores)
    xn_ref[0] = xn.astype(xn_ref.dtype)
    rep_ref[0] = rep.astype(rep_ref.dtype)


def conatt_features(x, need_att_mask, p_after, p_ca, context_b):
    B, L, D = x.shape
    Nc, Cc = context_b.shape
    A = p_ca["dec"]["w"].shape[1]
    # contextual keys are shared across the batch -> project once
    k_ctx = dense(context_b, p_ca["coc"]["w"], p_ca["coc"]["b"], out_dtype=jnp.bfloat16)
    need = need_att_mask.astype(jnp.int32).reshape(B, L, 1)
    est = _clamp_vmem(2 * 2 * (L * D + D * A + Nc * A + Nc * Cc + L)
                      + 8 * L * (Nc + D + Cc) * 4 + (2 << 20))
    xn, rep = pl.pallas_call(
        partial(_conatt_kernel, scale=1.0 / math.sqrt(A)),
        out_shape=(jax.ShapeDtypeStruct((B, L, D), jnp.bfloat16),
                   jax.ShapeDtypeStruct((B, L, Cc), jnp.bfloat16)),
        grid=(B,),
        in_specs=[pl.BlockSpec((1, L, D), lambda b: (b, 0, 0)),
                  pl.BlockSpec((1, D), lambda b: (0, 0)),
                  pl.BlockSpec((1, D), lambda b: (0, 0)),
                  pl.BlockSpec((D, A), lambda b: (0, 0)),
                  pl.BlockSpec((1, A), lambda b: (0, 0)),
                  pl.BlockSpec((Nc, A), lambda b: (0, 0)),
                  pl.BlockSpec((Nc, Cc), lambda b: (0, 0)),
                  pl.BlockSpec((1, L, 1), lambda b: (b, 0, 0))],
        out_specs=(pl.BlockSpec((1, L, D), lambda b: (b, 0, 0)),
                   pl.BlockSpec((1, L, Cc), lambda b: (b, 0, 0))),
        compiler_params=pltpu.CompilerParams(
            dimension_semantics=("parallel",), vmem_limit_bytes=est),
    )(x, p_after["g"], p_after["b"], p_ca["dec"]["w"], p_ca["dec"]["b"],
      k_ctx, context_b, need)
    return xn, rep


# ------------------------------------------- fused dual-matmul vocab logits --

def _logits_kernel(x1_ref, x2_ref, w1_ref, w2_ref, b_ref, o_ref):
    acc = jnp.dot(x1_ref[...], w1_ref[...], preferred_element_type=jnp.float32)
    acc = acc + jnp.dot(x2_ref[...], w2_ref[...], preferred_element_type=jnp.float32)
    o_ref[...] = (acc + b_ref[...]).astype(o_ref.dtype)


def output_projection(xn2d, rep2d, wx, wc, bias, vocab, tile_m=512, tile_n=512):
    """logits = xn @ wx + rep @ wc + bias  (== Linear(cat(xn, rep)));  vocab padded to 128."""
    M, D = xn2d.shape
    Cc = rep2d.shape[1]
    Vp = _round_up(vocab, 128)
    bias = bias.reshape(1, vocab)
    if Vp != vocab:
        wx = jnp.pad(wx, ((0, 0), (0, Vp - vocab)))
        wc = jnp.pad(wc, ((0, 0), (0, Vp - vocab)))
        bias = jnp.pad(bias, ((0, 0), (0, Vp - vocab)))
    tm = _pick_tile(M, tile_m, 8)
    tn = _pick_tile(Vp, tile_n, 128)
    est = _clamp_vmem(2 * 2 * (tm * (D + Cc) + (D + Cc) * tn + tn)
                      + 2 * tm * tn * 4 + 4 * tm * tn + (2 << 20))
    out = pl.pallas_call(
        _logits_kernel,
        out_shape=jax.ShapeDtypeStruct((M, Vp), jnp.float32),
        grid=(M // tm, Vp // tn),
        in_specs=[pl.BlockSpec((tm, D), lambda i, j: (i, 0)),
                  pl.BlockSpec((tm, Cc), lambda i, j: (i, 0)),
                  pl.BlockSpec((D, tn), lambda i, j: (0, j)),
                  pl.BlockSpec((Cc, tn), lambda i, j: (0, j)),
                  pl.BlockSpec((1, tn), lambda i, j: (0, j))],
        out_specs=pl.BlockSpec((tm, tn), lambda i, j: (i, j)),
        compiler_params=pltpu.CompilerParams(
            dimension_semantics=("parallel", "parallel"),
            vmem_limit_bytes=est),
    )(xn2d, rep2d, wx, wc, bias)
    return out if Vp == vocab else out[:, :vocab]


# ------------------------------------------------------------------- model --

def positional_encoding(L, d):
    pos = jnp.arange(L, dtype=jnp.float32)[:, None]
    div = jnp.exp(jnp.arange(0, d, 2, dtype=jnp.float32) * (-math.log(10000.0) / d))
    pe = jnp.zeros((L, d), jnp.float32)
    pe = pe.at[:, 0::2].set(jnp.sin(pos * div))
    pe = pe.at[:, 1::2].set(jnp.cos(pos * div)[:, : d // 2])
    return pe


@partial(jax.jit, static_argnames=("heads",))
def forward(params, memory, memory_mask, ys_in_pad, ys_in_lens, context,
            need_att_mask, *, heads):
    B, L = ys_in_pad.shape
    V, D = params["embed"].shape
    Cc = context.shape[-1]

    ys_in_lens = ys_in_lens.astype(jnp.int32)
    # memory pad-mask -> lengths (wenet encoder masks are contiguous pad masks)
    mem_lens = jnp.sum(memory_mask[:, 0, :].astype(jnp.int32), axis=-1)

    # embedding + positional encoding (dropout = identity in eval)
    # TODO(synk): dropout paths omitted (eval-mode forward only).
    x = params["embed"][ys_in_pad] * math.sqrt(D) + positional_encoding(L, D)[None]
    x = x.astype(jnp.bfloat16)
    memory_b = memory.astype(jnp.bfloat16)
    context_b = context.astype(jnp.bfloat16)

    tq = _pick_tile(L, 128, 8)
    for p in params["layers"]:
        x = decoder_layer(x, memory_b, ys_in_lens, mem_lens, p, heads, tq)

    # after_norm + ContextualAttention (reconstructed) -> lane-dense xn / context_repr
    xn, rep = conatt_features(x, need_att_mask, params["after_norm"],
                              params["conatt"], context_b)

    # output_layer(cat(xn, context_repr)) == xn @ W[:D] + ctx @ W[D:] + b
    w_out = params["out"]["w"]
    logits = output_projection(xn.reshape(B * L, D), rep.reshape(B * L, Cc),
                               w_out[:D], w_out[D:], params["out"]["b"], V)
    logits = logits.reshape(B, L, V)

    # olens = tgt_mask.sum(1), as in the reference forward
    key_valid = jnp.arange(L)[None, :] < ys_in_lens[:, None]
    tgt_mask = key_valid[:, None, :] & jnp.tril(jnp.ones((L, L), jnp.bool_))[None]
    olens = jnp.sum(tgt_mask.astype(jnp.int32), axis=1)

    return logits, jnp.asarray(0.0, jnp.float32), olens


# ------------------------------------------------------------------- params --

def init_params(key, vocab_size, d, ff, num_blocks, cocoder_dim, dot_att_dim):
    keys = iter(jax.random.split(key, num_blocks * 12 + 8))

    def lin(din, dout):
        kw, kb = jax.random.split(next(keys))
        return {"w": (jax.random.normal(kw, (din, dout), jnp.float32) * 0.05).astype(jnp.bfloat16),
                "b": jax.random.normal(kb, (1, dout), jnp.float32) * 0.01}

    def ln():
        return {"g": jnp.ones((1, d), jnp.float32), "b": jnp.zeros((1, d), jnp.float32)}

    params = {"embed": jax.random.normal(next(keys), (vocab_size, d), jnp.float32) * 0.1}
    layers = []
    for _ in range(num_blocks):
        layers.append({
            "ln1": ln(), "ln2": ln(), "ln3": ln(),
            "self_q": lin(d, d), "self_k": lin(d, d), "self_v": lin(d, d), "self_o": lin(d, d),
            "src_q": lin(d, d), "src_k": lin(d, d), "src_v": lin(d, d), "src_o": lin(d, d),
            "ff1": lin(d, ff), "ff2": lin(ff, d),
        })
    params["layers"] = layers
    params["after_norm"] = ln()
    params["conatt"] = {"dec": lin(d, dot_att_dim), "coc": lin(cocoder_dim, dot_att_dim)}
    params["out"] = lin(d + cocoder_dim, vocab_size)
    return params


# --------------------------------------------------------------------- main --

if __name__ == "__main__":
    vocab_size = 50
    d_model = 32          # encoder_output_size == attention_dim
    heads = 4
    linear_units = 64
    num_blocks = 2
    cocoder_out_dim = 24
    dot_att_dim = 16
    B, L, Lm, Nc = 2, 8, 10, 6

    key = jax.random.PRNGKey(0)
    kp, km, kt, kc = jax.random.split(key, 4)
    params = init_params(kp, vocab_size, d_model, linear_units, num_blocks,
                         cocoder_out_dim, dot_att_dim)

    memory = jax.random.normal(km, (B, Lm, d_model), jnp.float32)
    mem_lens = jnp.array([10, 7], jnp.int32)
    memory_mask = (jnp.arange(Lm)[None, :] < mem_lens[:, None])[:, None, :]   # (B, 1, Lm)
    ys_in_pad = jax.random.randint(kt, (B, L), 0, vocab_size, dtype=jnp.int32)
    ys_in_lens = jnp.array([8, 5], jnp.int32)
    context = jax.random.normal(kc, (Nc, cocoder_out_dim), jnp.float32)       # [N, c_dim]
    need_att_mask = jnp.ones((B, L), dtype=bool)

    logits, aux, olens = forward(params, memory, memory_mask, ys_in_pad,
                                 ys_in_lens, context, need_att_mask, heads=heads)
    jax.block_until_ready(logits)

    assert logits.shape == (B, L, vocab_size)
    assert olens.shape == (B, L)
    assert bool(jnp.all(jnp.isfinite(logits)))
    print("KERNEL_OK")
</pallas_src>

<mosaic_0001>
module attributes {stable_mosaic.version = 11 : i64} {
  func.func @_decoder_layer_kernel(%arg0: i32, %arg1: i32, %arg2: memref<2xi32, #tpu.memory_space<smem>>, %arg3: memref<2xi32, #tpu.memory_space<smem>>, %arg4: memref<1x8x32xbf16, #tpu.memory_space<vmem>>, %arg5: memref<1x10x32xbf16, #tpu.memory_space<vmem>>, %arg6: memref<1x32xf32, #tpu.memory_space<vmem>>, %arg7: memref<1x32xf32, #tpu.memory_space<vmem>>, %arg8: memref<32x32xbf16, #tpu.memory_space<vmem>>, %arg9: memref<1x32xf32, #tpu.memory_space<vmem>>, %arg10: memref<32x32xbf16, #tpu.memory_space<vmem>>, %arg11: memref<1x32xf32, #tpu.memory_space<vmem>>, %arg12: memref<32x32xbf16, #tpu.memory_space<vmem>>, %arg13: memref<1x32xf32, #tpu.memory_space<vmem>>, %arg14: memref<32x32xbf16, #tpu.memory_space<vmem>>, %arg15: memref<1x32xf32, #tpu.memory_space<vmem>>, %arg16: memref<1x32xf32, #tpu.memory_space<vmem>>, %arg17: memref<1x32xf32, #tpu.memory_space<vmem>>, %arg18: memref<32x32xbf16, #tpu.memory_space<vmem>>, %arg19: memref<1x32xf32, #tpu.memory_space<vmem>>, %arg20: memref<32x32xbf16, #tpu.memory_space<vmem>>, %arg21: memref<1x32xf32, #tpu.memory_space<vmem>>, %arg22: memref<32x32xbf16, #tpu.memory_space<vmem>>, %arg23: memref<1x32xf32, #tpu.memory_space<vmem>>, %arg24: memref<32x32xbf16, #tpu.memory_space<vmem>>, %arg25: memref<1x32xf32, #tpu.memory_space<vmem>>, %arg26: memref<1x32xf32, #tpu.memory_space<vmem>>, %arg27: memref<1x32xf32, #tpu.memory_space<vmem>>, %arg28: memref<32x64xbf16, #tpu.memory_space<vmem>>, %arg29: memref<1x64xf32, #tpu.memory_space<vmem>>, %arg30: memref<64x32xbf16, #tpu.memory_space<vmem>>, %arg31: memref<1x32xf32, #tpu.memory_space<vmem>>, %arg32: memref<1x8x32xbf16, #tpu.memory_space<vmem>>, %arg33: memref<4x8x8xbf16, #tpu.memory_space<vmem>>, %arg34: memref<4x8x8xbf16, #tpu.memory_space<vmem>>, %arg35: memref<4x10x8xbf16, #tpu.memory_space<vmem>>, %arg36: memref<4x10x8xbf16, #tpu.memory_space<vmem>>) attributes {dimension_semantics = [#tpu.dimension_semantics<parallel>, #tpu.dimension_semantics<arbitrary>], iteration_bounds = array<i64: 2, 1>, scalar_prefetch = 2 : i64, scratch_operands = 4 : i64, tpu.core_type = #tpu.core_type<tc>, window_params = [{transform_indices = @transform_0, window_bounds = array<i64: 1, 8, 32>}, {transform_indices = @transform_1, window_bounds = array<i64: 1, 10, 32>}, {pipeline_mode = #tpu.pipeline_mode<synchronous>, transform_indices = @transform_2, window_bounds = array<i64: 1, 32>}, {pipeline_mode = #tpu.pipeline_mode<synchronous>, transform_indices = @transform_3, window_bounds = array<i64: 1, 32>}, {pipeline_mode = #tpu.pipeline_mode<synchronous>, transform_indices = @transform_4, window_bounds = array<i64: 32, 32>}, {pipeline_mode = #tpu.pipeline_mode<synchronous>, transform_indices = @transform_5, window_bounds = array<i64: 1, 32>}, {pipeline_mode = #tpu.pipeline_mode<synchronous>, transform_indices = @transform_6, window_bounds = array<i64: 32, 32>}, {pipeline_mode = #tpu.pipeline_mode<synchronous>, transform_indices = @transform_7, window_bounds = array<i64: 1, 32>}, {pipeline_mode = #tpu.pipeline_mode<synchronous>, transform_indices = @transform_8, window_bounds = array<i64: 32, 32>}, {pipeline_mode = #tpu.pipeline_mode<synchronous>, transform_indices = @transform_9, window_bounds = array<i64: 1, 32>}, {pipeline_mode = #tpu.pipeline_mode<synchronous>, transform_indices = @transform_10, window_bounds = array<i64: 32, 32>}, {pipeline_mode = #tpu.pipeline_mode<synchronous>, transform_indices = @transform_11, window_bounds = array<i64: 1, 32>}, {pipeline_mode = #tpu.pipeline_mode<synchronous>, transform_indices = @transform_12, window_bounds = array<i64: 1, 32>}, {pipeline_mode = #tpu.pipeline_mode<synchronous>, transform_indices = @transform_13, window_bounds = array<i64: 1, 32>}, {pipeline_mode = #tpu.pipeline_mode<synchronous>, transform_indices = @transform_14, window_bounds = array<i64: 32, 32>}, {pipeline_mode = #tpu.pipeline_mode<synchronous>, transform_indices = @transform_15, window_bounds = array<i64: 1, 32>}, {pipeline_mode = #tpu.pipeline_mode<synchronous>, transform_indices = @transform_16, window_bounds = array<i64: 32, 32>}, {pipeline_mode = #tpu.pipeline_mode<synchronous>, transform_indices = @transform_17, window_bounds = array<i64: 1, 32>}, {pipeline_mode = #tpu.pipeline_mode<synchronous>, transform_indices = @transform_18, window_bounds = array<i64: 32, 32>}, {pipeline_mode = #tpu.pipeline_mode<synchronous>, transform_indices = @transform_19, window_bounds = array<i64: 1, 32>}, {pipeline_mode = #tpu.pipeline_mode<synchronous>, transform_indices = @transform_20, window_bounds = array<i64: 32, 32>}, {pipeline_mode = #tpu.pipeline_mode<synchronous>, transform_indices = @transform_21, window_bounds = array<i64: 1, 32>}, {pipeline_mode = #tpu.pipeline_mode<synchronous>, transform_indices = @transform_22, window_bounds = array<i64: 1, 32>}, {pipeline_mode = #tpu.pipeline_mode<synchronous>, transform_indices = @transform_23, window_bounds = array<i64: 1, 32>}, {pipeline_mode = #tpu.pipeline_mode<synchronous>, transform_indices = @transform_24, window_bounds = array<i64: 32, 64>}, {pipeline_mode = #tpu.pipeline_mode<synchronous>, transform_indices = @transform_25, window_bounds = array<i64: 1, 64>}, {pipeline_mode = #tpu.pipeline_mode<synchronous>, transform_indices = @transform_26, window_bounds = array<i64: 64, 32>}, {pipeline_mode = #tpu.pipeline_mode<synchronous>, transform_indices = @transform_27, window_bounds = array<i64: 1, 32>}, {transform_indices = @transform_28, window_bounds = array<i64: 1, 8, 32>}]} {
    %c0_i32 = arith.constant 0 : i32
    %0 = arith.cmpi eq, %arg1, %c0_i32 : i32
    %1 = arith.extui %0 : i1 to i32
    %c0_i32_0 = arith.constant 0 : i32
    %2 = arith.cmpi ne, %1, %c0_i32_0 : i32
    scf.if %2 {
      %c0_88 = arith.constant 0 : index
      %c0_89 = arith.constant 0 : index
      %c0_90 = arith.constant 0 : index
      %237 = vector.load %arg4[%c0_88, %c0_89, %c0_90] : memref<1x8x32xbf16, #tpu.memory_space<vmem>>, vector<1x8x32xbf16>
      %238 = vector.shape_cast %237 : vector<1x8x32xbf16> to vector<8x32xbf16>
      %239 = arith.extf %238 : vector<8x32xbf16> to vector<8x32xf32>
      %c0_91 = arith.constant 0 : index
      %c0_92 = arith.constant 0 : index
      %240 = vector.load %arg6[%c0_91, %c0_92] : memref<1x32xf32, #tpu.memory_space<vmem>>, vector<1x32xf32>
      %c0_93 = arith.constant 0 : index
      %c0_94 = arith.constant 0 : index
      %241 = vector.load %arg7[%c0_93, %c0_94] : memref<1x32xf32, #tpu.memory_space<vmem>>, vector<1x32xf32>
      %cst_95 = arith.constant dense<0.000000e+00> : vector<8xf32>
      %242 = vector.multi_reduction <add>, %239, %cst_95 [1] : vector<8x32xf32> to vector<8xf32>
      %243 = vector.shape_cast %242 : vector<8xf32> to vector<8x1xf32>
      %cst_96 = arith.constant 3.200000e+01 : f32
      %244 = vector.broadcast %cst_96 : f32 to vector<8x1xf32>
      %245 = arith.divf %243, %244 : vector<8x1xf32>
      %246 = vector.broadcast %245 : vector<8x1xf32> to vector<8x32xf32>
      %247 = arith.subf %239, %246 : vector<8x32xf32>
      %248 = arith.mulf %247, %247 : vector<8x32xf32>
      %cst_97 = arith.constant dense<0.000000e+00> : vector<8xf32>
      %249 = vector.multi_reduction <add>, %248, %cst_97 [1] : vector<8x32xf32> to vector<8xf32>
      %250 = vector.shape_cast %249 : vector<8xf32> to vector<8x1xf32>
      %cst_98 = arith.constant 3.200000e+01 : f32
      %251 = vector.broadcast %cst_98 : f32 to vector<8x1xf32>
      %252 = arith.divf %250, %251 : vector<8x1xf32>
      %253 = vector.broadcast %245 : vector<8x1xf32> to vector<8x32xf32>
      %254 = arith.subf %239, %253 : vector<8x32xf32>
      %cst_99 = arith.constant 9.99999974E-6 : f32
      %255 = vector.broadcast %cst_99 : f32 to vector<8x1xf32>
      %256 = arith.addf %252, %255 : vector<8x1xf32>
      %257 = math.rsqrt %256 : vector<8x1xf32>
      %258 = vector.broadcast %257 : vector<8x1xf32> to vector<8x32xf32>
      %259 = arith.mulf %254, %258 : vector<8x32xf32>
      %260 = vector.broadcast %240 : vector<1x32xf32> to vector<8x32xf32>
      %261 = arith.mulf %259, %260 : vector<8x32xf32>
      %262 = vector.broadcast %241 : vector<1x32xf32> to vector<8x32xf32>
      %263 = arith.addf %261, %262 : vector<8x32xf32>
      %264 = arith.truncf %263 : vector<8x32xf32> to vector<8x32xbf16>
      %c0_100 = arith.constant 0 : index
      %c0_101 = arith.constant 0 : index
      %265 = vector.load %arg10[%c0_100, %c0_101] : memref<32x32xbf16, #tpu.memory_space<vmem>>, vector<32x32xbf16>
      %cst_102 = arith.constant dense<0.000000e+00> : vector<8x32xf32>
      %266 = tpu.matmul %264, %265, %cst_102 {dimension_numbers = #tpu.dot_dimension_numbers<[1], [0], [0], [1], [0, 0, 1, 1], [], []>} : vector<8x32xbf16>, vector<32x32xbf16>, vector<8x32xf32> -> vector<8x32xf32>
      %c0_103 = arith.constant 0 : index
      %c0_104 = arith.constant 0 : index
      %267 = vector.load %arg11[%c0_103, %c0_104] : memref<1x32xf32, #tpu.memory_space<vmem>>, vector<1x32xf32>
      %268 = vector.broadcast %267 : vector<1x32xf32> to vector<8x32xf32>
      %269 = arith.addf %266, %268 : vector<8x32xf32>
      %270 = arith.truncf %269 : vector<8x32xf32> to vector<8x32xbf16>
      %c0_105 = arith.constant 0 : index
      %c0_106 = arith.constant 0 : index
      %271 = vector.load %arg12[%c0_105, %c0_106] : memref<32x32xbf16, #tpu.memory_space<vmem>>, vector<32x32xbf16>
      %cst_107 = arith.constant dense<0.000000e+00> : vector<8x32xf32>
      %272 = tpu.matmul %264, %271, %cst_107 {dimension_numbers = #tpu.dot_dimension_numbers<[1], [0], [0], [1], [0, 0, 1, 1], [], []>} : vector<8x32xbf16>, vector<32x32xbf16>, vector<8x32xf32> -> vector<8x32xf32>
      %c0_108 = arith.constant 0 : index
      %c0_109 = arith.constant 0 : index
      %273 = vector.load %arg13[%c0_108, %c0_109] : memref<1x32xf32, #tpu.memory_space<vmem>>, vector<1x32xf32>
      %274 = vector.broadcast %273 : vector<1x32xf32> to vector<8x32xf32>
      %275 = arith.addf %272, %274 : vector<8x32xf32>
      %276 = arith.truncf %275 : vector<8x32xf32> to vector<8x32xbf16>
      %277 = vector.extract_strided_slice %270 {offsets = [0, 0], sizes = [8, 8], strides = [1, 1]} : vector<8x32xbf16> to vector<8x8xbf16>
      %278 = vector.shape_cast %277 : vector<8x8xbf16> to vector<1x8x8xbf16>
      %279 = vector.extract_strided_slice %270 {offsets = [0, 8], sizes = [8, 8], strides = [1, 1]} : vector<8x32xbf16> to vector<8x8xbf16>
      %280 = vector.shape_cast %279 : vector<8x8xbf16> to vector<1x8x8xbf16>
      %281 = vector.extract_strided_slice %270 {offsets = [0, 16], sizes = [8, 8], strides = [1, 1]} : vector<8x32xbf16> to vector<8x8xbf16>
      %282 = vector.shape_cast %281 : vector<8x8xbf16> to vector<1x8x8xbf16>
      %283 = vector.extract_strided_slice %270 {offsets = [0, 24], sizes = [8, 8], strides = [1, 1]} : vector<8x32xbf16> to vector<8x8xbf16>
      %284 = vector.shape_cast %283 : vector<8x8xbf16> to vector<1x8x8xbf16>
      %285 = tpu.concatenate %278, %280, %282, %284 in 0 : vector<1x8x8xbf16>, vector<1x8x8xbf16>, vector<1x8x8xbf16>, vector<1x8x8xbf16> -> vector<4x8x8xbf16>
      %c0_110 = arith.constant 0 : index
      %c0_111 = arith.constant 0 : index
      %c0_112 = arith.constant 0 : index
      %286 = vector.load %arg33[%c0_110, %c0_111, %c0_112] : memref<4x8x8xbf16, #tpu.memory_space<vmem>>, vector<4x8x8xbf16>
      tpu.vector_store %arg33[%c0_110, %c0_111, %c0_112], %285 {strides = array<i32>} : memref<4x8x8xbf16, #tpu.memory_space<vmem>>, vector<4x8x8xbf16>,
      %287 = vector.extract_strided_slice %276 {offsets = [0, 0], sizes = [8, 8], strides = [1, 1]} : vector<8x32xbf16> to vector<8x8xbf16>
      %288 = vector.shape_cast %287 : vector<8x8xbf16> to vector<1x8x8xbf16>
      %289 = vector.extract_strided_slice %276 {offsets = [0, 8], sizes = [8, 8], strides = [1, 1]} : vector<8x32xbf16> to vector<8x8xbf16>
      %290 = vector.shape_cast %289 : vector<8x8xbf16> to vector<1x8x8xbf16>
      %291 = vector.extract_strided_slice %276 {offsets = [0, 16], sizes = [8, 8], strides = [1, 1]} : vector<8x32xbf16> to vector<8x8xbf16>
      %292 = vector.shape_cast %291 : vector<8x8xbf16> to vector<1x8x8xbf16>
      %293 = vector.extract_strided_slice %276 {offsets = [0, 24], sizes = [8, 8], strides = [1, 1]} : vector<8x32xbf16> to vector<8x8xbf16>
      %294 = vector.shape_cast %293 : vector<8x8xbf16> to vector<1x8x8xbf16>
      %295 = tpu.concatenate %288, %290, %292, %294 in 0 : vector<1x8x8xbf16>, vector<1x8x8xbf16>, vector<1x8x8xbf16>, vector<1x8x8xbf16> -> vector<4x8x8xbf16>
      %c0_113 = arith.constant 0 : index
      %c0_114 = arith.constant 0 : index
      %c0_115 = arith.constant 0 : index
      %296 = vector.load %arg34[%c0_113, %c0_114, %c0_115] : memref<4x8x8xbf16, #tpu.memory_space<vmem>>, vector<4x8x8xbf16>
      tpu.vector_store %arg34[%c0_113, %c0_114, %c0_115], %295 {strides = array<i32>} : memref<4x8x8xbf16, #tpu.memory_space<vmem>>, vector<4x8x8xbf16>,
      %c0_116 = arith.constant 0 : index
      %c0_117 = arith.constant 0 : index
      %c0_118 = arith.constant 0 : index
      %297 = vector.load %arg5[%c0_116, %c0_117, %c0_118] : memref<1x10x32xbf16, #tpu.memory_space<vmem>>, vector<1x10x32xbf16>
      %298 = vector.shape_cast %297 : vector<1x10x32xbf16> to vector<10x32xbf16>
      %c0_119 = arith.constant 0 : index
      %c0_120 = arith.constant 0 : index
      %299 = vector.load %arg20[%c0_119, %c0_120] : memref<32x32xbf16, #tpu.memory_space<vmem>>, vector<32x32xbf16>
      %cst_121 = arith.constant dense<0.000000e+00> : vector<10x32xf32>
      %300 = tpu.matmul %298, %299, %cst_121 {dimension_numbers = #tpu.dot_dimension_numbers<[1], [0], [0], [1], [0, 0, 1, 1], [], []>} : vector<10x32xbf16>, vector<32x32xbf16>, vector<10x32xf32> -> vector<10x32xf32>
      %c0_122 = arith.constant 0 : index
      %c0_123 = arith.constant 0 : index
      %301 = vector.load %arg21[%c0_122, %c0_123] : memref<1x32xf32, #tpu.memory_space<vmem>>, vector<1x32xf32>
      %302 = vector.broadcast %301 : vector<1x32xf32> to vector<10x32xf32>
      %303 = arith.addf %300, %302 : vector<10x32xf32>
      %304 = arith.truncf %303 : vector<10x32xf32> to vector<10x32xbf16>
      %c0_124 = arith.constant 0 : index
      %c0_125 = arith.constant 0 : index
      %305 = vector.load %arg22[%c0_124, %c0_125] : memref<32x32xbf16, #tpu.memory_space<vmem>>, vector<32x32xbf16>
      %cst_126 = arith.constant dense<0.000000e+00> : vector<10x32xf32>
      %306 = tpu.matmul %298, %305, %cst_126 {dimension_numbers = #tpu.dot_dimension_numbers<[1], [0], [0], [1], [0, 0, 1, 1], [], []>} : vector<10x32xbf16>, vector<32x32xbf16>, vector<10x32xf32> -> vector<10x32xf32>
      %c0_127 = arith.constant 0 : index
      %c0_128 = arith.constant 0 : index
      %307 = vector.load %arg23[%c0_127, %c0_128] : memref<1x32xf32, #tpu.memory_space<vmem>>, vector<1x32xf32>
      %308 = vector.broadcast %307 : vector<1x32xf32> to vector<10x32xf32>
      %309 = arith.addf %306, %308 : vector<10x32xf32>
      %310 = arith.truncf %309 : vector<10x32xf32> to vector<10x32xbf16>
      %311 = vector.extract_strided_slice %304 {offsets = [0, 0], sizes = [10, 8], strides = [1, 1]} : vector<10x32xbf16> to vector<10x8xbf16>
      %312 = vector.shape_cast %311 : vector<10x8xbf16> to vector<1x10x8xbf16>
      %313 = vector.extract_strided_slice %304 {offsets = [0, 8], sizes = [10, 8], strides = [1, 1]} : vector<10x32xbf16> to vector<10x8xbf16>
      %314 = vector.shape_cast %313 : vector<10x8xbf16> to vector<1x10x8xbf16>
      %315 = vector.extract_strided_slice %304 {offsets = [0, 16], sizes = [10, 8], strides = [1, 1]} : vector<10x32xbf16> to vector<10x8xbf16>
      %316 = vector.shape_cast %315 : vector<10x8xbf16> to vector<1x10x8xbf16>
      %317 = vector.extract_strided_slice %304 {offsets = [0, 24], sizes = [10, 8], strides = [1, 1]} : vector<10x32xbf16> to vector<10x8xbf16>
      %318 = vector.shape_cast %317 : vector<10x8xbf16> to vector<1x10x8xbf16>
      %319 = tpu.concatenate %312, %314, %316, %318 in 0 : vector<1x10x8xbf16>, vector<1x10x8xbf16>, vector<1x10x8xbf16>, vector<1x10x8xbf16> -> vector<4x10x8xbf16>
      %c0_129 = arith.constant 0 : index
      %c0_130 = arith.constant 0 : index
      %c0_131 = arith.constant 0 : index
      %320 = vector.load %arg35[%c0_129, %c0_130, %c0_131] : memref<4x10x8xbf16, #tpu.memory_space<vmem>>, vector<4x10x8xbf16>
      tpu.vector_store %arg35[%c0_129, %c0_130, %c0_131], %319 {strides = array<i32>} : memref<4x10x8xbf16, #tpu.memory_space<vmem>>, vector<4x10x8xbf16>,
      %321 = vector.extract_strided_slice %310 {offsets = [0, 0], sizes = [10, 8], strides = [1, 1]} : vector<10x32xbf16> to vector<10x8xbf16>
      %322 = vector.shape_cast %321 : vector<10x8xbf16> to vector<1x10x8xbf16>
      %323 = vector.extract_strided_slice %310 {offsets = [0, 8], sizes = [10, 8], strides = [1, 1]} : vector<10x32xbf16> to vector<10x8xbf16>
      %324 = vector.shape_cast %323 : vector<10x8xbf16> to vector<1x10x8xbf16>
      %325 = vector.extract_strided_slice %310 {offsets = [0, 16], sizes = [10, 8], strides = [1, 1]} : vector<10x32xbf16> to vector<10x8xbf16>
      %326 = vector.shape_cast %325 : vector<10x8xbf16> to vector<1x10x8xbf16>
      %327 = vector.extract_strided_slice %310 {offsets = [0, 24], sizes = [10, 8], strides = [1, 1]} : vector<10x32xbf16> to vector<10x8xbf16>
      %328 = vector.shape_cast %327 : vector<10x8xbf16> to vector<1x10x8xbf16>
      %329 = tpu.concatenate %322, %324, %326, %328 in 0 : vector<1x10x8xbf16>, vector<1x10x8xbf16>, vector<1x10x8xbf16>, vector<1x10x8xbf16> -> vector<4x10x8xbf16>
      %c0_132 = arith.constant 0 : index
      %c0_133 = arith.constant 0 : index
      %c0_134 = arith.constant 0 : index
      %330 = vector.load %arg36[%c0_132, %c0_133, %c0_134] : memref<4x10x8xbf16, #tpu.memory_space<vmem>>, vector<4x10x8xbf16>
      tpu.vector_store %arg36[%c0_132, %c0_133, %c0_134], %329 {strides = array<i32>} : memref<4x10x8xbf16, #tpu.memory_space<vmem>>, vector<4x10x8xbf16>,
    } else {
    }
    %c8_i32 = arith.constant 8 : i32
    %3 = arith.muli %arg1, %c8_i32 : i32
    %4 = tpu.assume_multiple %3, 8 : i32
    %c0 = arith.constant 0 : index
    %5 = arith.index_cast %4 : i32 to index
    %c0_1 = arith.constant 0 : index
    %6 = vector.load %arg4[%c0, %5, %c0_1] : memref<1x8x32xbf16, #tpu.memory_space<vmem>>, vector<1x8x32xbf16>
    %7 = vector.shape_cast %6 : vector<1x8x32xbf16> to vector<8x32xbf16>
    %8 = arith.extf %7 : vector<8x32xbf16> to vector<8x32xf32>
    %c0_2 = arith.constant 0 : index
    %c0_3 = arith.constant 0 : index
    %9 = vector.load %arg6[%c0_2, %c0_3] : memref<1x32xf32, #tpu.memory_space<vmem>>, vector<1x32xf32>
    %c0_4 = arith.constant 0 : index
    %c0_5 = arith.constant 0 : index
    %10 = vector.load %arg7[%c0_4, %c0_5] : memref<1x32xf32, #tpu.memory_space<vmem>>, vector<1x32xf32>
    %cst = arith.constant dense<0.000000e+00> : vector<8xf32>
    %11 = vector.multi_reduction <add>, %8, %cst [1] : vector<8x32xf32> to vector<8xf32>
    %12 = vector.shape_cast %11 : vector<8xf32> to vector<8x1xf32>
    %cst_6 = arith.constant 3.200000e+01 : f32
    %13 = vector.broadcast %cst_6 : f32 to vector<8x1xf32>
    %14 = arith.divf %12, %13 : vector<8x1xf32>
    %15 = vector.broadcast %14 : vector<8x1xf32> to vector<8x32xf32>
    %16 = arith.subf %8, %15 : vector<8x32xf32>
    %17 = arith.mulf %16, %16 : vector<8x32xf32>
    %cst_7 = arith.constant dense<0.000000e+00> : vector<8xf32>
    %18 = vector.multi_reduction <add>, %17, %cst_7 [1] : vector<8x32xf32> to vector<8xf32>
    %19 = vector.shape_cast %18 : vector<8xf32> to vector<8x1xf32>
    %cst_8 = arith.constant 3.200000e+01 : f32
    %20 = vector.broadcast %cst_8 : f32 to vector<8x1xf32>
    %21 = arith.divf %19, %20 : vector<8x1xf32>
    %22 = vector.broadcast %14 : vector<8x1xf32> to vector<8x32xf32>
    %23 = arith.subf %8, %22 : vector<8x32xf32>
    %cst_9 = arith.constant 9.99999974E-6 : f32
    %24 = vector.broadcast %cst_9 : f32 to vector<8x1xf32>
    %25 = arith.addf %21, %24 : vector<8x1xf32>
    %26 = math.rsqrt %25 : vector<8x1xf32>
    %27 = vector.broadcast %26 : vector<8x1xf32> to vector<8x32xf32>
    %28 = arith.mulf %23, %27 : vector<8x32xf32>
    %29 = vector.broadcast %9 : vector<1x32xf32> to vector<8x32xf32>
    %30 = arith.mulf %28, %29 : vector<8x32xf32>
    %31 = vector.broadcast %10 : vector<1x32xf32> to vector<8x32xf32>
    %32 = arith.addf %30, %31 : vector<8x32xf32>
    %33 = arith.truncf %32 : vector<8x32xf32> to vector<8x32xbf16>
    %c0_10 = arith.constant 0 : index
    %c0_11 = arith.constant 0 : index
    %34 = vector.load %arg8[%c0_10, %c0_11] : memref<32x32xbf16, #tpu.memory_space<vmem>>, vector<32x32xbf16>
    %cst_12 = arith.constant dense<0.000000e+00> : vector<8x32xf32>
    %35 = tpu.matmul %33, %34, %cst_12 {dimension_numbers = #tpu.dot_dimension_numbers<[1], [0], [0], [1], [0, 0, 1, 1], [], []>} : vector<8x32xbf16>, vector<32x32xbf16>, vector<8x32xf32> -> vector<8x32xf32>
    %c0_13 = arith.constant 0 : index
    %c0_14 = arith.constant 0 : index
    %36 = vector.load %arg9[%c0_13, %c0_14] : memref<1x32xf32, #tpu.memory_space<vmem>>, vector<1x32xf32>
    %37 = vector.broadcast %36 : vector<1x32xf32> to vector<8x32xf32>
    %38 = arith.addf %35, %37 : vector<8x32xf32>
    %cst_15 = arith.constant 0.353553385 : f32
    %39 = vector.broadcast %cst_15 : f32 to vector<8x32xf32>
    %40 = arith.mulf %38, %39 : vector<8x32xf32>
    %41 = arith.truncf %40 : vector<8x32xf32> to vector<8x32xbf16>
    %42 = vector.extract_strided_slice %41 {offsets = [0, 0], sizes = [8, 8], strides = [1, 1]} : vector<8x32xbf16> to vector<8x8xbf16>
    %43 = vector.shape_cast %42 : vector<8x8xbf16> to vector<1x8x8xbf16>
    %44 = vector.extract_strided_slice %41 {offsets = [0, 8], sizes = [8, 8], strides = [1, 1]} : vector<8x32xbf16> to vector<8x8xbf16>
    %45 = vector.shape_cast %44 : vector<8x8xbf16> to vector<1x8x8xbf16>
    %46 = vector.extract_strided_slice %41 {offsets = [0, 16], sizes = [8, 8], strides = [1, 1]} : vector<8x32xbf16> to vector<8x8xbf16>
    %47 = vector.shape_cast %46 : vector<8x8xbf16> to vector<1x8x8xbf16>
    %48 = vector.extract_strided_slice %41 {offsets = [0, 24], sizes = [8, 8], strides = [1, 1]} : vector<8x32xbf16> to vector<8x8xbf16>
    %49 = vector.shape_cast %48 : vector<8x8xbf16> to vector<1x8x8xbf16>
    %50 = tpu.concatenate %43, %45, %47, %49 in 0 : vector<1x8x8xbf16>, vector<1x8x8xbf16>, vector<1x8x8xbf16>, vector<1x8x8xbf16> -> vector<4x8x8xbf16>
    %51 = arith.index_cast %arg0 : i32 to index
    %52 = memref.load %arg2[%51] : memref<2xi32, #tpu.memory_space<smem>>
    %53 = tpu.iota {dimensions = array<i32: 0>} : vector<8x8xi32>
    %54 = vector.broadcast %4 : i32 to vector<8x8xi32>
    %55 = arith.addi %54, %53 : vector<8x8xi32>
    %56 = tpu.iota {dimensions = array<i32: 1>} : vector<8x8xi32>
    %57 = arith.cmpi sle, %56, %55 : vector<8x8xi32>
    %58 = vector.broadcast %52 : i32 to vector<8x8xi32>
    %59 = arith.cmpi slt, %56, %58 : vector<8x8xi32>
    %60 = arith.andi %57, %59 : vector<8x8xi1>
    %c0_16 = arith.constant 0 : index
    %c0_17 = arith.constant 0 : index
    %c0_18 = arith.constant 0 : index
    %61 = vector.load %arg33[%c0_16, %c0_17, %c0_18] : memref<4x8x8xbf16, #tpu.memory_space<vmem>>, vector<4x8x8xbf16>
    %c0_19 = arith.constant 0 : index
    %c0_20 = arith.constant 0 : index
    %c0_21 = arith.constant 0 : index
    %62 = vector.load %arg34[%c0_19, %c0_20, %c0_21] : memref<4x8x8xbf16, #tpu.memory_space<vmem>>, vector<4x8x8xbf16>
    %cst_22 = arith.constant dense<0.000000e+00> : vector<4x8x8xf32>
    %63 = tpu.matmul %50, %61, %cst_22 {dimension_numbers = #tpu.dot_dimension_numbers<[2], [2], [1], [1], [0, 0, 0, 1, 1, 1], [0], [0]>} : vector<4x8x8xbf16>, vector<4x8x8xbf16>, vector<4x8x8xf32> -> vector<4x8x8xf32>
    %64 = vector.shape_cast %60 : vector<8x8xi1> to vector<1x8x8xi1>
    %cst_23 = arith.constant -1.000000e+30 : f32
    %65 = vector.shape_cast %64 : vector<1x8x8xi1> to vector<1x8x8xi1>
    %66 = vector.broadcast %65 : vector<1x8x8xi1> to vector<4x8x8xi1>
    %67 = vector.broadcast %cst_23 : f32 to vector<4x8x8xf32>
    %68 = arith.select %66, %63, %67 : vector<4x8x8xi1>, vector<4x8x8xf32>
    %cst_24 = arith.constant dense<0xFF800000> : vector<4x8xf32>
    %69 = vector.multi_reduction <maximumf>, %68, %cst_24 [2] : vector<4x8x8xf32> to vector<4x8xf32>
    %70 = vector.shape_cast %69 : vector<4x8xf32> to vector<4x8x1xf32>
    %71 = vector.broadcast %70 : vector<4x8x1xf32> to vector<4x8x8xf32>
    %72 = arith.subf %68, %71 : vector<4x8x8xf32>
    %73 = math.exp %72 : vector<4x8x8xf32>
    %74 = vector.shape_cast %60 : vector<8x8xi1> to vector<1x8x8xi1>
    %75 = arith.extui %74 : vector<1x8x8xi1> to vector<1x8x8xi32>
    %76 = arith.sitofp %75 : vector<1x8x8xi32> to vector<1x8x8xf32>
    %77 = vector.broadcast %76 : vector<1x8x8xf32> to vector<4x8x8xf32>
    %78 = arith.mulf %73, %77 : vector<4x8x8xf32>
    %cst_25 = arith.constant dense<0.000000e+00> : vector<4x8xf32>
    %79 = vector.multi_reduction <add>, %78, %cst_25 [2] : vector<4x8x8xf32> to vector<4x8xf32>
    %80 = vector.shape_cast %79 : vector<4x8xf32> to vector<4x8x1xf32>
    %cst_26 = arith.constant 1.000000e-30 : f32
    %81 = vector.broadcast %cst_26 : f32 to vector<4x8x1xf32>
    %82 = arith.addf %80, %81 : vector<4x8x1xf32>
    %83 = tpu.reciprocal %82 {approx = true} : vector<4x8x1xf32> -> vector<4x8x1xf32>
    %84 = vector.broadcast %83 : vector<4x8x1xf32> to vector<4x8x8xf32>
    %85 = arith.mulf %78, %84 : vector<4x8x8xf32>
    %86 = arith.truncf %85 : vector<4x8x8xf32> to vector<4x8x8xbf16>
    %cst_27 = arith.constant dense<0.000000e+00> : vector<4x8x8xf32>
    %87 = tpu.matmul %86, %62, %cst_27 {dimension_numbers = #tpu.dot_dimension_numbers<[2], [1], [1], [2], [0, 0, 0, 1, 1, 2], [0], [0]>} : vector<4x8x8xbf16>, vector<4x8x8xbf16>, vector<4x8x8xf32> -> vector<4x8x8xf32>
    %88 = vector.extract_strided_slice %87 {offsets = [0, 0, 0], sizes = [1, 8, 8], strides = [1, 1, 1]} : vector<4x8x8xf32> to vector<1x8x8xf32>
    %89 = vector.shape_cast %88 : vector<1x8x8xf32> to vector<8x8xf32>
    %90 = vector.extract_strided_slice %87 {offsets = [1, 0, 0], sizes = [1, 8, 8], strides = [1, 1, 1]} : vector<4x8x8xf32> to vector<1x8x8xf32>
    %91 = vector.shape_cast %90 : vector<1x8x8xf32> to vector<8x8xf32>
    %92 = vector.extract_strided_slice %87 {offsets = [2, 0, 0], sizes = [1, 8, 8], strides = [1, 1, 1]} : vector<4x8x8xf32> to vector<1x8x8xf32>
    %93 = vector.shape_cast %92 : vector<1x8x8xf32> to vector<8x8xf32>
    %94 = vector.extract_strided_slice %87 {offsets = [3, 0, 0], sizes = [1, 8, 8], strides = [1, 1, 1]} : vector<4x8x8xf32> to vector<1x8x8xf32>
    %95 = vector.shape_cast %94 : vector<1x8x8xf32> to vector<8x8xf32>
    %96 = tpu.concatenate %89, %91, %93, %95 in 1 : vector<8x8xf32>, vector<8x8xf32>, vector<8x8xf32>, vector<8x8xf32> -> vector<8x32xf32>
    %97 = arith.truncf %96 : vector<8x32xf32> to vector<8x32xbf16>
    %c0_28 = arith.constant 0 : index
    %c0_29 = arith.constant 0 : index
    %98 = vector.load %arg14[%c0_28, %c0_29] : memref<32x32xbf16, #tpu.memory_space<vmem>>, vector<32x32xbf16>
    %cst_30 = arith.constant dense<0.000000e+00> : vector<8x32xf32>
    %99 = tpu.matmul %97, %98, %cst_30 {dimension_numbers = #tpu.dot_dimension_numbers<[1], [0], [0], [1], [0, 0, 1, 1], [], []>} : vector<8x32xbf16>, vector<32x32xbf16>, vector<8x32xf32> -> vector<8x32xf32>
    %c0_31 = arith.constant 0 : index
    %c0_32 = arith.constant 0 : index
    %100 = vector.load %arg15[%c0_31, %c0_32] : memref<1x32xf32, #tpu.memory_space<vmem>>, vector<1x32xf32>
    %101 = vector.broadcast %100 : vector<1x32xf32> to vector<8x32xf32>
    %102 = arith.addf %99, %101 : vector<8x32xf32>
    %103 = arith.addf %8, %102 : vector<8x32xf32>
    %c0_33 = arith.constant 0 : index
    %c0_34 = arith.constant 0 : index
    %104 = vector.load %arg16[%c0_33, %c0_34] : memref<1x32xf32, #tpu.memory_space<vmem>>, vector<1x32xf32>
    %c0_35 = arith.constant 0 : index
    %c0_36 = arith.constant 0 : index
    %105 = vector.load %arg17[%c0_35, %c0_36] : memref<1x32xf32, #tpu.memory_space<vmem>>, vector<1x32xf32>
    %cst_37 = arith.constant dense<0.000000e+00> : vector<8xf32>
    %106 = vector.multi_reduction <add>, %103, %cst_37 [1] : vector<8x32xf32> to vector<8xf32>
    %107 = vector.shape_cast %106 : vector<8xf32> to vector<8x1xf32>
    %cst_38 = arith.constant 3.200000e+01 : f32
    %108 = vector.broadcast %cst_38 : f32 to vector<8x1xf32>
    %109 = arith.divf %107, %108 : vector<8x1xf32>
    %110 = vector.broadcast %109 : vector<8x1xf32> to vector<8x32xf32>
    %111 = arith.subf %103, %110 : vector<8x32xf32>
    %112 = arith.mulf %111, %111 : vector<8x32xf32>
    %cst_39 = arith.constant dense<0.000000e+00> : vector<8xf32>
    %113 = vector.multi_reduction <add>, %112, %cst_39 [1] : vector<8x32xf32> to vector<8xf32>
    %114 = vector.shape_cast %113 : vector<8xf32> to vector<8x1xf32>
    %cst_40 = arith.constant 3.200000e+01 : f32
    %115 = vector.broadcast %cst_40 : f32 to vector<8x1xf32>
    %116 = arith.divf %114, %115 : vector<8x1xf32>
    %117 = vector.broadcast %109 : vector<8x1xf32> to vector<8x32xf32>
    %118 = arith.subf %103, %117 : vector<8x32xf32>
    %cst_41 = arith.constant 9.99999974E-6 : f32
    %119 = vector.broadcast %cst_41 : f32 to vector<8x1xf32>
    %120 = arith.addf %116, %119 : vector<8x1xf32>
    %121 = math.rsqrt %120 : vector<8x1xf32>
    %122 = vector.broadcast %121 : vector<8x1xf32> to vector<8x32xf32>
    %123 = arith.mulf %118, %122 : vector<8x32xf32>
    %124 = vector.broadcast %104 : vector<1x32xf32> to vector<8x32xf32>
    %125 = arith.mulf %123, %124 : vector<8x32xf32>
    %126 = vector.broadcast %105 : vector<1x32xf32> to vector<8x32xf32>
    %127 = arith.addf %125, %126 : vector<8x32xf32>
    %128 = arith.truncf %127 : vector<8x32xf32> to vector<8x32xbf16>
    %c0_42 = arith.constant 0 : index
    %c0_43 = arith.constant 0 : index
    %129 = vector.load %arg18[%c0_42, %c0_43] : memref<32x32xbf16, #tpu.memory_space<vmem>>, vector<32x32xbf16>
    %cst_44 = arith.constant dense<0.000000e+00> : vector<8x32xf32>
    %130 = tpu.matmul %128, %129, %cst_44 {dimension_numbers = #tpu.dot_dimension_numbers<[1], [0], [0], [1], [0, 0, 1, 1], [], []>} : vector<8x32xbf16>, vector<32x32xbf16>, vector<8x32xf32> -> vector<8x32xf32>
    %c0_45 = arith.constant 0 : index
    %c0_46 = arith.constant 0 : index
    %131 = vector.load %arg19[%c0_45, %c0_46] : memref<1x32xf32, #tpu.memory_space<vmem>>, vector<1x32xf32>
    %132 = vector.broadcast %131 : vector<1x32xf32> to vector<8x32xf32>
    %133 = arith.addf %130, %132 : vector<8x32xf32>
    %cst_47 = arith.constant 0.353553385 : f32
    %134 = vector.broadcast %cst_47 : f32 to vector<8x32xf32>
    %135 = arith.mulf %133, %134 : vector<8x32xf32>
    %136 = arith.truncf %135 : vector<8x32xf32> to vector<8x32xbf16>
    %137 = vector.extract_strided_slice %136 {offsets = [0, 0], sizes = [8, 8], strides = [1, 1]} : vector<8x32xbf16> to vector<8x8xbf16>
    %138 = vector.shape_cast %137 : vector<8x8xbf16> to vector<1x8x8xbf16>
    %139 = vector.extract_strided_slice %136 {offsets = [0, 8], sizes = [8, 8], strides = [1, 1]} : vector<8x32xbf16> to vector<8x8xbf16>
    %140 = vector.shape_cast %139 : vector<8x8xbf16> to vector<1x8x8xbf16>
    %141 = vector.extract_strided_slice %136 {offsets = [0, 16], sizes = [8, 8], strides = [1, 1]} : vector<8x32xbf16> to vector<8x8xbf16>
    %142 = vector.shape_cast %141 : vector<8x8xbf16> to vector<1x8x8xbf16>
    %143 = vector.extract_strided_slice %136 {offsets = [0, 24], sizes = [8, 8], strides = [1, 1]} : vector<8x32xbf16> to vector<8x8xbf16>
    %144 = vector.shape_cast %143 : vector<8x8xbf16> to vector<1x8x8xbf16>
    %145 = tpu.concatenate %138, %140, %142, %144 in 0 : vector<1x8x8xbf16>, vector<1x8x8xbf16>, vector<1x8x8xbf16>, vector<1x8x8xbf16> -> vector<4x8x8xbf16>
    %146 = tpu.iota {dimensions = array<i32: 1>} : vector<8x10xi32>
    %147 = arith.index_cast %arg0 : i32 to index
    %148 = memref.load %arg3[%147] : memref<2xi32, #tpu.memory_space<smem>>
    %149 = vector.broadcast %148 : i32 to vector<8x10xi32>
    %150 = arith.cmpi slt, %146, %149 : vector<8x10xi32>
    %c0_48 = arith.constant 0 : index
    %c0_49 = arith.constant 0 : index
    %c0_50 = arith.constant 0 : index
    %151 = vector.load %arg35[%c0_48, %c0_49, %c0_50] : memref<4x10x8xbf16, #tpu.memory_space<vmem>>, vector<4x10x8xbf16>
    %c0_51 = arith.constant 0 : index
    %c0_52 = arith.constant 0 : index
    %c0_53 = arith.constant 0 : index
    %152 = vector.load %arg36[%c0_51, %c0_52, %c0_53] : memref<4x10x8xbf16, #tpu.memory_space<vmem>>, vector<4x10x8xbf16>
    %cst_54 = arith.constant dense<0.000000e+00> : vector<4x8x10xf32>
    %153 = tpu.matmul %145, %151, %cst_54 {dimension_numbers = #tpu.dot_dimension_numbers<[2], [2], [1], [1], [0, 0, 0, 1, 1, 1], [0], [0]>} : vector<4x8x8xbf16>, vector<4x10x8xbf16>, vector<4x8x10xf32> -> vector<4x8x10xf32>
    %154 = vector.shape_cast %150 : vector<8x10xi1> to vector<1x8x10xi1>
    %cst_55 = arith.constant -1.000000e+30 : f32
    %155 = vector.shape_cast %154 : vector<1x8x10xi1> to vector<1x8x10xi1>
    %156 = vector.broadcast %155 : vector<1x8x10xi1> to vector<4x8x10xi1>
    %157 = vector.broadcast %cst_55 : f32 to vector<4x8x10xf32>
    %158 = arith.select %156, %153, %157 : vector<4x8x10xi1>, vector<4x8x10xf32>
    %cst_56 = arith.constant dense<0xFF800000> : vector<4x8xf32>
    %159 = vector.multi_reduction <maximumf>, %158, %cst_56 [2] : vector<4x8x10xf32> to vector<4x8xf32>
    %160 = vector.shape_cast %159 : vector<4x8xf32> to vector<4x8x1xf32>
    %161 = vector.broadcast %160 : vector<4x8x1xf32> to vector<4x8x10xf32>
    %162 = arith.subf %158, %161 : vector<4x8x10xf32>
    %163 = math.exp %162 : vector<4x8x10xf32>
    %164 = vector.shape_cast %150 : vector<8x10xi1> to vector<1x8x10xi1>
    %165 = arith.extui %164 : vector<1x8x10xi1> to vector<1x8x10xi32>
    %166 = arith.sitofp %165 : vector<1x8x10xi32> to vector<1x8x10xf32>
    %167 = vector.broadcast %166 : vector<1x8x10xf32> to vector<4x8x10xf32>
    %168 = arith.mulf %163, %167 : vector<4x8x10xf32>
    %cst_57 = arith.constant dense<0.000000e+00> : vector<4x8xf32>
    %169 = vector.multi_reduction <add>, %168, %cst_57 [2] : vector<4x8x10xf32> to vector<4x8xf32>
    %170 = vector.shape_cast %169 : vector<4x8xf32> to vector<4x8x1xf32>
    %cst_58 = arith.constant 1.000000e-30 : f32
    %171 = vector.broadcast %cst_58 : f32 to vector<4x8x1xf32>
    %172 = arith.addf %170, %171 : vector<4x8x1xf32>
    %173 = tpu.reciprocal %172 {approx = true} : vector<4x8x1xf32> -> vector<4x8x1xf32>
    %174 = vector.broadcast %173 : vector<4x8x1xf32> to vector<4x8x10xf32>
    %175 = arith.mulf %168, %174 : vector<4x8x10xf32>
    %176 = arith.truncf %175 : vector<4x8x10xf32> to vector<4x8x10xbf16>
    %cst_59 = arith.constant dense<0.000000e+00> : vector<4x8x8xf32>
    %177 = tpu.matmul %176, %152, %cst_59 {dimension_numbers = #tpu.dot_dimension_numbers<[2], [1], [1], [2], [0, 0, 0, 1, 1, 2], [0], [0]>} : vector<4x8x10xbf16>, vector<4x10x8xbf16>, vector<4x8x8xf32> -> vector<4x8x8xf32>
    %178 = vector.extract_strided_slice %177 {offsets = [0, 0, 0], sizes = [1, 8, 8], strides = [1, 1, 1]} : vector<4x8x8xf32> to vector<1x8x8xf32>
    %179 = vector.shape_cast %178 : vector<1x8x8xf32> to vector<8x8xf32>
    %180 = vector.extract_strided_slice %177 {offsets = [1, 0, 0], sizes = [1, 8, 8], strides = [1, 1, 1]} : vector<4x8x8xf32> to vector<1x8x8xf32>
    %181 = vector.shape_cast %180 : vector<1x8x8xf32> to vector<8x8xf32>
    %182 = vector.extract_strided_slice %177 {offsets = [2, 0, 0], sizes = [1, 8, 8], strides = [1, 1, 1]} : vector<4x8x8xf32> to vector<1x8x8xf32>
    %183 = vector.shape_cast %182 : vector<1x8x8xf32> to vector<8x8xf32>
    %184 = vector.extract_strided_slice %177 {offsets = [3, 0, 0], sizes = [1, 8, 8], strides = [1, 1, 1]} : vector<4x8x8xf32> to vector<1x8x8xf32>
    %185 = vector.shape_cast %184 : vector<1x8x8xf32> to vector<8x8xf32>
    %186 = tpu.concatenate %179, %181, %183, %185 in 1 : vector<8x8xf32>, vector<8x8xf32>, vector<8x8xf32>, vector<8x8xf32> -> vector<8x32xf32>
    %187 = arith.truncf %186 : vector<8x32xf32> to vector<8x32xbf16>
    %c0_60 = arith.constant 0 : index
    %c0_61 = arith.constant 0 : index
    %188 = vector.load %arg24[%c0_60, %c0_61] : memref<32x32xbf16, #tpu.memory_space<vmem>>, vector<32x32xbf16>
    %cst_62 = arith.constant dense<0.000000e+00> : vector<8x32xf32>
    %189 = tpu.matmul %187, %188, %cst_62 {dimension_numbers = #tpu.dot_dimension_numbers<[1], [0], [0], [1], [0, 0, 1, 1], [], []>} : vector<8x32xbf16>, vector<32x32xbf16>, vector<8x32xf32> -> vector<8x32xf32>
    %c0_63 = arith.constant 0 : index
    %c0_64 = arith.constant 0 : index
    %190 = vector.load %arg25[%c0_63, %c0_64] : memref<1x32xf32, #tpu.memory_space<vmem>>, vector<1x32xf32>
    %191 = vector.broadcast %190 : vector<1x32xf32> to vector<8x32xf32>
    %192 = arith.addf %189, %191 : vector<8x32xf32>
    %193 = arith.addf %103, %192 : vector<8x32xf32>
    %c0_65 = arith.constant 0 : index
    %c0_66 = arith.constant 0 : index
    %194 = vector.load %arg26[%c0_65, %c0_66] : memref<1x32xf32, #tpu.memory_space<vmem>>, vector<1x32xf32>
    %c0_67 = arith.constant 0 : index
    %c0_68 = arith.constant 0 : index
    %195 = vector.load %arg27[%c0_67, %c0_68] : memref<1x32xf32, #tpu.memory_space<vmem>>, vector<1x32xf32>
    %cst_69 = arith.constant dense<0.000000e+00> : vector<8xf32>
    %196 = vector.multi_reduction <add>, %193, %cst_69 [1] : vector<8x32xf32> to vector<8xf32>
    %197 = vector.shape_cast %196 : vector<8xf32> to vector<8x1xf32>
    %cst_70 = arith.constant 3.200000e+01 : f32
    %198 = vector.broadcast %cst_70 : f32 to vector<8x1xf32>
    %199 = arith.divf %197, %198 : vector<8x1xf32>
    %200 = vector.broadcast %199 : vector<8x1xf32> to vector<8x32xf32>
    %201 = arith.subf %193, %200 : vector<8x32xf32>
    %202 = arith.mulf %201, %201 : vector<8x32xf32>
    %cst_71 = arith.constant dense<0.000000e+00> : vector<8xf32>
    %203 = vector.multi_reduction <add>, %202, %cst_71 [1] : vector<8x32xf32> to vector<8xf32>
    %204 = vector.shape_cast %203 : vector<8xf32> to vector<8x1xf32>
    %cst_72 = arith.constant 3.200000e+01 : f32
    %205 = vector.broadcast %cst_72 : f32 to vector<8x1xf32>
    %206 = arith.divf %204, %205 : vector<8x1xf32>
    %207 = vector.broadcast %199 : vector<8x1xf32> to vector<8x32xf32>
    %208 = arith.subf %193, %207 : vector<8x32xf32>
    %cst_73 = arith.constant 9.99999974E-6 : f32
    %209 = vector.broadcast %cst_73 : f32 to vector<8x1xf32>
    %210 = arith.addf %206, %209 : vector<8x1xf32>
    %211 = math.rsqrt %210 : vector<8x1xf32>
    %212 = vector.broadcast %211 : vector<8x1xf32> to vector<8x32xf32>
    %213 = arith.mulf %208, %212 : vector<8x32xf32>
    %214 = vector.broadcast %194 : vector<1x32xf32> to vector<8x32xf32>
    %215 = arith.mulf %213, %214 : vector<8x32xf32>
    %216 = vector.broadcast %195 : vector<1x32xf32> to vector<8x32xf32>
    %217 = arith.addf %215, %216 : vector<8x32xf32>
    %218 = arith.truncf %217 : vector<8x32xf32> to vector<8x32xbf16>
    %c0_74 = arith.constant 0 : index
    %c0_75 = arith.constant 0 : index
    %219 = vector.load %arg28[%c0_74, %c0_75] : memref<32x64xbf16, #tpu.memory_space<vmem>>, vector<32x64xbf16>
    %cst_76 = arith.constant dense<0.000000e+00> : vector<8x64xf32>
    %220 = tpu.matmul %218, %219, %cst_76 {dimension_numbers = #tpu.dot_dimension_numbers<[1], [0], [0], [1], [0, 0, 1, 1], [], []>} : vector<8x32xbf16>, vector<32x64xbf16>, vector<8x64xf32> -> vector<8x64xf32>
    %c0_77 = arith.constant 0 : index
    %c0_78 = arith.constant 0 : index
    %221 = vector.load %arg29[%c0_77, %c0_78] : memref<1x64xf32, #tpu.memory_space<vmem>>, vector<1x64xf32>
    %222 = vector.broadcast %221 : vector<1x64xf32> to vector<8x64xf32>
    %223 = arith.addf %220, %222 : vector<8x64xf32>
    %cst_79 = arith.constant 0.000000e+00 : f32
    %224 = vector.broadcast %cst_79 : f32 to vector<8x64xf32>
    %225 = arith.maximumf %223, %224 : vector<8x64xf32>
    %226 = arith.truncf %225 : vector<8x64xf32> to vector<8x64xbf16>
    %c0_80 = arith.constant 0 : index
    %c0_81 = arith.constant 0 : index
    %227 = vector.load %arg30[%c0_80, %c0_81] : memref<64x32xbf16, #tpu.memory_space<vmem>>, vector<64x32xbf16>
    %cst_82 = arith.constant dense<0.000000e+00> : vector<8x32xf32>
    %228 = tpu.matmul %226, %227, %cst_82 {dimension_numbers = #tpu.dot_dimension_numbers<[1], [0], [0], [1], [0, 0, 1, 1], [], []>} : vector<8x64xbf16>, vector<64x32xbf16>, vector<8x32xf32> -> vector<8x32xf32>
    %c0_83 = arith.constant 0 : index
    %c0_84 = arith.constant 0 : index
    %229 = vector.load %arg31[%c0_83, %c0_84] : memref<1x32xf32, #tpu.memory_space<vmem>>, vector<1x32xf32>
    %230 = vector.broadcast %229 : vector<1x32xf32> to vector<8x32xf32>
    %231 = arith.addf %228, %230 : vector<8x32xf32>
    %232 = arith.addf %193, %231 : vector<8x32xf32>
    %233 = arith.truncf %232 : vector<8x32xf32> to vector<8x32xbf16>
    %c0_85 = arith.constant 0 : index
    %c0_86 = arith.constant 0 : index
    %c0_87 = arith.constant 0 : index
    %234 = vector.load %arg32[%c0_85, %c0_86, %c0_87] : memref<1x8x32xbf16, #tpu.memory_space<vmem>>, vector<1x8x32xbf16>
    %235 = vector.shape_cast %234 : vector<1x8x32xbf16> to vector<8x32xbf16>
    %236 = vector.shape_cast %233 : vector<8x32xbf16> to vector<1x8x32xbf16>
    tpu.vector_store %arg32[%c0_85, %c0_86, %c0_87], %236 {strides = array<i32>} : memref<1x8x32xbf16, #tpu.memory_space<vmem>>, vector<1x8x32xbf16>,
    return
  }
  func.func @transform_0(%arg0: i32, %arg1: i32, %arg2: memref<2xi32, #tpu.memory_space<smem>>, %arg3: memref<2xi32, #tpu.memory_space<smem>>) -> (i32, i32, i32) {
    %c0_i32 = arith.constant 0 : i32
    %c0_i32_0 = arith.constant 0 : i32
    %c0_i32_1 = arith.constant 0 : i32
    return %arg0, %c0_i32, %c0_i32_0 : i32, i32, i32
  }
  func.func @transform_1(%arg0: i32, %arg1: i32, %arg2: memref<2xi32, #tpu.memory_space<smem>>, %arg3: memref<2xi32, #tpu.memory_space<smem>>) -> (i32, i32, i32) {
    %c0_i32 = arith.constant 0 : i32
    %c0_i32_0 = arith.constant 0 : i32
    %c0_i32_1 = arith.constant 0 : i32
    return %arg0, %c0_i32, %c0_i32_0 : i32, i32, i32
  }
  func.func @transform_2(%arg0: i32, %arg1: i32, %arg2: memref<2xi32, #tpu.memory_space<smem>>, %arg3: memref<2xi32, #tpu.memory_space<smem>>) -> (i32, i32) {
    %c0_i32 = arith.constant 0 : i32
    %c0_i32_0 = arith.constant 0 : i32
    %c0_i32_1 = arith.constant 0 : i32
    return %c0_i32, %c0_i32_0 : i32, i32
  }
  func.func @transform_3(%arg0: i32, %arg1: i32, %arg2: memref<2xi32, #tpu.memory_space<smem>>, %arg3: memref<2xi32, #tpu.memory_space<smem>>) -> (i32, i32) {
    %c0_i32 = arith.constant 0 : i32
    %c0_i32_0 = arith.constant 0 : i32
    %c0_i32_1 = arith.constant 0 : i32
    return %c0_i32, %c0_i32_0 : i32, i32
  }
  func.func @transform_4(%arg0: i32, %arg1: i32, %arg2: memref<2xi32, #tpu.memory_space<smem>>, %arg3: memref<2xi32, #tpu.memory_space<smem>>) -> (i32, i32) {
    %c0_i32 = arith.constant 0 : i32
    %c0_i32_0 = arith.constant 0 : i32
    %c0_i32_1 = arith.constant 0 : i32
    return %c0_i32, %c0_i32_0 : i32, i32
  }
  func.func @transform_5(%arg0: i32, %arg1: i32, %arg2: memref<2xi32, #tpu.memory_space<smem>>, %arg3: memref<2xi32, #tpu.memory_space<smem>>) -> (i32, i32) {
    %c0_i32 = arith.constant 0 : i32
    %c0_i32_0 = arith.constant 0 : i32
    %c0_i32_1 = arith.constant 0 : i32
    return %c0_i32, %c0_i32_0 : i32, i32
  }
  func.func @transform_6(%arg0: i32, %arg1: i32, %arg2: memref<2xi32, #tpu.memory_space<smem>>, %arg3: memref<2xi32, #tpu.memory_space<smem>>) -> (i32, i32) {
    %c0_i32 = arith.constant 0 : i32
    %c0_i32_0 = arith.constant 0 : i32
    %c0_i32_1 = arith.constant 0 : i32
    return %c0_i32, %c0_i32_0 : i32, i32
  }
  func.func @transform_7(%arg0: i32, %arg1: i32, %arg2: memref<2xi32, #tpu.memory_space<smem>>, %arg3: memref<2xi32, #tpu.memory_space<smem>>) -> (i32, i32) {
    %c0_i32 = arith.constant 0 : i32
    %c0_i32_0 = arith.constant 0 : i32
    %c0_i32_1 = arith.constant 0 : i32
    return %c0_i32, %c0_i32_0 : i32, i32
  }
  func.func @transform_8(%arg0: i32, %arg1: i32, %arg2: memref<2xi32, #tpu.memory_space<smem>>, %arg3: memref<2xi32, #tpu.memory_space<smem>>) -> (i32, i32) {
    %c0_i32 = arith.constant 0 : i32
    %c0_i32_0 = arith.constant 0 : i32
    %c0_i32_1 = arith.constant 0 : i32
    return %c0_i32, %c0_i32_0 : i32, i32
  }
  func.func @transform_9(%arg0: i32, %arg1: i32, %arg2: memref<2xi32, #tpu.memory_space<smem>>, %arg3: memref<2xi32, #tpu.memory_space<smem>>) -> (i32, i32) {
    %c0_i32 = arith.constant 0 : i32
    %c0_i32_0 = arith.constant 0 : i32
    %c0_i32_1 = arith.constant 0 : i32
    return %c0_i32, %c0_i32_0 : i32, i32
  }
  func.func @transform_10(%arg0: i32, %arg1: i32, %arg2: memref<2xi32, #tpu.memory_space<smem>>, %arg3: memref<2xi32, #tpu.memory_space<smem>>) -> (i32, i32) {
    %c0_i32 = arith.constant 0 : i32
    %c0_i32_0 = arith.constant 0 : i32
    %c0_i32_1 = arith.constant 0 : i32
    return %c0_i32, %c0_i32_0 : i32, i32
  }
  func.func @transform_11(%arg0: i32, %arg1: i32, %arg2: memref<2xi32, #tpu.memory_space<smem>>, %arg3: memref<2xi32, #tpu.memory_space<smem>>) -> (i32, i32) {
    %c0_i32 = arith.constant 0 : i32
    %c0_i32_0 = arith.constant 0 : i32
    %c0_i32_1 = arith.constant 0 : i32
    return %c0_i32, %c0_i32_0 : i32, i32
  }
  func.func @transform_12(%arg0: i32, %arg1: i32, %arg2: memref<2xi32, #tpu.memory_space<smem>>, %arg3: memref<2xi32, #tpu.memory_space<smem>>) -> (i32, i32) {
    %c0_i32 = arith.constant 0 : i32
    %c0_i32_0 = arith.constant 0 : i32
    %c0_i32_1 = arith.constant 0 : i32
    return %c0_i32, %c0_i32_0 : i32, i32
  }
  func.func @transform_13(%arg0: i32, %arg1: i32, %arg2: memref<2xi32, #tpu.memory_space<smem>>, %arg3: memref<2xi32, #tpu.memory_space<smem>>) -> (i32, i32) {
    %c0_i32 = arith.constant 0 : i32
    %c0_i32_0 = arith.constant 0 : i32
    %c0_i32_1 = arith.constant 0 : i32
    return %c0_i32, %c0_i32_0 : i32, i32
  }
  func.func @transform_14(%arg0: i32, %arg1: i32, %arg2: memref<2xi32, #tpu.memory_space<smem>>, %arg3: memref<2xi32, #tpu.memory_space<smem>>) -> (i32, i32) {
    %c0_i32 = arith.constant 0 : i32
    %c0_i32_0 = arith.constant 0 : i32
    %c0_i32_1 = arith.constant 0 : i32
    return %c0_i32, %c0_i32_0 : i32, i32
  }
  func.func @transform_15(%arg0: i32, %arg1: i32, %arg2: memref<2xi32, #tpu.memory_space<smem>>, %arg3: memref<2xi32, #tpu.memory_space<smem>>) -> (i32, i32) {
    %c0_i32 = arith.constant 0 : i32
    %c0_i32_0 = arith.constant 0 : i32
    %c0_i32_1 = arith.constant 0 : i32
    return %c0_i32, %c0_i32_0 : i32, i32
  }
  func.func @transform_16(%arg0: i32, %arg1: i32, %arg2: memref<2xi32, #tpu.memory_space<smem>>, %arg3: memref<2xi32, #tpu.memory_space<smem>>) -> (i32, i32) {
    %c0_i32 = arith.constant 0 : i32
    %c0_i32_0 = arith.constant 0 : i32
    %c0_i32_1 = arith.constant 0 : i32
    return %c0_i32, %c0_i32_0 : i32, i32
  }
  func.func @transform_17(%arg0: i32, %arg1: i32, %arg2: memref<2xi32, #tpu.memory_space<smem>>, %arg3: memref<2xi32, #tpu.memory_space<smem>>) -> (i32, i32) {
    %c0_i32 = arith.constant 0 : i32
    %c0_i32_0 = arith.constant 0 : i32
    %c0_i32_1 = arith.constant 0 : i32
    return %c0_i32, %c0_i32_0 : i32, i32
  }
  func.func @transform_18(%arg0: i32, %arg1: i32, %arg2: memref<2xi32, #tpu.memory_space<smem>>, %arg3: memref<2xi32, #tpu.memory_space<smem>>) -> (i32, i32) {
    %c0_i32 = arith.constant 0 : i32
    %c0_i32_0 = arith.constant 0 : i32
    %c0_i32_1 = arith.constant 0 : i32
    return %c0_i32, %c0_i32_0 : i32, i32
  }
  func.func @transform_19(%arg0: i32, %arg1: i32, %arg2: memref<2xi32, #tpu.memory_space<smem>>, %arg3: memref<2xi32, #tpu.memory_space<smem>>) -> (i32, i32) {
    %c0_i32 = arith.constant 0 : i32
    %c0_i32_0 = arith.constant 0 : i32
    %c0_i32_1 = arith.constant 0 : i32
    return %c0_i32, %c0_i32_0 : i32, i32
  }
  func.func @transform_20(%arg0: i32, %arg1: i32, %arg2: memref<2xi32, #tpu.memory_space<smem>>, %arg3: memref<2xi32, #tpu.memory_space<smem>>) -> (i32, i32) {
    %c0_i32 = arith.constant 0 : i32
    %c0_i32_0 = arith.constant 0 : i32
    %c0_i32_1 = arith.constant 0 : i32
    return %c0_i32, %c0_i32_0 : i32, i32
  }
  func.func @transform_21(%arg0: i32, %arg1: i32, %arg2: memref<2xi32, #tpu.memory_space<smem>>, %arg3: memref<2xi32, #tpu.memory_space<smem>>) -> (i32, i32) {
    %c0_i32 = arith.constant 0 : i32
    %c0_i32_0 = arith.constant 0 : i32
    %c0_i32_1 = arith.constant 0 : i32
    return %c0_i32, %c0_i32_0 : i32, i32
  }
  func.func @transform_22(%arg0: i32, %arg1: i32, %arg2: memref<2xi32, #tpu.memory_space<smem>>, %arg3: memref<2xi32, #tpu.memory_space<smem>>) -> (i32, i32) {
    %c0_i32 = arith.constant 0 : i32
    %c0_i32_0 = arith.constant 0 : i32
    %c0_i32_1 = arith.constant 0 : i32
    return %c0_i32, %c0_i32_0 : i32, i32
  }
  func.func @transform_23(%arg0: i32, %arg1: i32, %arg2: memref<2xi32, #tpu.memory_space<smem>>, %arg3: memref<2xi32, #tpu.memory_space<smem>>) -> (i32, i32) {
    %c0_i32 = arith.constant 0 : i32
    %c0_i32_0 = arith.constant 0 : i32
    %c0_i32_1 = arith.constant 0 : i32
    return %c0_i32, %c0_i32_0 : i32, i32
  }
  func.func @transform_24(%arg0: i32, %arg1: i32, %arg2: memref<2xi32, #tpu.memory_space<smem>>, %arg3: memref<2xi32, #tpu.memory_space<smem>>) -> (i32, i32) {
    %c0_i32 = arith.constant 0 : i32
    %c0_i32_0 = arith.constant 0 : i32
    %c0_i32_1 = arith.constant 0 : i32
    return %c0_i32, %c0_i32_0 : i32, i32
  }
  func.func @transform_25(%arg0: i32, %arg1: i32, %arg2: memref<2xi32, #tpu.memory_space<smem>>, %arg3: memref<2xi32, #tpu.memory_space<smem>>) -> (i32, i32) {
    %c0_i32 = arith.constant 0 : i32
    %c0_i32_0 = arith.constant 0 : i32
    %c0_i32_1 = arith.constant 0 : i32
    return %c0_i32, %c0_i32_0 : i32, i32
  }
  func.func @transform_26(%arg0: i32, %arg1: i32, %arg2: memref<2xi32, #tpu.memory_space<smem>>, %arg3: memref<2xi32, #tpu.memory_space<smem>>) -> (i32, i32) {
    %c0_i32 = arith.constant 0 : i32
    %c0_i32_0 = arith.constant 0 : i32
    %c0_i32_1 = arith.constant 0 : i32
    return %c0_i32, %c0_i32_0 : i32, i32
  }
  func.func @transform_27(%arg0: i32, %arg1: i32, %arg2: memref<2xi32, #tpu.memory_space<smem>>, %arg3: memref<2xi32, #tpu.memory_space<smem>>) -> (i32, i32) {
    %c0_i32 = arith.constant 0 : i32
    %c0_i32_0 = arith.constant 0 : i32
    %c0_i32_1 = arith.constant 0 : i32
    return %c0_i32, %c0_i32_0 : i32, i32
  }
  func.func @transform_28(%arg0: i32, %arg1: i32, %arg2: memref<2xi32, #tpu.memory_space<smem>>, %arg3: memref<2xi32, #tpu.memory_space<smem>>) -> (i32, i32, i32) {
    %c0_i32 = arith.constant 0 : i32
    %c0_i32_0 = arith.constant 0 : i32
    return %arg0, %arg1, %c0_i32 : i32, i32, i32
  }
}

module attributes {stable_mosaic.version = 11 : i64} {
  func.func @_decoder_layer_kernel(%arg0: i32, %arg1: i32, %arg2: memref<2xi32, #tpu.memory_space<smem>>, %arg3: memref<2xi32, #tpu.memory_space<smem>>, %arg4: memref<1x8x32xbf16, #tpu.memory_space<vmem>>, %arg5: memref<1x10x32xbf16, #tpu.memory_space<vmem>>, %arg6: memref<1x32xf32, #tpu.memory_space<vmem>>, %arg7: memref<1x32xf32, #tpu.memory_space<vmem>>, %arg8: memref<32x32xbf16, #tpu.memory_space<vmem>>, %arg9: memref<1x32xf32, #tpu.memory_space<vmem>>, %arg10: memref<32x32xbf16, #tpu.memory_space<vmem>>, %arg11: memref<1x32xf32, #tpu.memory_space<vmem>>, %arg12: memref<32x32xbf16, #tpu.memory_space<vmem>>, %arg13: memref<1x32xf32, #tpu.memory_space<vmem>>, %arg14: memref<32x32xbf16, #tpu.memory_space<vmem>>, %arg15: memref<1x32xf32, #tpu.memory_space<vmem>>, %arg16: memref<1x32xf32, #tpu.memory_space<vmem>>, %arg17: memref<1x32xf32, #tpu.memory_space<vmem>>, %arg18: memref<32x32xbf16, #tpu.memory_space<vmem>>, %arg19: memref<1x32xf32, #tpu.memory_space<vmem>>, %arg20: memref<32x32xbf16, #tpu.memory_space<vmem>>, %arg21: memref<1x32xf32, #tpu.memory_space<vmem>>, %arg22: memref<32x32xbf16, #tpu.memory_space<vmem>>, %arg23: memref<1x32xf32, #tpu.memory_space<vmem>>, %arg24: memref<32x32xbf16, #tpu.memory_space<vmem>>, %arg25: memref<1x32xf32, #tpu.memory_space<vmem>>, %arg26: memref<1x32xf32, #tpu.memory_space<vmem>>, %arg27: memref<1x32xf32, #tpu.memory_space<vmem>>, %arg28: memref<32x64xbf16, #tpu.memory_space<vmem>>, %arg29: memref<1x64xf32, #tpu.memory_space<vmem>>, %arg30: memref<64x32xbf16, #tpu.memory_space<vmem>>, %arg31: memref<1x32xf32, #tpu.memory_space<vmem>>, %arg32: memref<1x8x32xbf16, #tpu.memory_space<vmem>>, %arg33: memref<4x8x8xbf16, #tpu.memory_space<vmem>>, %arg34: memref<4x8x8xbf16, #tpu.memory_space<vmem>>, %arg35: memref<4x10x8xbf16, #tpu.memory_space<vmem>>, %arg36: memref<4x10x8xbf16, #tpu.memory_space<vmem>>) attributes {dimension_semantics = [#tpu.dimension_semantics<parallel>, #tpu.dimension_semantics<arbitrary>], iteration_bounds = array<i64: 2, 1>, scalar_prefetch = 2 : i64, scratch_operands = 4 : i64, tpu.core_type = #tpu.core_type<tc>, window_params = [{transform_indices = @transform_0, window_bounds = array<i64: 1, 8, 32>}, {transform_indices = @transform_1, window_bounds = array<i64: 1, 10, 32>}, {pipeline_mode = #tpu.pipeline_mode<synchronous>, transform_indices = @transform_2, window_bounds = array<i64: 1, 32>}, {pipeline_mode = #tpu.pipeline_mode<synchronous>, transform_indices = @transform_3, window_bounds = array<i64: 1, 32>}, {pipeline_mode = #tpu.pipeline_mode<synchronous>, transform_indices = @transform_4, window_bounds = array<i64: 32, 32>}, {pipeline_mode = #tpu.pipeline_mode<synchronous>, transform_indices = @transform_5, window_bounds = array<i64: 1, 32>}, {pipeline_mode = #tpu.pipeline_mode<synchronous>, transform_indices = @transform_6, window_bounds = array<i64: 32, 32>}, {pipeline_mode = #tpu.pipeline_mode<synchronous>, transform_indices = @transform_7, window_bounds = array<i64: 1, 32>}, {pipeline_mode = #tpu.pipeline_mode<synchronous>, transform_indices = @transform_8, window_bounds = array<i64: 32, 32>}, {pipeline_mode = #tpu.pipeline_mode<synchronous>, transform_indices = @transform_9, window_bounds = array<i64: 1, 32>}, {pipeline_mode = #tpu.pipeline_mode<synchronous>, transform_indices = @transform_10, window_bounds = array<i64: 32, 32>}, {pipeline_mode = #tpu.pipeline_mode<synchronous>, transform_indices = @transform_11, window_bounds = array<i64: 1, 32>}, {pipeline_mode = #tpu.pipeline_mode<synchronous>, transform_indices = @transform_12, window_bounds = array<i64: 1, 32>}, {pipeline_mode = #tpu.pipeline_mode<synchronous>, transform_indices = @transform_13, window_bounds = array<i64: 1, 32>}, {pipeline_mode = #tpu.pipeline_mode<synchronous>, transform_indices = @transform_14, window_bounds = array<i64: 32, 32>}, {pipeline_mode = #tpu.pipeline_mode<synchronous>, transform_indices = @transform_15, window_bounds = array<i64: 1, 32>}, {pipeline_mode = #tpu.pipeline_mode<synchronous>, transform_indices = @transform_16, window_bounds = array<i64: 32, 32>}, {pipeline_mode = #tpu.pipeline_mode<synchronous>, transform_indices = @transform_17, window_bounds = array<i64: 1, 32>}, {pipeline_mode = #tpu.pipeline_mode<synchronous>, transform_indices = @transform_18, window_bounds = array<i64: 32, 32>}, {pipeline_mode = #tpu.pipeline_mode<synchronous>, transform_indices = @transform_19, window_bounds = array<i64: 1, 32>}, {pipeline_mode = #tpu.pipeline_mode<synchronous>, transform_indices = @transform_20, window_bounds = array<i64: 32, 32>}, {pipeline_mode = #tpu.pipeline_mode<synchronous>, transform_indices = @transform_21, window_bounds = array<i64: 1, 32>}, {pipeline_mode = #tpu.pipeline_mode<synchronous>, transform_indices = @transform_22, window_bounds = array<i64: 1, 32>}, {pipeline_mode = #tpu.pipeline_mode<synchronous>, transform_indices = @transform_23, window_bounds = array<i64: 1, 32>}, {pipeline_mode = #tpu.pipeline_mode<synchronous>, transform_indices = @transform_24, window_bounds = array<i64: 32, 64>}, {pipeline_mode = #tpu.pipeline_mode<synchronous>, transform_indices = @transform_25, window_bounds = array<i64: 1, 64>}, {pipeline_mode = #tpu.pipeline_mode<synchronous>, transform_indices = @transform_26, window_bounds = array<i64: 64, 32>}, {pipeline_mode = #tpu.pipeline_mode<synchronous>, transform_indices = @transform_27, window_bounds = array<i64: 1, 32>}, {transform_indices = @transform_28, window_bounds = array<i64: 1, 8, 32>}]} {
    %c0_i32 = arith.constant 0 : i32
    %0 = arith.cmpi eq, %arg1, %c0_i32 : i32
    %1 = arith.extui %0 : i1 to i32
    %c0_i32_0 = arith.constant 0 : i32
    %2 = arith.cmpi ne, %1, %c0_i32_0 : i32
    scf.if %2 {
      %c0_88 = arith.constant 0 : index
      %c0_89 = arith.constant 0 : index
      %c0_90 = arith.constant 0 : index
      %237 = vector.load %arg4[%c0_88, %c0_89, %c0_90] : memref<1x8x32xbf16, #tpu.memory_space<vmem>>, vector<1x8x32xbf16>
      %238 = vector.shape_cast %237 : vector<1x8x32xbf16> to vector<8x32xbf16>
      %239 = arith.extf %238 : vector<8x32xbf16> to vector<8x32xf32>
      %c0_91 = arith.constant 0 : index
      %c0_92 = arith.constant 0 : index
      %240 = vector.load %arg6[%c0_91, %c0_92] : memref<1x32xf32, #tpu.memory_space<vmem>>, vector<1x32xf32>
      %c0_93 = arith.constant 0 : index
      %c0_94 = arith.constant 0 : index
      %241 = vector.load %arg7[%c0_93, %c0_94] : memref<1x32xf32, #tpu.memory_space<vmem>>, vector<1x32xf32>
      %cst_95 = arith.constant dense<0.000000e+00> : vector<8xf32>
      %242 = vector.multi_reduction <add>, %239, %cst_95 [1] : vector<8x32xf32> to vector<8xf32>
      %243 = vector.shape_cast %242 : vector<8xf32> to vector<8x1xf32>
      %cst_96 = arith.constant 3.200000e+01 : f32
      %244 = vector.broadcast %cst_96 : f32 to vector<8x1xf32>
      %245 = arith.divf %243, %244 : vector<8x1xf32>
      %246 = vector.broadcast %245 : vector<8x1xf32> to vector<8x32xf32>
      %247 = arith.subf %239, %246 : vector<8x32xf32>
      %248 = arith.mulf %247, %247 : vector<8x32xf32>
      %cst_97 = arith.constant dense<0.000000e+00> : vector<8xf32>
      %249 = vector.multi_reduction <add>, %248, %cst_97 [1] : vector<8x32xf32> to vector<8xf32>
      %250 = vector.shape_cast %249 : vector<8xf32> to vector<8x1xf32>
      %cst_98 = arith.constant 3.200000e+01 : f32
      %251 = vector.broadcast %cst_98 : f32 to vector<8x1xf32>
      %252 = arith.divf %250, %251 : vector<8x1xf32>
      %253 = vector.broadcast %245 : vector<8x1xf32> to vector<8x32xf32>
      %254 = arith.subf %239, %253 : vector<8x32xf32>
      %cst_99 = arith.constant 9.99999974E-6 : f32
      %255 = vector.broadcast %cst_99 : f32 to vector<8x1xf32>
      %256 = arith.addf %252, %255 : vector<8x1xf32>
      %257 = math.rsqrt %256 : vector<8x1xf32>
      %258 = vector.broadcast %257 : vector<8x1xf32> to vector<8x32xf32>
      %259 = arith.mulf %254, %258 : vector<8x32xf32>
      %260 = vector.broadcast %240 : vector<1x32xf32> to vector<8x32xf32>
      %261 = arith.mulf %259, %260 : vector<8x32xf32>
      %262 = vector.broadcast %241 : vector<1x32xf32> to vector<8x32xf32>
      %263 = arith.addf %261, %262 : vector<8x32xf32>
      %264 = arith.truncf %263 : vector<8x32xf32> to vector<8x32xbf16>
      %c0_100 = arith.constant 0 : index
      %c0_101 = arith.constant 0 : index
      %265 = vector.load %arg10[%c0_100, %c0_101] : memref<32x32xbf16, #tpu.memory_space<vmem>>, vector<32x32xbf16>
      %cst_102 = arith.constant dense<0.000000e+00> : vector<8x32xf32>
      %266 = tpu.matmul %264, %265, %cst_102 {dimension_numbers = #tpu.dot_dimension_numbers<[1], [0], [0], [1], [0, 0, 1, 1], [], []>} : vector<8x32xbf16>, vector<32x32xbf16>, vector<8x32xf32> -> vector<8x32xf32>
      %c0_103 = arith.constant 0 : index
      %c0_104 = arith.constant 0 : index
      %267 = vector.load %arg11[%c0_103, %c0_104] : memref<1x32xf32, #tpu.memory_space<vmem>>, vector<1x32xf32>
      %268 = vector.broadcast %267 : vector<1x32xf32> to vector<8x32xf32>
      %269 = arith.addf %266, %268 : vector<8x32xf32>
      %270 = arith.truncf %269 : vector<8x32xf32> to vector<8x32xbf16>
      %c0_105 = arith.constant 0 : index
      %c0_106 = arith.constant 0 : index
      %271 = vector.load %arg12[%c0_105, %c0_106] : memref<32x32xbf16, #tpu.memory_space<vmem>>, vector<32x32xbf16>
      %cst_107 = arith.constant dense<0.000000e+00> : vector<8x32xf32>
      %272 = tpu.matmul %264, %271, %cst_107 {dimension_numbers = #tpu.dot_dimension_numbers<[1], [0], [0], [1], [0, 0, 1, 1], [], []>} : vector<8x32xbf16>, vector<32x32xbf16>, vector<8x32xf32> -> vector<8x32xf32>
      %c0_108 = arith.constant 0 : index
      %c0_109 = arith.constant 0 : index
      %273 = vector.load %arg13[%c0_108, %c0_109] : memref<1x32xf32, #tpu.memory_space<vmem>>, vector<1x32xf32>
      %274 = vector.broadcast %273 : vector<1x32xf32> to vector<8x32xf32>
      %275 = arith.addf %272, %274 : vector<8x32xf32>
      %276 = arith.truncf %275 : vector<8x32xf32> to vector<8x32xbf16>
      %277 = vector.extract_strided_slice %270 {offsets = [0, 0], sizes = [8, 8], strides = [1, 1]} : vector<8x32xbf16> to vector<8x8xbf16>
      %278 = vector.shape_cast %277 : vector<8x8xbf16> to vector<1x8x8xbf16>
      %279 = vector.extract_strided_slice %270 {offsets = [0, 8], sizes = [8, 8], strides = [1, 1]} : vector<8x32xbf16> to vector<8x8xbf16>
      %280 = vector.shape_cast %279 : vector<8x8xbf16> to vector<1x8x8xbf16>
      %281 = vector.extract_strided_slice %270 {offsets = [0, 16], sizes = [8, 8], strides = [1, 1]} : vector<8x32xbf16> to vector<8x8xbf16>
      %282 = vector.shape_cast %281 : vector<8x8xbf16> to vector<1x8x8xbf16>
      %283 = vector.extract_strided_slice %270 {offsets = [0, 24], sizes = [8, 8], strides = [1, 1]} : vector<8x32xbf16> to vector<8x8xbf16>
      %284 = vector.shape_cast %283 : vector<8x8xbf16> to vector<1x8x8xbf16>
      %285 = tpu.concatenate %278, %280, %282, %284 in 0 : vector<1x8x8xbf16>, vector<1x8x8xbf16>, vector<1x8x8xbf16>, vector<1x8x8xbf16> -> vector<4x8x8xbf16>
      %c0_110 = arith.constant 0 : index
      %c0_111 = arith.constant 0 : index
      %c0_112 = arith.constant 0 : index
      %286 = vector.load %arg33[%c0_110, %c0_111, %c0_112] : memref<4x8x8xbf16, #tpu.memory_space<vmem>>, vector<4x8x8xbf16>
      tpu.vector_store %arg33[%c0_110, %c0_111, %c0_112], %285 {strides = array<i32>} : memref<4x8x8xbf16, #tpu.memory_space<vmem>>, vector<4x8x8xbf16>,
      %287 = vector.extract_strided_slice %276 {offsets = [0, 0], sizes = [8, 8], strides = [1, 1]} : vector<8x32xbf16> to vector<8x8xbf16>
      %288 = vector.shape_cast %287 : vector<8x8xbf16> to vector<1x8x8xbf16>
      %289 = vector.extract_strided_slice %276 {offsets = [0, 8], sizes = [8, 8], strides = [1, 1]} : vector<8x32xbf16> to vector<8x8xbf16>
      %290 = vector.shape_cast %289 : vector<8x8xbf16> to vector<1x8x8xbf16>
      %291 = vector.extract_strided_slice %276 {offsets = [0, 16], sizes = [8, 8], strides = [1, 1]} : vector<8x32xbf16> to vector<8x8xbf16>
      %292 = vector.shape_cast %291 : vector<8x8xbf16> to vector<1x8x8xbf16>
      %293 = vector.extract_strided_slice %276 {offsets = [0, 24], sizes = [8, 8], strides = [1, 1]} : vector<8x32xbf16> to vector<8x8xbf16>
      %294 = vector.shape_cast %293 : vector<8x8xbf16> to vector<1x8x8xbf16>
      %295 = tpu.concatenate %288, %290, %292, %294 in 0 : vector<1x8x8xbf16>, vector<1x8x8xbf16>, vector<1x8x8xbf16>, vector<1x8x8xbf16> -> vector<4x8x8xbf16>
      %c0_113 = arith.constant 0 : index
      %c0_114 = arith.constant 0 : index
      %c0_115 = arith.constant 0 : index
      %296 = vector.load %arg34[%c0_113, %c0_114, %c0_115] : memref<4x8x8xbf16, #tpu.memory_space<vmem>>, vector<4x8x8xbf16>
      tpu.vector_store %arg34[%c0_113, %c0_114, %c0_115], %295 {strides = array<i32>} : memref<4x8x8xbf16, #tpu.memory_space<vmem>>, vector<4x8x8xbf16>,
      %c0_116 = arith.constant 0 : index
      %c0_117 = arith.constant 0 : index
      %c0_118 = arith.constant 0 : index
      %297 = vector.load %arg5[%c0_116, %c0_117, %c0_118] : memref<1x10x32xbf16, #tpu.memory_space<vmem>>, vector<1x10x32xbf16>
      %298 = vector.shape_cast %297 : vector<1x10x32xbf16> to vector<10x32xbf16>
      %c0_119 = arith.constant 0 : index
      %c0_120 = arith.constant 0 : index
      %299 = vector.load %arg20[%c0_119, %c0_120] : memref<32x32xbf16, #tpu.memory_space<vmem>>, vector<32x32xbf16>
      %cst_121 = arith.constant dense<0.000000e+00> : vector<10x32xf32>
      %300 = tpu.matmul %298, %299, %cst_121 {dimension_numbers = #tpu.dot_dimension_numbers<[1], [0], [0], [1], [0, 0, 1, 1], [], []>} : vector<10x32xbf16>, vector<32x32xbf16>, vector<10x32xf32> -> vector<10x32xf32>
      %c0_122 = arith.constant 0 : index
      %c0_123 = arith.constant 0 : index
      %301 = vector.load %arg21[%c0_122, %c0_123] : memref<1x32xf32, #tpu.memory_space<vmem>>, vector<1x32xf32>
      %302 = vector.broadcast %301 : vector<1x32xf32> to vector<10x32xf32>
      %303 = arith.addf %300, %302 : vector<10x32xf32>
      %304 = arith.truncf %303 : vector<10x32xf32> to vector<10x32xbf16>
      %c0_124 = arith.constant 0 : index
      %c0_125 = arith.constant 0 : index
      %305 = vector.load %arg22[%c0_124, %c0_125] : memref<32x32xbf16, #tpu.memory_space<vmem>>, vector<32x32xbf16>
      %cst_126 = arith.constant dense<0.000000e+00> : vector<10x32xf32>
      %306 = tpu.matmul %298, %305, %cst_126 {dimension_numbers = #tpu.dot_dimension_numbers<[1], [0], [0], [1], [0, 0, 1, 1], [], []>} : vector<10x32xbf16>, vector<32x32xbf16>, vector<10x32xf32> -> vector<10x32xf32>
      %c0_127 = arith.constant 0 : index
      %c0_128 = arith.constant 0 : index
      %307 = vector.load %arg23[%c0_127, %c0_128] : memref<1x32xf32, #tpu.memory_space<vmem>>, vector<1x32xf32>
      %308 = vector.broadcast %307 : vector<1x32xf32> to vector<10x32xf32>
      %309 = arith.addf %306, %308 : vector<10x32xf32>
      %310 = arith.truncf %309 : vector<10x32xf32> to vector<10x32xbf16>
      %311 = vector.extract_strided_slice %304 {offsets = [0, 0], sizes = [10, 8], strides = [1, 1]} : vector<10x32xbf16> to vector<10x8xbf16>
      %312 = vector.shape_cast %311 : vector<10x8xbf16> to vector<1x10x8xbf16>
      %313 = vector.extract_strided_slice %304 {offsets = [0, 8], sizes = [10, 8], strides = [1, 1]} : vector<10x32xbf16> to vector<10x8xbf16>
      %314 = vector.shape_cast %313 : vector<10x8xbf16> to vector<1x10x8xbf16>
      %315 = vector.extract_strided_slice %304 {offsets = [0, 16], sizes = [10, 8], strides = [1, 1]} : vector<10x32xbf16> to vector<10x8xbf16>
      %316 = vector.shape_cast %315 : vector<10x8xbf16> to vector<1x10x8xbf16>
      %317 = vector.extract_strided_slice %304 {offsets = [0, 24], sizes = [10, 8], strides = [1, 1]} : vector<10x32xbf16> to vector<10x8xbf16>
      %318 = vector.shape_cast %317 : vector<10x8xbf16> to vector<1x10x8xbf16>
      %319 = tpu.concatenate %312, %314, %316, %318 in 0 : vector<1x10x8xbf16>, vector<1x10x8xbf16>, vector<1x10x8xbf16>, vector<1x10x8xbf16> -> vector<4x10x8xbf16>
      %c0_129 = arith.constant 0 : index
      %c0_130 = arith.constant 0 : index
      %c0_131 = arith.constant 0 : index
      %320 = vector.load %arg35[%c0_129, %c0_130, %c0_131] : memref<4x10x8xbf16, #tpu.memory_space<vmem>>, vector<4x10x8xbf16>
      tpu.vector_store %arg35[%c0_129, %c0_130, %c0_131], %319 {strides = array<i32>} : memref<4x10x8xbf16, #tpu.memory_space<vmem>>, vector<4x10x8xbf16>,
      %321 = vector.extract_strided_slice %310 {offsets = [0, 0], sizes = [10, 8], strides = [1, 1]} : vector<10x32xbf16> to vector<10x8xbf16>
      %322 = vector.shape_cast %321 : vector<10x8xbf16> to vector<1x10x8xbf16>
      %323 = vector.extract_strided_slice %310 {offsets = [0, 8], sizes = [10, 8], strides = [1, 1]} : vector<10x32xbf16> to vector<10x8xbf16>
      %324 = vector.shape_cast %323 : vector<10x8xbf16> to vector<1x10x8xbf16>
      %325 = vector.extract_strided_slice %310 {offsets = [0, 16], sizes = [10, 8], strides = [1, 1]} : vector<10x32xbf16> to vector<10x8xbf16>
      %326 = vector.shape_cast %325 : vector<10x8xbf16> to vector<1x10x8xbf16>
      %327 = vector.extract_strided_slice %310 {offsets = [0, 24], sizes = [10, 8], strides = [1, 1]} : vector<10x32xbf16> to vector<10x8xbf16>
      %328 = vector.shape_cast %327 : vector<10x8xbf16> to vector<1x10x8xbf16>
      %329 = tpu.concatenate %322, %324, %326, %328 in 0 : vector<1x10x8xbf16>, vector<1x10x8xbf16>, vector<1x10x8xbf16>, vector<1x10x8xbf16> -> vector<4x10x8xbf16>
      %c0_132 = arith.constant 0 : index
      %c0_133 = arith.constant 0 : index
      %c0_134 = arith.constant 0 : index
      %330 = vector.load %arg36[%c0_132, %c0_133, %c0_134] : memref<4x10x8xbf16, #tpu.memory_space<vmem>>, vector<4x10x8xbf16>
      tpu.vector_store %arg36[%c0_132, %c0_133, %c0_134], %329 {strides = array<i32>} : memref<4x10x8xbf16, #tpu.memory_space<vmem>>, vector<4x10x8xbf16>,
    } else {
    }
    %c8_i32 = arith.constant 8 : i32
    %3 = arith.muli %arg1, %c8_i32 : i32
    %4 = tpu.assume_multiple %3, 8 : i32
    %c0 = arith.constant 0 : index
    %5 = arith.index_cast %4 : i32 to index
    %c0_1 = arith.constant 0 : index
    %6 = vector.load %arg4[%c0, %5, %c0_1] : memref<1x8x32xbf16, #tpu.memory_space<vmem>>, vector<1x8x32xbf16>
    %7 = vector.shape_cast %6 : vector<1x8x32xbf16> to vector<8x32xbf16>
    %8 = arith.extf %7 : vector<8x32xbf16> to vector<8x32xf32>
    %c0_2 = arith.constant 0 : index
    %c0_3 = arith.constant 0 : index
    %9 = vector.load %arg6[%c0_2, %c0_3] : memref<1x32xf32, #tpu.memory_space<vmem>>, vector<1x32xf32>
    %c0_4 = arith.constant 0 : index
    %c0_5 = arith.constant 0 : index
    %10 = vector.load %arg7[%c0_4, %c0_5] : memref<1x32xf32, #tpu.memory_space<vmem>>, vector<1x32xf32>
    %cst = arith.constant dense<0.000000e+00> : vector<8xf32>
    %11 = vector.multi_reduction <add>, %8, %cst [1] : vector<8x32xf32> to vector<8xf32>
    %12 = vector.shape_cast %11 : vector<8xf32> to vector<8x1xf32>
    %cst_6 = arith.constant 3.200000e+01 : f32
    %13 = vector.broadcast %cst_6 : f32 to vector<8x1xf32>
    %14 = arith.divf %12, %13 : vector<8x1xf32>
    %15 = vector.broadcast %14 : vector<8x1xf32> to vector<8x32xf32>
    %16 = arith.subf %8, %15 : vector<8x32xf32>
    %17 = arith.mulf %16, %16 : vector<8x32xf32>
    %cst_7 = arith.constant dense<0.000000e+00> : vector<8xf32>
    %18 = vector.multi_reduction <add>, %17, %cst_7 [1] : vector<8x32xf32> to vector<8xf32>
    %19 = vector.shape_cast %18 : vector<8xf32> to vector<8x1xf32>
    %cst_8 = arith.constant 3.200000e+01 : f32
    %20 = vector.broadcast %cst_8 : f32 to vector<8x1xf32>
    %21 = arith.divf %19, %20 : vector<8x1xf32>
    %22 = vector.broadcast %14 : vector<8x1xf32> to vector<8x32xf32>
    %23 = arith.subf %8, %22 : vector<8x32xf32>
    %cst_9 = arith.constant 9.99999974E-6 : f32
    %24 = vector.broadcast %cst_9 : f32 to vector<8x1xf32>
    %25 = arith.addf %21, %24 : vector<8x1xf32>
    %26 = math.rsqrt %25 : vector<8x1xf32>
    %27 = vector.broadcast %26 : vector<8x1xf32> to vector<8x32xf32>
    %28 = arith.mulf %23, %27 : vector<8x32xf32>
    %29 = vector.broadcast %9 : vector<1x32xf32> to vector<8x32xf32>
    %30 = arith.mulf %28, %29 : vector<8x32xf32>
    %31 = vector.broadcast %10 : vector<1x32xf32> to vector<8x32xf32>
    %32 = arith.addf %30, %31 : vector<8x32xf32>
    %33 = arith.truncf %32 : vector<8x32xf32> to vector<8x32xbf16>
    %c0_10 = arith.constant 0 : index
    %c0_11 = arith.constant 0 : index
    %34 = vector.load %arg8[%c0_10, %c0_11] : memref<32x32xbf16, #tpu.memory_space<vmem>>, vector<32x32xbf16>
    %cst_12 = arith.constant dense<0.000000e+00> : vector<8x32xf32>
    %35 = tpu.matmul %33, %34, %cst_12 {dimension_numbers = #tpu.dot_dimension_numbers<[1], [0], [0], [1], [0, 0, 1, 1], [], []>} : vector<8x32xbf16>, vector<32x32xbf16>, vector<8x32xf32> -> vector<8x32xf32>
    %c0_13 = arith.constant 0 : index
    %c0_14 = arith.constant 0 : index
    %36 = vector.load %arg9[%c0_13, %c0_14] : memref<1x32xf32, #tpu.memory_space<vmem>>, vector<1x32xf32>
    %37 = vector.broadcast %36 : vector<1x32xf32> to vector<8x32xf32>
    %38 = arith.addf %35, %37 : vector<8x32xf32>
    %cst_15 = arith.constant 0.353553385 : f32
    %39 = vector.broadcast %cst_15 : f32 to vector<8x32xf32>
    %40 = arith.mulf %38, %39 : vector<8x32xf32>
    %41 = arith.truncf %40 : vector<8x32xf32> to vector<8x32xbf16>
    %42 = vector.extract_strided_slice %41 {offsets = [0, 0], sizes = [8, 8], strides = [1, 1]} : vector<8x32xbf16> to vector<8x8xbf16>
    %43 = vector.shape_cast %42 : vector<8x8xbf16> to vector<1x8x8xbf16>
    %44 = vector.extract_strided_slice %41 {offsets = [0, 8], sizes = [8, 8], strides = [1, 1]} : vector<8x32xbf16> to vector<8x8xbf16>
    %45 = vector.shape_cast %44 : vector<8x8xbf16> to vector<1x8x8xbf16>
    %46 = vector.extract_strided_slice %41 {offsets = [0, 16], sizes = [8, 8], strides = [1, 1]} : vector<8x32xbf16> to vector<8x8xbf16>
    %47 = vector.shape_cast %46 : vector<8x8xbf16> to vector<1x8x8xbf16>
    %48 = vector.extract_strided_slice %41 {offsets = [0, 24], sizes = [8, 8], strides = [1, 1]} : vector<8x32xbf16> to vector<8x8xbf16>
    %49 = vector.shape_cast %48 : vector<8x8xbf16> to vector<1x8x8xbf16>
    %50 = tpu.concatenate %43, %45, %47, %49 in 0 : vector<1x8x8xbf16>, vector<1x8x8xbf16>, vector<1x8x8xbf16>, vector<1x8x8xbf16> -> vector<4x8x8xbf16>
    %51 = arith.index_cast %arg0 : i32 to index
    %52 = memref.load %arg2[%51] : memref<2xi32, #tpu.memory_space<smem>>
    %53 = tpu.iota {dimensions = array<i32: 0>} : vector<8x8xi32>
    %54 = vector.broadcast %4 : i32 to vector<8x8xi32>
    %55 = arith.addi %54, %53 : vector<8x8xi32>
    %56 = tpu.iota {dimensions = array<i32: 1>} : vector<8x8xi32>
    %57 = arith.cmpi sle, %56, %55 : vector<8x8xi32>
    %58 = vector.broadcast %52 : i32 to vector<8x8xi32>
    %59 = arith.cmpi slt, %56, %58 : vector<8x8xi32>
    %60 = arith.andi %57, %59 : vector<8x8xi1>
    %c0_16 = arith.constant 0 : index
    %c0_17 = arith.constant 0 : index
    %c0_18 = arith.constant 0 : index
    %61 = vector.load %arg33[%c0_16, %c0_17, %c0_18] : memref<4x8x8xbf16, #tpu.memory_space<vmem>>, vector<4x8x8xbf16>
    %c0_19 = arith.constant 0 : index
    %c0_20 = arith.constant 0 : index
    %c0_21 = arith.constant 0 : index
    %62 = vector.load %arg34[%c0_19, %c0_20, %c0_21] : memref<4x8x8xbf16, #tpu.memory_space<vmem>>, vector<4x8x8xbf16>
    %cst_22 = arith.constant dense<0.000000e+00> : vector<4x8x8xf32>
    %63 = tpu.matmul %50, %61, %cst_22 {dimension_numbers = #tpu.dot_dimension_numbers<[2], [2], [1], [1], [0, 0, 0, 1, 1, 1], [0], [0]>} : vector<4x8x8xbf16>, vector<4x8x8xbf16>, vector<4x8x8xf32> -> vector<4x8x8xf32>
    %64 = vector.shape_cast %60 : vector<8x8xi1> to vector<1x8x8xi1>
    %cst_23 = arith.constant -1.000000e+30 : f32
    %65 = vector.shape_cast %64 : vector<1x8x8xi1> to vector<1x8x8xi1>
    %66 = vector.broadcast %65 : vector<1x8x8xi1> to vector<4x8x8xi1>
    %67 = vector.broadcast %cst_23 : f32 to vector<4x8x8xf32>
    %68 = arith.select %66, %63, %67 : vector<4x8x8xi1>, vector<4x8x8xf32>
    %cst_24 = arith.constant dense<0xFF800000> : vector<4x8xf32>
    %69 = vector.multi_reduction <maximumf>, %68, %cst_24 [2] : vector<4x8x8xf32> to vector<4x8xf32>
    %70 = vector.shape_cast %69 : vector<4x8xf32> to vector<4x8x1xf32>
    %71 = vector.broadcast %70 : vector<4x8x1xf32> to vector<4x8x8xf32>
    %72 = arith.subf %68, %71 : vector<4x8x8xf32>
    %73 = math.exp %72 : vector<4x8x8xf32>
    %74 = vector.shape_cast %60 : vector<8x8xi1> to vector<1x8x8xi1>
    %75 = arith.extui %74 : vector<1x8x8xi1> to vector<1x8x8xi32>
    %76 = arith.sitofp %75 : vector<1x8x8xi32> to vector<1x8x8xf32>
    %77 = vector.broadcast %76 : vector<1x8x8xf32> to vector<4x8x8xf32>
    %78 = arith.mulf %73, %77 : vector<4x8x8xf32>
    %cst_25 = arith.constant dense<0.000000e+00> : vector<4x8xf32>
    %79 = vector.multi_reduction <add>, %78, %cst_25 [2] : vector<4x8x8xf32> to vector<4x8xf32>
    %80 = vector.shape_cast %79 : vector<4x8xf32> to vector<4x8x1xf32>
    %cst_26 = arith.constant 1.000000e-30 : f32
    %81 = vector.broadcast %cst_26 : f32 to vector<4x8x1xf32>
    %82 = arith.addf %80, %81 : vector<4x8x1xf32>
    %83 = tpu.reciprocal %82 {approx = true} : vector<4x8x1xf32> -> vector<4x8x1xf32>
    %84 = vector.broadcast %83 : vector<4x8x1xf32> to vector<4x8x8xf32>
    %85 = arith.mulf %78, %84 : vector<4x8x8xf32>
    %86 = arith.truncf %85 : vector<4x8x8xf32> to vector<4x8x8xbf16>
    %cst_27 = arith.constant dense<0.000000e+00> : vector<4x8x8xf32>
    %87 = tpu.matmul %86, %62, %cst_27 {dimension_numbers = #tpu.dot_dimension_numbers<[2], [1], [1], [2], [0, 0, 0, 1, 1, 2], [0], [0]>} : vector<4x8x8xbf16>, vector<4x8x8xbf16>, vector<4x8x8xf32> -> vector<4x8x8xf32>
    %88 = vector.extract_strided_slice %87 {offsets = [0, 0, 0], sizes = [1, 8, 8], strides = [1, 1, 1]} : vector<4x8x8xf32> to vector<1x8x8xf32>
    %89 = vector.shape_cast %88 : vector<1x8x8xf32> to vector<8x8xf32>
    %90 = vector.extract_strided_slice %87 {offsets = [1, 0, 0], sizes = [1, 8, 8], strides = [1, 1, 1]} : vector<4x8x8xf32> to vector<1x8x8xf32>
    %91 = vector.shape_cast %90 : vector<1x8x8xf32> to vector<8x8xf32>
    %92 = vector.extract_strided_slice %87 {offsets = [2, 0, 0], sizes = [1, 8, 8], strides = [1, 1, 1]} : vector<4x8x8xf32> to vector<1x8x8xf32>
    %93 = vector.shape_cast %92 : vector<1x8x8xf32> to vector<8x8xf32>
    %94 = vector.extract_strided_slice %87 {offsets = [3, 0, 0], sizes = [1, 8, 8], strides = [1, 1, 1]} : vector<4x8x8xf32> to vector<1x8x8xf32>
    %95 = vector.shape_cast %94 : vector<1x8x8xf32> to vector<8x8xf32>
    %96 = tpu.concatenate %89, %91, %93, %95 in 1 : vector<8x8xf32>, vector<8x8xf32>, vector<8x8xf32>, vector<8x8xf32> -> vector<8x32xf32>
    %97 = arith.truncf %96 : vector<8x32xf32> to vector<8x32xbf16>
    %c0_28 = arith.constant 0 : index
    %c0_29 = arith.constant 0 : index
    %98 = vector.load %arg14[%c0_28, %c0_29] : memref<32x32xbf16, #tpu.memory_space<vmem>>, vector<32x32xbf16>
    %cst_30 = arith.constant dense<0.000000e+00> : vector<8x32xf32>
    %99 = tpu.matmul %97, %98, %cst_30 {dimension_numbers = #tpu.dot_dimension_numbers<[1], [0], [0], [1], [0, 0, 1, 1], [], []>} : vector<8x32xbf16>, vector<32x32xbf16>, vector<8x32xf32> -> vector<8x32xf32>
    %c0_31 = arith.constant 0 : index
    %c0_32 = arith.constant 0 : index
    %100 = vector.load %arg15[%c0_31, %c0_32] : memref<1x32xf32, #tpu.memory_space<vmem>>, vector<1x32xf32>
    %101 = vector.broadcast %100 : vector<1x32xf32> to vector<8x32xf32>
    %102 = arith.addf %99, %101 : vector<8x32xf32>
    %103 = arith.addf %8, %102 : vector<8x32xf32>
    %c0_33 = arith.constant 0 : index
    %c0_34 = arith.constant 0 : index
    %104 = vector.load %arg16[%c0_33, %c0_34] : memref<1x32xf32, #tpu.memory_space<vmem>>, vector<1x32xf32>
    %c0_35 = arith.constant 0 : index
    %c0_36 = arith.constant 0 : index
    %105 = vector.load %arg17[%c0_35, %c0_36] : memref<1x32xf32, #tpu.memory_space<vmem>>, vector<1x32xf32>
    %cst_37 = arith.constant dense<0.000000e+00> : vector<8xf32>
    %106 = vector.multi_reduction <add>, %103, %cst_37 [1] : vector<8x32xf32> to vector<8xf32>
    %107 = vector.shape_cast %106 : vector<8xf32> to vector<8x1xf32>
    %cst_38 = arith.constant 3.200000e+01 : f32
    %108 = vector.broadcast %cst_38 : f32 to vector<8x1xf32>
    %109 = arith.divf %107, %108 : vector<8x1xf32>
    %110 = vector.broadcast %109 : vector<8x1xf32> to vector<8x32xf32>
    %111 = arith.subf %103, %110 : vector<8x32xf32>
    %112 = arith.mulf %111, %111 : vector<8x32xf32>
    %cst_39 = arith.constant dense<0.000000e+00> : vector<8xf32>
    %113 = vector.multi_reduction <add>, %112, %cst_39 [1] : vector<8x32xf32> to vector<8xf32>
    %114 = vector.shape_cast %113 : vector<8xf32> to vector<8x1xf32>
    %cst_40 = arith.constant 3.200000e+01 : f32
    %115 = vector.broadcast %cst_40 : f32 to vector<8x1xf32>
    %116 = arith.divf %114, %115 : vector<8x1xf32>
    %117 = vector.broadcast %109 : vector<8x1xf32> to vector<8x32xf32>
    %118 = arith.subf %103, %117 : vector<8x32xf32>
    %cst_41 = arith.constant 9.99999974E-6 : f32
    %119 = vector.broadcast %cst_41 : f32 to vector<8x1xf32>
    %120 = arith.addf %116, %119 : vector<8x1xf32>
    %121 = math.rsqrt %120 : vector<8x1xf32>
    %122 = vector.broadcast %121 : vector<8x1xf32> to vector<8x32xf32>
    %123 = arith.mulf %118, %122 : vector<8x32xf32>
    %124 = vector.broadcast %104 : vector<1x32xf32> to vector<8x32xf32>
    %125 = arith.mulf %123, %124 : vector<8x32xf32>
    %126 = vector.broadcast %105 : vector<1x32xf32> to vector<8x32xf32>
    %127 = arith.addf %125, %126 : vector<8x32xf32>
    %128 = arith.truncf %127 : vector<8x32xf32> to vector<8x32xbf16>
    %c0_42 = arith.constant 0 : index
    %c0_43 = arith.constant 0 : index
    %129 = vector.load %arg18[%c0_42, %c0_43] : memref<32x32xbf16, #tpu.memory_space<vmem>>, vector<32x32xbf16>
    %cst_44 = arith.constant dense<0.000000e+00> : vector<8x32xf32>
    %130 = tpu.matmul %128, %129, %cst_44 {dimension_numbers = #tpu.dot_dimension_numbers<[1], [0], [0], [1], [0, 0, 1, 1], [], []>} : vector<8x32xbf16>, vector<32x32xbf16>, vector<8x32xf32> -> vector<8x32xf32>
    %c0_45 = arith.constant 0 : index
    %c0_46 = arith.constant 0 : index
    %131 = vector.load %arg19[%c0_45, %c0_46] : memref<1x32xf32, #tpu.memory_space<vmem>>, vector<1x32xf32>
    %132 = vector.broadcast %131 : vector<1x32xf32> to vector<8x32xf32>
    %133 = arith.addf %130, %132 : vector<8x32xf32>
    %cst_47 = arith.constant 0.353553385 : f32
    %134 = vector.broadcast %cst_47 : f32 to vector<8x32xf32>
    %135 = arith.mulf %133, %134 : vector<8x32xf32>
    %136 = arith.truncf %135 : vector<8x32xf32> to vector<8x32xbf16>
    %137 = vector.extract_strided_slice %136 {offsets = [0, 0], sizes = [8, 8], strides = [1, 1]} : vector<8x32xbf16> to vector<8x8xbf16>
    %138 = vector.shape_cast %137 : vector<8x8xbf16> to vector<1x8x8xbf16>
    %139 = vector.extract_strided_slice %136 {offsets = [0, 8], sizes = [8, 8], strides = [1, 1]} : vector<8x32xbf16> to vector<8x8xbf16>
    %140 = vector.shape_cast %139 : vector<8x8xbf16> to vector<1x8x8xbf16>
    %141 = vector.extract_strided_slice %136 {offsets = [0, 16], sizes = [8, 8], strides = [1, 1]} : vector<8x32xbf16> to vector<8x8xbf16>
    %142 = vector.shape_cast %141 : vector<8x8xbf16> to vector<1x8x8xbf16>
    %143 = vector.extract_strided_slice %136 {offsets = [0, 24], sizes = [8, 8], strides = [1, 1]} : vector<8x32xbf16> to vector<8x8xbf16>
    %144 = vector.shape_cast %143 : vector<8x8xbf16> to vector<1x8x8xbf16>
    %145 = tpu.concatenate %138, %140, %142, %144 in 0 : vector<1x8x8xbf16>, vector<1x8x8xbf16>, vector<1x8x8xbf16>, vector<1x8x8xbf16> -> vector<4x8x8xbf16>
    %146 = tpu.iota {dimensions = array<i32: 1>} : vector<8x10xi32>
    %147 = arith.index_cast %arg0 : i32 to index
    %148 = memref.load %arg3[%147] : memref<2xi32, #tpu.memory_space<smem>>
    %149 = vector.broadcast %148 : i32 to vector<8x10xi32>
    %150 = arith.cmpi slt, %146, %149 : vector<8x10xi32>
    %c0_48 = arith.constant 0 : index
    %c0_49 = arith.constant 0 : index
    %c0_50 = arith.constant 0 : index
    %151 = vector.load %arg35[%c0_48, %c0_49, %c0_50] : memref<4x10x8xbf16, #tpu.memory_space<vmem>>, vector<4x10x8xbf16>
    %c0_51 = arith.constant 0 : index
    %c0_52 = arith.constant 0 : index
    %c0_53 = arith.constant 0 : index
    %152 = vector.load %arg36[%c0_51, %c0_52, %c0_53] : memref<4x10x8xbf16, #tpu.memory_space<vmem>>, vector<4x10x8xbf16>
    %cst_54 = arith.constant dense<0.000000e+00> : vector<4x8x10xf32>
    %153 = tpu.matmul %145, %151, %cst_54 {dimension_numbers = #tpu.dot_dimension_numbers<[2], [2], [1], [1], [0, 0, 0, 1, 1, 1], [0], [0]>} : vector<4x8x8xbf16>, vector<4x10x8xbf16>, vector<4x8x10xf32> -> vector<4x8x10xf32>
    %154 = vector.shape_cast %150 : vector<8x10xi1> to vector<1x8x10xi1>
    %cst_55 = arith.constant -1.000000e+30 : f32
    %155 = vector.shape_cast %154 : vector<1x8x10xi1> to vector<1x8x10xi1>
    %156 = vector.broadcast %155 : vector<1x8x10xi1> to vector<4x8x10xi1>
    %157 = vector.broadcast %cst_55 : f32 to vector<4x8x10xf32>
    %158 = arith.select %156, %153, %157 : vector<4x8x10xi1>, vector<4x8x10xf32>
    %cst_56 = arith.constant dense<0xFF800000> : vector<4x8xf32>
    %159 = vector.multi_reduction <maximumf>, %158, %cst_56 [2] : vector<4x8x10xf32> to vector<4x8xf32>
    %160 = vector.shape_cast %159 : vector<4x8xf32> to vector<4x8x1xf32>
    %161 = vector.broadcast %160 : vector<4x8x1xf32> to vector<4x8x10xf32>
    %162 = arith.subf %158, %161 : vector<4x8x10xf32>
    %163 = math.exp %162 : vector<4x8x10xf32>
    %164 = vector.shape_cast %150 : vector<8x10xi1> to vector<1x8x10xi1>
    %165 = arith.extui %164 : vector<1x8x10xi1> to vector<1x8x10xi32>
    %166 = arith.sitofp %165 : vector<1x8x10xi32> to vector<1x8x10xf32>
    %167 = vector.broadcast %166 : vector<1x8x10xf32> to vector<4x8x10xf32>
    %168 = arith.mulf %163, %167 : vector<4x8x10xf32>
    %cst_57 = arith.constant dense<0.000000e+00> : vector<4x8xf32>
    %169 = vector.multi_reduction <add>, %168, %cst_57 [2] : vector<4x8x10xf32> to vector<4x8xf32>
    %170 = vector.shape_cast %169 : vector<4x8xf32> to vector<4x8x1xf32>
    %cst_58 = arith.constant 1.000000e-30 : f32
    %171 = vector.broadcast %cst_58 : f32 to vector<4x8x1xf32>
    %172 = arith.addf %170, %171 : vector<4x8x1xf32>
    %173 = tpu.reciprocal %172 {approx = true} : vector<4x8x1xf32> -> vector<4x8x1xf32>
    %174 = vector.broadcast %173 : vector<4x8x1xf32> to vector<4x8x10xf32>
    %175 = arith.mulf %168, %174 : vector<4x8x10xf32>
    %176 = arith.truncf %175 : vector<4x8x10xf32> to vector<4x8x10xbf16>
    %cst_59 = arith.constant dense<0.000000e+00> : vector<4x8x8xf32>
    %177 = tpu.matmul %176, %152, %cst_59 {dimension_numbers = #tpu.dot_dimension_numbers<[2], [1], [1], [2], [0, 0, 0, 1, 1, 2], [0], [0]>} : vector<4x8x10xbf16>, vector<4x10x8xbf16>, vector<4x8x8xf32> -> vector<4x8x8xf32>
    %178 = vector.extract_strided_slice %177 {offsets = [0, 0, 0], sizes = [1, 8, 8], strides = [1, 1, 1]} : vector<4x8x8xf32> to vector<1x8x8xf32>
    %179 = vector.shape_cast %178 : vector<1x8x8xf32> to vector<8x8xf32>
    %180 = vector.extract_strided_slice %177 {offsets = [1, 0, 0], sizes = [1, 8, 8], strides = [1, 1, 1]} : vector<4x8x8xf32> to vector<1x8x8xf32>
    %181 = vector.shape_cast %180 : vector<1x8x8xf32> to vector<8x8xf32>
    %182 = vector.extract_strided_slice %177 {offsets = [2, 0, 0], sizes = [1, 8, 8], strides = [1, 1, 1]} : vector<4x8x8xf32> to vector<1x8x8xf32>
    %183 = vector.shape_cast %182 : vector<1x8x8xf32> to vector<8x8xf32>
    %184 = vector.extract_strided_slice %177 {offsets = [3, 0, 0], sizes = [1, 8, 8], strides = [1, 1, 1]} : vector<4x8x8xf32> to vector<1x8x8xf32>
    %185 = vector.shape_cast %184 : vector<1x8x8xf32> to vector<8x8xf32>
    %186 = tpu.concatenate %179, %181, %183, %185 in 1 : vector<8x8xf32>, vector<8x8xf32>, vector<8x8xf32>, vector<8x8xf32> -> vector<8x32xf32>
    %187 = arith.truncf %186 : vector<8x32xf32> to vector<8x32xbf16>
    %c0_60 = arith.constant 0 : index
    %c0_61 = arith.constant 0 : index
    %188 = vector.load %arg24[%c0_60, %c0_61] : memref<32x32xbf16, #tpu.memory_space<vmem>>, vector<32x32xbf16>
    %cst_62 = arith.constant dense<0.000000e+00> : vector<8x32xf32>
    %189 = tpu.matmul %187, %188, %cst_62 {dimension_numbers = #tpu.dot_dimension_numbers<[1], [0], [0], [1], [0, 0, 1, 1], [], []>} : vector<8x32xbf16>, vector<32x32xbf16>, vector<8x32xf32> -> vector<8x32xf32>
    %c0_63 = arith.constant 0 : index
    %c0_64 = arith.constant 0 : index
    %190 = vector.load %arg25[%c0_63, %c0_64] : memref<1x32xf32, #tpu.memory_space<vmem>>, vector<1x32xf32>
    %191 = vector.broadcast %190 : vector<1x32xf32> to vector<8x32xf32>
    %192 = arith.addf %189, %191 : vector<8x32xf32>
    %193 = arith.addf %103, %192 : vector<8x32xf32>
    %c0_65 = arith.constant 0 : index
    %c0_66 = arith.constant 0 : index
    %194 = vector.load %arg26[%c0_65, %c0_66] : memref<1x32xf32, #tpu.memory_space<vmem>>, vector<1x32xf32>
    %c0_67 = arith.constant 0 : index
    %c0_68 = arith.constant 0 : index
    %195 = vector.load %arg27[%c0_67, %c0_68] : memref<1x32xf32, #tpu.memory_space<vmem>>, vector<1x32xf32>
    %cst_69 = arith.constant dense<0.000000e+00> : vector<8xf32>
    %196 = vector.multi_reduction <add>, %193, %cst_69 [1] : vector<8x32xf32> to vector<8xf32>
    %197 = vector.shape_cast %196 : vector<8xf32> to vector<8x1xf32>
    %cst_70 = arith.constant 3.200000e+01 : f32
    %198 = vector.broadcast %cst_70 : f32 to vector<8x1xf32>
    %199 = arith.divf %197, %198 : vector<8x1xf32>
    %200 = vector.broadcast %199 : vector<8x1xf32> to vector<8x32xf32>
    %201 = arith.subf %193, %200 : vector<8x32xf32>
    %202 = arith.mulf %201, %201 : vector<8x32xf32>
    %cst_71 = arith.constant dense<0.000000e+00> : vector<8xf32>
    %203 = vector.multi_reduction <add>, %202, %cst_71 [1] : vector<8x32xf32> to vector<8xf32>
    %204 = vector.shape_cast %203 : vector<8xf32> to vector<8x1xf32>
    %cst_72 = arith.constant 3.200000e+01 : f32
    %205 = vector.broadcast %cst_72 : f32 to vector<8x1xf32>
    %206 = arith.divf %204, %205 : vector<8x1xf32>
    %207 = vector.broadcast %199 : vector<8x1xf32> to vector<8x32xf32>
    %208 = arith.subf %193, %207 : vector<8x32xf32>
    %cst_73 = arith.constant 9.99999974E-6 : f32
    %209 = vector.broadcast %cst_73 : f32 to vector<8x1xf32>
    %210 = arith.addf %206, %209 : vector<8x1xf32>
    %211 = math.rsqrt %210 : vector<8x1xf32>
    %212 = vector.broadcast %211 : vector<8x1xf32> to vector<8x32xf32>
    %213 = arith.mulf %208, %212 : vector<8x32xf32>
    %214 = vector.broadcast %194 : vector<1x32xf32> to vector<8x32xf32>
    %215 = arith.mulf %213, %214 : vector<8x32xf32>
    %216 = vector.broadcast %195 : vector<1x32xf32> to vector<8x32xf32>
    %217 = arith.addf %215, %216 : vector<8x32xf32>
    %218 = arith.truncf %217 : vector<8x32xf32> to vector<8x32xbf16>
    %c0_74 = arith.constant 0 : index
    %c0_75 = arith.constant 0 : index
    %219 = vector.load %arg28[%c0_74, %c0_75] : memref<32x64xbf16, #tpu.memory_space<vmem>>, vector<32x64xbf16>
    %cst_76 = arith.constant dense<0.000000e+00> : vector<8x64xf32>
    %220 = tpu.matmul %218, %219, %cst_76 {dimension_numbers = #tpu.dot_dimension_numbers<[1], [0], [0], [1], [0, 0, 1, 1], [], []>} : vector<8x32xbf16>, vector<32x64xbf16>, vector<8x64xf32> -> vector<8x64xf32>
    %c0_77 = arith.constant 0 : index
    %c0_78 = arith.constant 0 : index
    %221 = vector.load %arg29[%c0_77, %c0_78] : memref<1x64xf32, #tpu.memory_space<vmem>>, vector<1x64xf32>
    %222 = vector.broadcast %221 : vector<1x64xf32> to vector<8x64xf32>
    %223 = arith.addf %220, %222 : vector<8x64xf32>
    %cst_79 = arith.constant 0.000000e+00 : f32
    %224 = vector.broadcast %cst_79 : f32 to vector<8x64xf32>
    %225 = arith.maximumf %223, %224 : vector<8x64xf32>
    %226 = arith.truncf %225 : vector<8x64xf32> to vector<8x64xbf16>
    %c0_80 = arith.constant 0 : index
    %c0_81 = arith.constant 0 : index
    %227 = vector.load %arg30[%c0_80, %c0_81] : memref<64x32xbf16, #tpu.memory_space<vmem>>, vector<64x32xbf16>
    %cst_82 = arith.constant dense<0.000000e+00> : vector<8x32xf32>
    %228 = tpu.matmul %226, %227, %cst_82 {dimension_numbers = #tpu.dot_dimension_numbers<[1], [0], [0], [1], [0, 0, 1, 1], [], []>} : vector<8x64xbf16>, vector<64x32xbf16>, vector<8x32xf32> -> vector<8x32xf32>
    %c0_83 = arith.constant 0 : index
    %c0_84 = arith.constant 0 : index
    %229 = vector.load %arg31[%c0_83, %c0_84] : memref<1x32xf32, #tpu.memory_space<vmem>>, vector<1x32xf32>
    %230 = vector.broadcast %229 : vector<1x32xf32> to vector<8x32xf32>
    %231 = arith.addf %228, %230 : vector<8x32xf32>
    %232 = arith.addf %193, %231 : vector<8x32xf32>
    %233 = arith.truncf %232 : vector<8x32xf32> to vector<8x32xbf16>
    %c0_85 = arith.constant 0 : index
    %c0_86 = arith.constant 0 : index
    %c0_87 = arith.constant 0 : index
    %234 = vector.load %arg32[%c0_85, %c0_86, %c0_87] : memref<1x8x32xbf16, #tpu.memory_space<vmem>>, vector<1x8x32xbf16>
    %235 = vector.shape_cast %234 : vector<1x8x32xbf16> to vector<8x32xbf16>
    %236 = vector.shape_cast %233 : vector<8x32xbf16> to vector<1x8x32xbf16>
    tpu.vector_store %arg32[%c0_85, %c0_86, %c0_87], %236 {strides = array<i32>} : memref<1x8x32xbf16, #tpu.memory_space<vmem>>, vector<1x8x32xbf16>,
    return
  }
  func.func @transform_0(%arg0: i32, %arg1: i32, %arg2: memref<2xi32, #tpu.memory_space<smem>>, %arg3: memref<2xi32, #tpu.memory_space<smem>>) -> (i32, i32, i32) {
    %c0_i32 = arith.constant 0 : i32
    %c0_i32_0 = arith.constant 0 : i32
    %c0_i32_1 = arith.constant 0 : i32
    return %arg0, %c0_i32, %c0_i32_0 : i32, i32, i32
  }
  func.func @transform_1(%arg0: i32, %arg1: i32, %arg2: memref<2xi32, #tpu.memory_space<smem>>, %arg3: memref<2xi32, #tpu.memory_space<smem>>) -> (i32, i32, i32) {
    %c0_i32 = arith.constant 0 : i32
    %c0_i32_0 = arith.constant 0 : i32
    %c0_i32_1 = arith.constant 0 : i32
    return %arg0, %c0_i32, %c0_i32_0 : i32, i32, i32
  }
  func.func @transform_2(%arg0: i32, %arg1: i32, %arg2: memref<2xi32, #tpu.memory_space<smem>>, %arg3: memref<2xi32, #tpu.memory_space<smem>>) -> (i32, i32) {
    %c0_i32 = arith.constant 0 : i32
    %c0_i32_0 = arith.constant 0 : i32
    %c0_i32_1 = arith.constant 0 : i32
    return %c0_i32, %c0_i32_0 : i32, i32
  }
  func.func @transform_3(%arg0: i32, %arg1: i32, %arg2: memref<2xi32, #tpu.memory_space<smem>>, %arg3: memref<2xi32, #tpu.memory_space<smem>>) -> (i32, i32) {
    %c0_i32 = arith.constant 0 : i32
    %c0_i32_0 = arith.constant 0 : i32
    %c0_i32_1 = arith.constant 0 : i32
    return %c0_i32, %c0_i32_0 : i32, i32
  }
  func.func @transform_4(%arg0: i32, %arg1: i32, %arg2: memref<2xi32, #tpu.memory_space<smem>>, %arg3: memref<2xi32, #tpu.memory_space<smem>>) -> (i32, i32) {
    %c0_i32 = arith.constant 0 : i32
    %c0_i32_0 = arith.constant 0 : i32
    %c0_i32_1 = arith.constant 0 : i32
    return %c0_i32, %c0_i32_0 : i32, i32
  }
  func.func @transform_5(%arg0: i32, %arg1: i32, %arg2: memref<2xi32, #tpu.memory_space<smem>>, %arg3: memref<2xi32, #tpu.memory_space<smem>>) -> (i32, i32) {
    %c0_i32 = arith.constant 0 : i32
    %c0_i32_0 = arith.constant 0 : i32
    %c0_i32_1 = arith.constant 0 : i32
    return %c0_i32, %c0_i32_0 : i32, i32
  }
  func.func @transform_6(%arg0: i32, %arg1: i32, %arg2: memref<2xi32, #tpu.memory_space<smem>>, %arg3: memref<2xi32, #tpu.memory_space<smem>>) -> (i32, i32) {
    %c0_i32 = arith.constant 0 : i32
    %c0_i32_0 = arith.constant 0 : i32
    %c0_i32_1 = arith.constant 0 : i32
    return %c0_i32, %c0_i32_0 : i32, i32
  }
  func.func @transform_7(%arg0: i32, %arg1: i32, %arg2: memref<2xi32, #tpu.memory_space<smem>>, %arg3: memref<2xi32, #tpu.memory_space<smem>>) -> (i32, i32) {
    %c0_i32 = arith.constant 0 : i32
    %c0_i32_0 = arith.constant 0 : i32
    %c0_i32_1 = arith.constant 0 : i32
    return %c0_i32, %c0_i32_0 : i32, i32
  }
  func.func @transform_8(%arg0: i32, %arg1: i32, %arg2: memref<2xi32, #tpu.memory_space<smem>>, %arg3: memref<2xi32, #tpu.memory_space<smem>>) -> (i32, i32) {
    %c0_i32 = arith.constant 0 : i32
    %c0_i32_0 = arith.constant 0 : i32
    %c0_i32_1 = arith.constant 0 : i32
    return %c0_i32, %c0_i32_0 : i32, i32
  }
  func.func @transform_9(%arg0: i32, %arg1: i32, %arg2: memref<2xi32, #tpu.memory_space<smem>>, %arg3: memref<2xi32, #tpu.memory_space<smem>>) -> (i32, i32) {
    %c0_i32 = arith.constant 0 : i32
    %c0_i32_0 = arith.constant 0 : i32
    %c0_i32_1 = arith.constant 0 : i32
    return %c0_i32, %c0_i32_0 : i32, i32
  }
  func.func @transform_10(%arg0: i32, %arg1: i32, %arg2: memref<2xi32, #tpu.memory_space<smem>>, %arg3: memref<2xi32, #tpu.memory_space<smem>>) -> (i32, i32) {
    %c0_i32 = arith.constant 0 : i32
    %c0_i32_0 = arith.constant 0 : i32
    %c0_i32_1 = arith.constant 0 : i32
    return %c0_i32, %c0_i32_0 : i32, i32
  }
  func.func @transform_11(%arg0: i32, %arg1: i32, %arg2: memref<2xi32, #tpu.memory_space<smem>>, %arg3: memref<2xi32, #tpu.memory_space<smem>>) -> (i32, i32) {
    %c0_i32 = arith.constant 0 : i32
    %c0_i32_0 = arith.constant 0 : i32
    %c0_i32_1 = arith.constant 0 : i32
    return %c0_i32, %c0_i32_0 : i32, i32
  }
  func.func @transform_12(%arg0: i32, %arg1: i32, %arg2: memref<2xi32, #tpu.memory_space<smem>>, %arg3: memref<2xi32, #tpu.memory_space<smem>>) -> (i32, i32) {
    %c0_i32 = arith.constant 0 : i32
    %c0_i32_0 = arith.constant 0 : i32
    %c0_i32_1 = arith.constant 0 : i32
    return %c0_i32, %c0_i32_0 : i32, i32
  }
  func.func @transform_13(%arg0: i32, %arg1: i32, %arg2: memref<2xi32, #tpu.memory_space<smem>>, %arg3: memref<2xi32, #tpu.memory_space<smem>>) -> (i32, i32) {
    %c0_i32 = arith.constant 0 : i32
    %c0_i32_0 = arith.constant 0 : i32
    %c0_i32_1 = arith.constant 0 : i32
    return %c0_i32, %c0_i32_0 : i32, i32
  }
  func.func @transform_14(%arg0: i32, %arg1: i32, %arg2: memref<2xi32, #tpu.memory_space<smem>>, %arg3: memref<2xi32, #tpu.memory_space<smem>>) -> (i32, i32) {
    %c0_i32 = arith.constant 0 : i32
    %c0_i32_0 = arith.constant 0 : i32
    %c0_i32_1 = arith.constant 0 : i32
    return %c0_i32, %c0_i32_0 : i32, i32
  }
  func.func @transform_15(%arg0: i32, %arg1: i32, %arg2: memref<2xi32, #tpu.memory_space<smem>>, %arg3: memref<2xi32, #tpu.memory_space<smem>>) -> (i32, i32) {
    %c0_i32 = arith.constant 0 : i32
    %c0_i32_0 = arith.constant 0 : i32
    %c0_i32_1 = arith.constant 0 : i32
    return %c0_i32, %c0_i32_0 : i32, i32
  }
  func.func @transform_16(%arg0: i32, %arg1: i32, %arg2: memref<2xi32, #tpu.memory_space<smem>>, %arg3: memref<2xi32, #tpu.memory_space<smem>>) -> (i32, i32) {
    %c0_i32 = arith.constant 0 : i32
    %c0_i32_0 = arith.constant 0 : i32
    %c0_i32_1 = arith.constant 0 : i32
    return %c0_i32, %c0_i32_0 : i32, i32
  }
  func.func @transform_17(%arg0: i32, %arg1: i32, %arg2: memref<2xi32, #tpu.memory_space<smem>>, %arg3: memref<2xi32, #tpu.memory_space<smem>>) -> (i32, i32) {
    %c0_i32 = arith.constant 0 : i32
    %c0_i32_0 = arith.constant 0 : i32
    %c0_i32_1 = arith.constant 0 : i32
    return %c0_i32, %c0_i32_0 : i32, i32
  }
  func.func @transform_18(%arg0: i32, %arg1: i32, %arg2: memref<2xi32, #tpu.memory_space<smem>>, %arg3: memref<2xi32, #tpu.memory_space<smem>>) -> (i32, i32) {
    %c0_i32 = arith.constant 0 : i32
    %c0_i32_0 = arith.constant 0 : i32
    %c0_i32_1 = arith.constant 0 : i32
    return %c0_i32, %c0_i32_0 : i32, i32
  }
  func.func @transform_19(%arg0: i32, %arg1: i32, %arg2: memref<2xi32, #tpu.memory_space<smem>>, %arg3: memref<2xi32, #tpu.memory_space<smem>>) -> (i32, i32) {
    %c0_i32 = arith.constant 0 : i32
    %c0_i32_0 = arith.constant 0 : i32
    %c0_i32_1 = arith.constant 0 : i32
    return %c0_i32, %c0_i32_0 : i32, i32
  }
  func.func @transform_20(%arg0: i32, %arg1: i32, %arg2: memref<2xi32, #tpu.memory_space<smem>>, %arg3: memref<2xi32, #tpu.memory_space<smem>>) -> (i32, i32) {
    %c0_i32 = arith.constant 0 : i32
    %c0_i32_0 = arith.constant 0 : i32
    %c0_i32_1 = arith.constant 0 : i32
    return %c0_i32, %c0_i32_0 : i32, i32
  }
  func.func @transform_21(%arg0: i32, %arg1: i32, %arg2: memref<2xi32, #tpu.memory_space<smem>>, %arg3: memref<2xi32, #tpu.memory_space<smem>>) -> (i32, i32) {
    %c0_i32 = arith.constant 0 : i32
    %c0_i32_0 = arith.constant 0 : i32
    %c0_i32_1 = arith.constant 0 : i32
    return %c0_i32, %c0_i32_0 : i32, i32
  }
  func.func @transform_22(%arg0: i32, %arg1: i32, %arg2: memref<2xi32, #tpu.memory_space<smem>>, %arg3: memref<2xi32, #tpu.memory_space<smem>>) -> (i32, i32) {
    %c0_i32 = arith.constant 0 : i32
    %c0_i32_0 = arith.constant 0 : i32
    %c0_i32_1 = arith.constant 0 : i32
    return %c0_i32, %c0_i32_0 : i32, i32
  }
  func.func @transform_23(%arg0: i32, %arg1: i32, %arg2: memref<2xi32, #tpu.memory_space<smem>>, %arg3: memref<2xi32, #tpu.memory_space<smem>>) -> (i32, i32) {
    %c0_i32 = arith.constant 0 : i32
    %c0_i32_0 = arith.constant 0 : i32
    %c0_i32_1 = arith.constant 0 : i32
    return %c0_i32, %c0_i32_0 : i32, i32
  }
  func.func @transform_24(%arg0: i32, %arg1: i32, %arg2: memref<2xi32, #tpu.memory_space<smem>>, %arg3: memref<2xi32, #tpu.memory_space<smem>>) -> (i32, i32) {
    %c0_i32 = arith.constant 0 : i32
    %c0_i32_0 = arith.constant 0 : i32
    %c0_i32_1 = arith.constant 0 : i32
    return %c0_i32, %c0_i32_0 : i32, i32
  }
  func.func @transform_25(%arg0: i32, %arg1: i32, %arg2: memref<2xi32, #tpu.memory_space<smem>>, %arg3: memref<2xi32, #tpu.memory_space<smem>>) -> (i32, i32) {
    %c0_i32 = arith.constant 0 : i32
    %c0_i32_0 = arith.constant 0 : i32
    %c0_i32_1 = arith.constant 0 : i32
    return %c0_i32, %c0_i32_0 : i32, i32
  }
  func.func @transform_26(%arg0: i32, %arg1: i32, %arg2: memref<2xi32, #tpu.memory_space<smem>>, %arg3: memref<2xi32, #tpu.memory_space<smem>>) -> (i32, i32) {
    %c0_i32 = arith.constant 0 : i32
    %c0_i32_0 = arith.constant 0 : i32
    %c0_i32_1 = arith.constant 0 : i32
    return %c0_i32, %c0_i32_0 : i32, i32
  }
  func.func @transform_27(%arg0: i32, %arg1: i32, %arg2: memref<2xi32, #tpu.memory_space<smem>>, %arg3: memref<2xi32, #tpu.memory_space<smem>>) -> (i32, i32) {
    %c0_i32 = arith.constant 0 : i32
    %c0_i32_0 = arith.constant 0 : i32
    %c0_i32_1 = arith.constant 0 : i32
    return %c0_i32, %c0_i32_0 : i32, i32
  }
  func.func @transform_28(%arg0: i32, %arg1: i32, %arg2: memref<2xi32, #tpu.memory_space<smem>>, %arg3: memref<2xi32, #tpu.memory_space<smem>>) -> (i32, i32, i32) {
    %c0_i32 = arith.constant 0 : i32
    %c0_i32_0 = arith.constant 0 : i32
    return %arg0, %arg1, %c0_i32 : i32, i32, i32
  }
}

module attributes {stable_mosaic.version = 11 : i64} {
  func.func @_conatt_kernel(%arg0: i32, %arg1: memref<1x8x32xbf16, #tpu.memory_space<vmem>>, %arg2: memref<1x32xf32, #tpu.memory_space<vmem>>, %arg3: memref<1x32xf32, #tpu.memory_space<vmem>>, %arg4: memref<32x16xbf16, #tpu.memory_space<vmem>>, %arg5: memref<1x16xf32, #tpu.memory_space<vmem>>, %arg6: memref<6x16xbf16, #tpu.memory_space<vmem>>, %arg7: memref<6x24xbf16, #tpu.memory_space<vmem>>, %arg8: memref<1x8x1xi32, #tpu.memory_space<vmem>>, %arg9: memref<1x8x32xbf16, #tpu.memory_space<vmem>>, %arg10: memref<1x8x24xbf16, #tpu.memory_space<vmem>>) attributes {dimension_semantics = [#tpu.dimension_semantics<parallel>], iteration_bounds = array<i64: 2>, scalar_prefetch = 0 : i64, scratch_operands = 0 : i64, tpu.core_type = #tpu.core_type<tc>, window_params = [{transform_indices = @transform_0, window_bounds = array<i64: 1, 8, 32>}, {pipeline_mode = #tpu.pipeline_mode<synchronous>, transform_indices = @transform_1, window_bounds = array<i64: 1, 32>}, {pipeline_mode = #tpu.pipeline_mode<synchronous>, transform_indices = @transform_2, window_bounds = array<i64: 1, 32>}, {pipeline_mode = #tpu.pipeline_mode<synchronous>, transform_indices = @transform_3, window_bounds = array<i64: 32, 16>}, {pipeline_mode = #tpu.pipeline_mode<synchronous>, transform_indices = @transform_4, window_bounds = array<i64: 1, 16>}, {pipeline_mode = #tpu.pipeline_mode<synchronous>, transform_indices = @transform_5, window_bounds = array<i64: 6, 16>}, {pipeline_mode = #tpu.pipeline_mode<synchronous>, transform_indices = @transform_6, window_bounds = array<i64: 6, 24>}, {transform_indices = @transform_7, window_bounds = array<i64: 1, 8, 1>}, {transform_indices = @transform_8, window_bounds = array<i64: 1, 8, 32>}, {transform_indices = @transform_9, window_bounds = array<i64: 1, 8, 24>}]} {
    %c0 = arith.constant 0 : index
    %c0_0 = arith.constant 0 : index
    %c0_1 = arith.constant 0 : index
    %0 = vector.load %arg1[%c0, %c0_0, %c0_1] : memref<1x8x32xbf16, #tpu.memory_space<vmem>>, vector<1x8x32xbf16>
    %1 = vector.shape_cast %0 : vector<1x8x32xbf16> to vector<8x32xbf16>
    %2 = arith.extf %1 : vector<8x32xbf16> to vector<8x32xf32>
    %c0_2 = arith.constant 0 : index
    %c0_3 = arith.constant 0 : index
    %3 = vector.load %arg2[%c0_2, %c0_3] : memref<1x32xf32, #tpu.memory_space<vmem>>, vector<1x32xf32>
    %c0_4 = arith.constant 0 : index
    %c0_5 = arith.constant 0 : index
    %4 = vector.load %arg3[%c0_4, %c0_5] : memref<1x32xf32, #tpu.memory_space<vmem>>, vector<1x32xf32>
    %cst = arith.constant dense<0.000000e+00> : vector<8xf32>
    %5 = vector.multi_reduction <add>, %2, %cst [1] : vector<8x32xf32> to vector<8xf32>
    %6 = vector.shape_cast %5 : vector<8xf32> to vector<8x1xf32>
    %cst_6 = arith.constant 3.200000e+01 : f32
    %7 = vector.broadcast %cst_6 : f32 to vector<8x1xf32>
    %8 = arith.divf %6, %7 : vector<8x1xf32>
    %9 = vector.broadcast %8 : vector<8x1xf32> to vector<8x32xf32>
    %10 = arith.subf %2, %9 : vector<8x32xf32>
    %11 = arith.mulf %10, %10 : vector<8x32xf32>
    %cst_7 = arith.constant dense<0.000000e+00> : vector<8xf32>
    %12 = vector.multi_reduction <add>, %11, %cst_7 [1] : vector<8x32xf32> to vector<8xf32>
    %13 = vector.shape_cast %12 : vector<8xf32> to vector<8x1xf32>
    %cst_8 = arith.constant 3.200000e+01 : f32
    %14 = vector.broadcast %cst_8 : f32 to vector<8x1xf32>
    %15 = arith.divf %13, %14 : vector<8x1xf32>
    %16 = vector.broadcast %8 : vector<8x1xf32> to vector<8x32xf32>
    %17 = arith.subf %2, %16 : vector<8x32xf32>
    %cst_9 = arith.constant 9.99999974E-6 : f32
    %18 = vector.broadcast %cst_9 : f32 to vector<8x1xf32>
    %19 = arith.addf %15, %18 : vector<8x1xf32>
    %20 = math.rsqrt %19 : vector<8x1xf32>
    %21 = vector.broadcast %20 : vector<8x1xf32> to vector<8x32xf32>
    %22 = arith.mulf %17, %21 : vector<8x32xf32>
    %23 = vector.broadcast %3 : vector<1x32xf32> to vector<8x32xf32>
    %24 = arith.mulf %22, %23 : vector<8x32xf32>
    %25 = vector.broadcast %4 : vector<1x32xf32> to vector<8x32xf32>
    %26 = arith.addf %24, %25 : vector<8x32xf32>
    %27 = arith.truncf %26 : vector<8x32xf32> to vector<8x32xbf16>
    %c0_10 = arith.constant 0 : index
    %c0_11 = arith.constant 0 : index
    %28 = vector.load %arg4[%c0_10, %c0_11] : memref<32x16xbf16, #tpu.memory_space<vmem>>, vector<32x16xbf16>
    %cst_12 = arith.constant dense<0.000000e+00> : vector<8x16xf32>
    %29 = tpu.matmul %27, %28, %cst_12 {dimension_numbers = #tpu.dot_dimension_numbers<[1], [0], [0], [1], [0, 0, 1, 1], [], []>} : vector<8x32xbf16>, vector<32x16xbf16>, vector<8x16xf32> -> vector<8x16xf32>
    %c0_13 = arith.constant 0 : index
    %c0_14 = arith.constant 0 : index
    %30 = vector.load %arg5[%c0_13, %c0_14] : memref<1x16xf32, #tpu.memory_space<vmem>>, vector<1x16xf32>
    %31 = vector.broadcast %30 : vector<1x16xf32> to vector<8x16xf32>
    %32 = arith.addf %29, %31 : vector<8x16xf32>
    %cst_15 = arith.constant 2.500000e-01 : f32
    %33 = vector.broadcast %cst_15 : f32 to vector<8x16xf32>
    %34 = arith.mulf %32, %33 : vector<8x16xf32>
    %35 = arith.truncf %34 : vector<8x16xf32> to vector<8x16xbf16>
    %c0_16 = arith.constant 0 : index
    %c0_17 = arith.constant 0 : index
    %36 = vector.load %arg6[%c0_16, %c0_17] : memref<6x16xbf16, #tpu.memory_space<vmem>>, vector<6x16xbf16>
    %cst_18 = arith.constant dense<0.000000e+00> : vector<8x6xf32>
    %37 = tpu.matmul %35, %36, %cst_18 {dimension_numbers = #tpu.dot_dimension_numbers<[1], [1], [0], [0], [0, 0, 1, 0], [], []>} : vector<8x16xbf16>, vector<6x16xbf16>, vector<8x6xf32> -> vector<8x6xf32>
    %cst_19 = arith.constant dense<0xFF800000> : vector<8xf32>
    %38 = vector.multi_reduction <maximumf>, %37, %cst_19 [1] : vector<8x6xf32> to vector<8xf32>
    %39 = vector.shape_cast %38 : vector<8xf32> to vector<8x1xf32>
    %40 = vector.broadcast %39 : vector<8x1xf32> to vector<8x6xf32>
    %41 = arith.subf %37, %40 : vector<8x6xf32>
    %42 = math.exp %41 : vector<8x6xf32>
    %cst_20 = arith.constant dense<0.000000e+00> : vector<8xf32>
    %43 = vector.multi_reduction <add>, %42, %cst_20 [1] : vector<8x6xf32> to vector<8xf32>
    %44 = vector.shape_cast %43 : vector<8xf32> to vector<8x1xf32>
    %45 = tpu.reciprocal %44 {approx = true} : vector<8x1xf32> -> vector<8x1xf32>
    %46 = vector.broadcast %45 : vector<8x1xf32> to vector<8x6xf32>
    %47 = arith.mulf %42, %46 : vector<8x6xf32>
    %48 = arith.truncf %47 : vector<8x6xf32> to vector<8x6xbf16>
    %c0_21 = arith.constant 0 : index
    %c0_22 = arith.constant 0 : index
    %49 = vector.load %arg7[%c0_21, %c0_22] : memref<6x24xbf16, #tpu.memory_space<vmem>>, vector<6x24xbf16>
    %cst_23 = arith.constant dense<0.000000e+00> : vector<8x24xf32>
    %50 = tpu.matmul %48, %49, %cst_23 {dimension_numbers = #tpu.dot_dimension_numbers<[1], [0], [0], [1], [0, 0, 1, 1], [], []>} : vector<8x6xbf16>, vector<6x24xbf16>, vector<8x24xf32> -> vector<8x24xf32>
    %c0_24 = arith.constant 0 : index
    %c0_25 = arith.constant 0 : index
    %c0_26 = arith.constant 0 : index
    %51 = vector.load %arg8[%c0_24, %c0_25, %c0_26] : memref<1x8x1xi32, #tpu.memory_space<vmem>>, vector<1x8x1xi32>
    %52 = vector.shape_cast %51 : vector<1x8x1xi32> to vector<8x1xi32>
    %c0_i32 = arith.constant 0 : i32
    %53 = vector.broadcast %c0_i32 : i32 to vector<8x1xi32>
    %54 = arith.cmpi sgt, %52, %53 : vector<8x1xi32>
    %cst_27 = arith.constant 0.000000e+00 : f32
    %55 = vector.shape_cast %54 : vector<8x1xi1> to vector<8x1xi1>
    %56 = vector.broadcast %55 : vector<8x1xi1> to vector<8x24xi1>
    %57 = vector.broadcast %cst_27 : f32 to vector<8x24xf32>
    %58 = arith.select %56, %50, %57 : vector<8x24xi1>, vector<8x24xf32>
    %59 = arith.truncf %26 : vector<8x32xf32> to vector<8x32xbf16>
    %c0_28 = arith.constant 0 : index
    %c0_29 = arith.constant 0 : index
    %c0_30 = arith.constant 0 : index
    %60 = vector.load %arg9[%c0_28, %c0_29, %c0_30] : memref<1x8x32xbf16, #tpu.memory_space<vmem>>, vector<1x8x32xbf16>
    %61 = vector.shape_cast %60 : vector<1x8x32xbf16> to vector<8x32xbf16>
    %62 = vector.shape_cast %59 : vector<8x32xbf16> to vector<1x8x32xbf16>
    tpu.vector_store %arg9[%c0_28, %c0_29, %c0_30], %62 {strides = array<i32>} : memref<1x8x32xbf16, #tpu.memory_space<vmem>>, vector<1x8x32xbf16>,
    %63 = arith.truncf %58 : vector<8x24xf32> to vector<8x24xbf16>
    %c0_31 = arith.constant 0 : index
    %c0_32 = arith.constant 0 : index
    %c0_33 = arith.constant 0 : index
    %64 = vector.load %arg10[%c0_31, %c0_32, %c0_33] : memref<1x8x24xbf16, #tpu.memory_space<vmem>>, vector<1x8x24xbf16>
    %65 = vector.shape_cast %64 : vector<1x8x24xbf16> to vector<8x24xbf16>
    %66 = vector.shape_cast %63 : vector<8x24xbf16> to vector<1x8x24xbf16>
    tpu.vector_store %arg10[%c0_31, %c0_32, %c0_33], %66 {strides = array<i32>} : memref<1x8x24xbf16, #tpu.memory_space<vmem>>, vector<1x8x24xbf16>,
    return
  }
  func.func @transform_0(%arg0: i32) -> (i32, i32, i32) {
    %c0_i32 = arith.constant 0 : i32
    %c0_i32_0 = arith.constant 0 : i32
    %c0_i32_1 = arith.constant 0 : i32
    return %arg0, %c0_i32, %c0_i32_0 : i32, i32, i32
  }
  func.func @transform_1(%arg0: i32) -> (i32, i32) {
    %c0_i32 = arith.constant 0 : i32
    %c0_i32_0 = arith.constant 0 : i32
    %c0_i32_1 = arith.constant 0 : i32
    return %c0_i32, %c0_i32_0 : i32, i32
  }
  func.func @transform_2(%arg0: i32) -> (i32, i32) {
    %c0_i32 = arith.constant 0 : i32
    %c0_i32_0 = arith.constant 0 : i32
    %c0_i32_1 = arith.constant 0 : i32
    return %c0_i32, %c0_i32_0 : i32, i32
  }
  func.func @transform_3(%arg0: i32) -> (i32, i32) {
    %c0_i32 = arith.constant 0 : i32
    %c0_i32_0 = arith.constant 0 : i32
    %c0_i32_1 = arith.constant 0 : i32
    return %c0_i32, %c0_i32_0 : i32, i32
  }
  func.func @transform_4(%arg0: i32) -> (i32, i32) {
    %c0_i32 = arith.constant 0 : i32
    %c0_i32_0 = arith.constant 0 : i32
    %c0_i32_1 = arith.constant 0 : i32
    return %c0_i32, %c0_i32_0 : i32, i32
  }
  func.func @transform_5(%arg0: i32) -> (i32, i32) {
    %c0_i32 = arith.constant 0 : i32
    %c0_i32_0 = arith.constant 0 : i32
    %c0_i32_1 = arith.constant 0 : i32
    return %c0_i32, %c0_i32_0 : i32, i32
  }
  func.func @transform_6(%arg0: i32) -> (i32, i32) {
    %c0_i32 = arith.constant 0 : i32
    %c0_i32_0 = arith.constant 0 : i32
    %c0_i32_1 = arith.constant 0 : i32
    return %c0_i32, %c0_i32_0 : i32, i32
  }
  func.func @transform_7(%arg0: i32) -> (i32, i32, i32) {
    %c0_i32 = arith.constant 0 : i32
    %c0_i32_0 = arith.constant 0 : i32
    %c0_i32_1 = arith.constant 0 : i32
    return %arg0, %c0_i32, %c0_i32_0 : i32, i32, i32
  }
  func.func @transform_8(%arg0: i32) -> (i32, i32, i32) {
    %c0_i32 = arith.constant 0 : i32
    %c0_i32_0 = arith.constant 0 : i32
    %c0_i32_1 = arith.constant 0 : i32
    return %arg0, %c0_i32, %c0_i32_0 : i32, i32, i32
  }
  func.func @transform_9(%arg0: i32) -> (i32, i32, i32) {
    %c0_i32 = arith.constant 0 : i32
    %c0_i32_0 = arith.constant 0 : i32
    %c0_i32_1 = arith.constant 0 : i32
    return %arg0, %c0_i32, %c0_i32_0 : i32, i32, i32
  }
}

module attributes {stable_mosaic.version = 11 : i64} {
  func.func @_dense_kernel(%arg0: i32, %arg1: i32, %arg2: memref<6x24xbf16, #tpu.memory_space<vmem>>, %arg3: memref<24x128xbf16, #tpu.memory_space<vmem>>, %arg4: memref<1x128xf32, #tpu.memory_space<vmem>>, %arg5: memref<6x128xbf16, #tpu.memory_space<vmem>>) attributes {dimension_semantics = [#tpu.dimension_semantics<parallel>, #tpu.dimension_semantics<parallel>], iteration_bounds = array<i64: 1, 1>, scalar_prefetch = 0 : i64, scratch_operands = 0 : i64, tpu.core_type = #tpu.core_type<tc>, window_params = [{transform_indices = @transform_0, window_bounds = array<i64: 6, 24>}, {transform_indices = @transform_1, window_bounds = array<i64: 24, 128>}, {transform_indices = @transform_2, window_bounds = array<i64: 1, 128>}, {transform_indices = @transform_3, window_bounds = array<i64: 6, 128>}]} {
    %c0 = arith.constant 0 : index
    %c0_0 = arith.constant 0 : index
    %0 = vector.load %arg2[%c0, %c0_0] : memref<6x24xbf16, #tpu.memory_space<vmem>>, vector<6x24xbf16>
    %c0_1 = arith.constant 0 : index
    %c0_2 = arith.constant 0 : index
    %1 = vector.load %arg3[%c0_1, %c0_2] : memref<24x128xbf16, #tpu.memory_space<vmem>>, vector<24x128xbf16>
    %cst = arith.constant dense<0.000000e+00> : vector<6x128xf32>
    %2 = tpu.matmul %0, %1, %cst {dimension_numbers = #tpu.dot_dimension_numbers<[1], [0], [0], [1], [0, 0, 1, 1], [], []>} : vector<6x24xbf16>, vector<24x128xbf16>, vector<6x128xf32> -> vector<6x128xf32>
    %c0_3 = arith.constant 0 : index
    %c0_4 = arith.constant 0 : index
    %3 = vector.load %arg4[%c0_3, %c0_4] : memref<1x128xf32, #tpu.memory_space<vmem>>, vector<1x128xf32>
    %4 = vector.broadcast %3 : vector<1x128xf32> to vector<6x128xf32>
    %5 = arith.addf %2, %4 : vector<6x128xf32>
    %6 = arith.truncf %5 : vector<6x128xf32> to vector<6x128xbf16>
    %c0_5 = arith.constant 0 : index
    %c0_6 = arith.constant 0 : index
    %7 = vector.load %arg5[%c0_5, %c0_6] : memref<6x128xbf16, #tpu.memory_space<vmem>>, vector<6x128xbf16>
    tpu.vector_store %arg5[%c0_5, %c0_6], %6 {strides = array<i32>} : memref<6x128xbf16, #tpu.memory_space<vmem>>, vector<6x128xbf16>,
    return
  }
  func.func @transform_0(%arg0: i32, %arg1: i32) -> (i32, i32) {
    %c0_i32 = arith.constant 0 : i32
    %c0_i32_0 = arith.constant 0 : i32
    return %arg0, %c0_i32 : i32, i32
  }
  func.func @transform_1(%arg0: i32, %arg1: i32) -> (i32, i32) {
    %c0_i32 = arith.constant 0 : i32
    %c0_i32_0 = arith.constant 0 : i32
    return %c0_i32, %arg1 : i32, i32
  }
  func.func @transform_2(%arg0: i32, %arg1: i32) -> (i32, i32) {
    %c0_i32 = arith.constant 0 : i32
    %c0_i32_0 = arith.constant 0 : i32
    return %c0_i32, %arg1 : i32, i32
  }
  func.func @transform_3(%arg0: i32, %arg1: i32) -> (i32, i32) {
    %c0_i32 = arith.constant 0 : i32
    return %arg0, %arg1 : i32, i32
  }
}

module attributes {stable_mosaic.version = 11 : i64} {
  func.func @_logits_kernel(%arg0: i32, %arg1: i32, %arg2: memref<16x32xbf16, #tpu.memory_space<vmem>>, %arg3: memref<16x24xbf16, #tpu.memory_space<vmem>>, %arg4: memref<32x128xbf16, #tpu.memory_space<vmem>>, %arg5: memref<24x128xbf16, #tpu.memory_space<vmem>>, %arg6: memref<1x128xf32, #tpu.memory_space<vmem>>, %arg7: memref<16x128xf32, #tpu.memory_space<vmem>>) attributes {dimension_semantics = [#tpu.dimension_semantics<parallel>, #tpu.dimension_semantics<parallel>], iteration_bounds = array<i64: 1, 1>, scalar_prefetch = 0 : i64, scratch_operands = 0 : i64, tpu.core_type = #tpu.core_type<tc>, window_params = [{transform_indices = @transform_0, window_bounds = array<i64: 16, 32>}, {transform_indices = @transform_1, window_bounds = array<i64: 16, 24>}, {transform_indices = @transform_2, window_bounds = array<i64: 32, 128>}, {transform_indices = @transform_3, window_bounds = array<i64: 24, 128>}, {transform_indices = @transform_4, window_bounds = array<i64: 1, 128>}, {transform_indices = @transform_5, window_bounds = array<i64: 16, 128>}]} {
    %c0 = arith.constant 0 : index
    %c0_0 = arith.constant 0 : index
    %0 = vector.load %arg2[%c0, %c0_0] : memref<16x32xbf16, #tpu.memory_space<vmem>>, vector<16x32xbf16>
    %c0_1 = arith.constant 0 : index
    %c0_2 = arith.constant 0 : index
    %1 = vector.load %arg4[%c0_1, %c0_2] : memref<32x128xbf16, #tpu.memory_space<vmem>>, vector<32x128xbf16>
    %cst = arith.constant dense<0.000000e+00> : vector<16x128xf32>
    %2 = tpu.matmul %0, %1, %cst {dimension_numbers = #tpu.dot_dimension_numbers<[1], [0], [0], [1], [0, 0, 1, 1], [], []>} : vector<16x32xbf16>, vector<32x128xbf16>, vector<16x128xf32> -> vector<16x128xf32>
    %c0_3 = arith.constant 0 : index
    %c0_4 = arith.constant 0 : index
    %3 = vector.load %arg3[%c0_3, %c0_4] : memref<16x24xbf16, #tpu.memory_space<vmem>>, vector<16x24xbf16>
    %c0_5 = arith.constant 0 : index
    %c0_6 = arith.constant 0 : index
    %4 = vector.load %arg5[%c0_5, %c0_6] : memref<24x128xbf16, #tpu.memory_space<vmem>>, vector<24x128xbf16>
    %cst_7 = arith.constant dense<0.000000e+00> : vector<16x128xf32>
    %5 = tpu.matmul %3, %4, %cst_7 {dimension_numbers = #tpu.dot_dimension_numbers<[1], [0], [0], [1], [0, 0, 1, 1], [], []>} : vector<16x24xbf16>, vector<24x128xbf16>, vector<16x128xf32> -> vector<16x128xf32>
    %6 = arith.addf %2, %5 : vector<16x128xf32>
    %c0_8 = arith.constant 0 : index
    %c0_9 = arith.constant 0 : index
    %7 = vector.load %arg6[%c0_8, %c0_9] : memref<1x128xf32, #tpu.memory_space<vmem>>, vector<1x128xf32>
    %8 = vector.broadcast %7 : vector<1x128xf32> to vector<16x128xf32>
    %9 = arith.addf %6, %8 : vector<16x128xf32>
    %c0_10 = arith.constant 0 : index
    %c0_11 = arith.constant 0 : index
    %10 = vector.load %arg7[%c0_10, %c0_11] : memref<16x128xf32, #tpu.memory_space<vmem>>, vector<16x128xf32>
    tpu.vector_store %arg7[%c0_10, %c0_11], %9 {strides = array<i32>} : memref<16x128xf32, #tpu.memory_space<vmem>>, vector<16x128xf32>,
    return
  }
  func.func @transform_0(%arg0: i32, %arg1: i32) -> (i32, i32) {
    %c0_i32 = arith.constant 0 : i32
    %c0_i32_0 = arith.constant 0 : i32
    return %arg0, %c0_i32 : i32, i32
  }
  func.func @transform_1(%arg0: i32, %arg1: i32) -> (i32, i32) {
    %c0_i32 = arith.constant 0 : i32
    %c0_i32_0 = arith.constant 0 : i32
    return %arg0, %c0_i32 : i32, i32
  }
  func.func @transform_2(%arg0: i32, %arg1: i32) -> (i32, i32) {
    %c0_i32 = arith.constant 0 : i32
    %c0_i32_0 = arith.constant 0 : i32
    return %c0_i32, %arg1 : i32, i32
  }
  func.func @transform_3(%arg0: i32, %arg1: i32) -> (i32, i32) {
    %c0_i32 = arith.constant 0 : i32
    %c0_i32_0 = arith.constant 0 : i32
    return %c0_i32, %arg1 : i32, i32
  }
  func.func @transform_4(%arg0: i32, %arg1: i32) -> (i32, i32) {
    %c0_i32 = arith.constant 0 : i32
    %c0_i32_0 = arith.constant 0 : i32
    return %c0_i32, %arg1 : i32, i32
  }
  func.func @transform_5(%arg0: i32, %arg1: i32) -> (i32, i32) {
    %c0_i32 = arith.constant 0 : i32
    return %arg0, %arg1 : i32, i32
  }
}

</mosaic_0001>

<bundles_post_ra>
// kernel: forward.7
= control target key start
LH: loop header
LB: loop body
LE: loop exit
PB: predicated region body
PF: predicated region fallthrough
CT: control target
= control target key end

     0   :  { %v108_v0 = vmov 0.0   ;;  %vm39_vm0 = vcmask 1043456   ;;  %vm109_vm1 = vmmov 0   ;;  %vm35_vm2 = vcmask 195584   ;;  %s145_s1 = inlined_call_operand.vmem [shape: bf16[24,128], index: 1, kind: input, shape index: {}]   ;;  %s146_s0 = inlined_call_operand.vmem [shape: bf16[6,24], index: 0, kind: input, shape index: {}]   ;;  %s147_s2 = inlined_call_operand.vmem [shape: f32[1,128], index: 2, kind: input, shape index: {}]   ;;  %s148_s3 = inlined_call_operand.vmem [shape: bf16[6,128], index: 3, kind: output, shape index: {}]  }
   0x1   :  { %96 = vmatprep.subr.bf16.mxu0 %v108_v0  ;;  %v106_v1 = vld [vmem:[%s145_s1] sm:$0xff]   ;;  %100 = vmatprep.mubr.msk.bf16.mxu0 %vm109_vm1, %v108_v0  ;;  %v107_v2 = vld [vmem:[%s145_s1 + $0x8] ss:$0 sps:$4 sm:$0xff]  }
   0x2   :  { %97 = vmatpush3.bf16.msra.mxu0 %v106_v1  ;;  %v41_v3 = vsel %vm39_vm0, %v107_v2, 0  ;;  %v15_v4 = vld [vmem:[%s146_s0] sm:$0x7] }
   0x3   :  { %98 = vmatprep.subr.bf16.mxu0 %v108_v0  ;;  %v89_v5 = vld [vmem:[%s147_s2] ss:$0 sm:$0xff] }
   0x6   :  { %99 = vmatpush3.bf16.msra.mxu0 %v41_v3 }
   0x9   :  { %101 = vmatmul.mubr.msk.bf16.vlgmr.msra.gmra.mrb[0].mxu0 %vm35_vm2, %v15_v4 }
  0xdc   :  { %v77_v6 = vpop.f32.mrb[0].mxu0 }
  0xdd   :  { %v78_v7 = vadd.f32 %v89_v5, %v77_v6  ;;  %v102_v8 = vpop.f32.mrb[1].mxu0 }
  0xde   :  { %v80_v9 = vpop.f32.mrb[2].mxu0 }
  0xdf   :  { %v83_v10 = vpack.c.bf16 %v78_v7, %v78_v7  ;;  %v103_v11 = vpop.f32.mrb[3].mxu0 }
  0xe1   :  { %84 = vst [vmem:[%s148_s3] sm:$0x7] %v83_v10 }

// kernel: forward.8
= control target key start
LH: loop header
LB: loop body
LE: loop exit
PB: predicated region body
PF: predicated region fallthrough
CT: control target
= control target key end

     0   :  { %s804_s30 = smov 0   ;;  %s866_s0 = inlined_call_operand.vmem [shape: bf16[2,8,32], index: 0, kind: input, shape index: {}]   ;;  %s867_s1 = inlined_call_operand.vmem [shape: f32[1,32], index: 1, kind: input, shape index: {}]   ;;  %s868_s2 = inlined_call_operand.vmem [shape: f32[1,32], index: 2, kind: input, shape index: {}]   ;;  %s869_s3 = inlined_call_operand.vmem [shape: bf16[32,16], index: 3, kind: input, shape index: {}]   ;;  %s870_s4 = inlined_call_operand.vmem [shape: f32[1,16], index: 4, kind: input, shape index: {}]   ;;  %s871_s5 = inlined_call_operand.vmem [shape: bf16[6,16], index: 5, kind: input, shape index: {}]   ;;  %s872_s6 = inlined_call_operand.vmem [shape: bf16[6,24], index: 6, kind: input, shape index: {}]   ;;  %s873_s7 = inlined_call_operand.vmem [shape: s32[2,8,1], index: 7, kind: input, shape index: {}]   ;;  %s874_s8 = inlined_call_operand.vmem [shape: bf16[2,8,32], index: 8, kind: output, shape index: {0}]   ;;  %s875_s9 = inlined_call_operand.vmem [shape: bf16[2,8,24], index: 9, kind: output, shape index: {1}]  }
   0x1 LB: > { %s677_s10 = sadd.s32 4294967295, %s749_s30   ;;  %p681_p0 = scmp.ge.s32.totalorder %s749_s30, 1  ;;  %s749_s30 = sphi %s804_s30, %s20_s30  }
   0x2   : > { %p298_p1 = scmp.lt.s32.totalorder %s749_s30, 3 }
   0x4   : > { %p299_p2 = pnand %p681_p0, %p298_p1 }
   0x5   : > { %p340_p3 = scmp.lt.s32.totalorder (!%p299_p2), %s677_s10, 1  ;;  %vm361_vm0 = vcmask (!%p299_p2), 261120   ;;  %v735_v8 = vld [vmem:[%s869_s3] sm:$0xff] (!%p299_p2)   ;;  %v751_v9 = vmov (!%p299_p2), 0.0   ;;  %vm752_vm1 = vmmov (!%p299_p2), 0   ;;  %v736_v10 = vld [vmem:[%s869_s3 + $0x8] sm:$0xff] (!%p299_p2)  }
   0x6   : > { %302 = sbr.rel (%p299_p2) target bundleno = 1296 (0x510), region = 52  ;;  %703 = vmatprep.subr.bf16.mxu0 (!%p299_p2), %v751_v9  ;;  %707 = vmatprep.mubr.msk.bf16.mxu0 (!%p299_p2), %vm752_vm1, %v751_v9  ;;  %v686_v15 = vld [vmem:[%s867_s1] ss:$0 sm:$0xff] (!%p299_p2)  ;;  %vm576_vm2 = vcmask (!%p299_p2), 257024   ;;  %vm460_vm3 = vcmask (!%p299_p2), 130048   ;;  %vm507_vm4 = vcmask (!%p299_p2), 48128  }
   0x7   : > { %704 = vmatpush3.bf16.msra.mxu0 (!%p299_p2), %v735_v8  ;;  %711 = vmatprep.subr.bf16.mxu1 (!%p299_p2), %v751_v9  ;;  %v687_v17 = vld [vmem:[%s868_s2] ss:$0 sm:$0xff] (!%p299_p2)  ;;  %vm524_vm5 = vcmask (!%p299_p2), 1042432   ;;  %v753_v43 = vmov (!%p299_p2), 0   ;;  %vm579_vm8 = vcmask (!%p299_p2), 191488  }
   0x8   : > { %705 = vmatprep.subr.bf16.mxu0 (!%p299_p2), %v751_v9  ;;  %713 = vmatprep.mubr.msk.bf16.mxu1 (!%p299_p2), %vm752_vm1, %v751_v9  ;;  %v459_v21 = vld [vmem:[%s871_s5] sm:$0x7] (!%p299_p2) }
   0x9   : > { %v465_v22 = vsel (!%p299_p2), %vm460_vm3, %v459_v21, 0  ;;  %v688_v23 = vld [vmem:[%s870_s4] ss:$0 sm:$0xff] (!%p299_p2)  ;;  %734 = vset.pattern.permute.xlu0 (!%p299_p2), %v753_v43 }
   0xa   : > { %712 = vmatpush3.bf16.xpose.msra.mxu1 (!%p299_p2), %v465_v22  ;;  %v520_v41 = vld [vmem:[%s872_s6] sm:$0x7] (!%p299_p2) }
   0xb   : > { %706 = vmatpush3.bf16.msra.mxu0 (!%p299_p2), %v736_v10  ;;  %v526_v42 = vsel (!%p299_p2), %vm524_vm5, %v520_v41, 0 }
   0xc   : > { %717 = vmatprep.subr.bf16.mxu0 (!%p299_p2), %v751_v9 }
   0xd   : > { %s877_s10 = smov (!%p340_p3, %s677_s10), 1 }
   0xe   : > { %s815_s11 = sshll.u32 %s877_s10, 2 }
   0xf   : > { %s343_s14 = scalar_lea.vmem %s866_s0, %s815_s11  ;;  %s351_s25 = scalar_lea.vmem %s874_s8, %s815_s11 }
  0x10   : > { %v357_v0 = vld [vmem:[%s343_s14] sm:$0xf]  ;;  %s683_s14 = sshll.u32 %s877_s10, 3  ;;  %s355_s19 = scalar_lea.vmem %s875_s9, %s815_s11 }
  0x11   : > { %v358_v1 = vunpack.c.l.bf16 %v357_v0  ;;  %s347_s17 = scalar_lea.vmem %s873_s7, %s683_s14 }
  0x12   : > { %v568_v44 = vld [vmem:[%s347_s17] sm:$0xff] }
  0x13   : > { %v362_v2 = vsel %vm361_vm0, %v358_v1, 0.0  ;;  %vm569_vm6 = vcmp.gt.s32.totalorder %v568_v44, 0 }
  0x14   : > { %363 = vadd.xlane.f32.xlu0 %v362_v2  ;;  %v570_v45 = vsel %vm569_vm6, 1, %v753_v43 }
  0xa1   : > { %v364_v3 = vpop.xlane.xlu0 %363 }
  0xa2   : > { %v366_v4 = vmul.f32 0.03125, %v364_v3 }
  0xa4   : > { %v367_v5 = vsub.f32 %v358_v1, %v366_v4 }
  0xa6   : > { %v368_v6 = vmul.f32 %v367_v5, %v367_v5 }
  0xa8   : > { %v369_v7 = vsel %vm361_vm0, %v368_v6, 0.0 }
  0xa9   : > { %370 = vadd.xlane.f32.xlu0 %v369_v7 }
  0xbf   : > { %572 = vperm.xlu0 %734, %v570_v45  }
 0x136   : > { %v371_v11 = vpop.xlane.xlu0 %370 }
 0x137   : > { %v372_v12 = vmul.f32 0.03125, %v371_v11 }
 0x139   : > { %v373_v13 = vadd.f32 1e-05, %v372_v12 }
 0x13b   : > { %737 = vrsqrt.f32 %v373_v13 }
 0x13e   : > { %v573_v50 = vpop.permute.xlu0 %572 }
 0x13f   : > { %vm574_vm7 = vcmp.eq.s32.totalorder %v573_v50, 1 }
 0x145   : > { %v738_v14 = vpop.eup %737 }
 0x146   : > { %v375_v16 = vmul.f32 %v738_v14, %v367_v5 }
 0x148   : > { %v382_v18 = vmul.f32 %v686_v15, %v375_v16 }
 0x14a   : > { %v389_v19 = vadd.f32 %v687_v17, %v382_v18 }
 0x14c   : > { %v390_v20 = vpack.c.bf16 %v389_v19, %v389_v19 }
 0x14e   : > { %708 = vmatmul.mubr.msk.bf16.vlgmr.msra.gmra.mrb[0].mxu0 %vm361_vm0, %v390_v20  ;;  %577 = vst.msk [vmem:[%s351_s25] sm:$0xf] %vm576_vm2, %v390_v20 }
 0x14f   : > { %719 = vmatprep.mubr.msk.bf16.mxu0 %vm752_vm1, %v751_v9  ;;  %718 = vmatpush3.bf16.msra.mxu0 %v526_v42 }
 0x221   : > { %v451_v24 = vpop.f32.mrb[0].mxu0 }
 0x222   : > { %v452_v25 = vadd.f32 %v688_v23, %v451_v24  ;;  %v709_v26 = vpop.f32.mrb[1].mxu0 }
 0x223   : > { %v454_v27 = vpop.f32.mrb[2].mxu0 }
 0x224   : > { %v457_v28 = vmul.f32 0.25, %v452_v25  ;;  %v710_v29 = vpop.f32.mrb[3].mxu0 }
 0x226   : > { %v458_v30 = vpack.c.bf16 %v457_v28, %v457_v28 }
 0x228   : > { %714 = vmatmul.mubr.msk.bf16.vlgmr.msra.gmra.mrb[0].mxu1 %vm460_vm3, %v458_v30 }
 0x2fb   : > { %v501_v31 = vpop.f32.mrb[0].mxu1 }
 0x2fc   : > { %v715_v32 = vpop.f32.mrb[1].mxu1  ;;  %v508_v33 = vsel %vm507_vm4, %v501_v31, -inf }
 0x2fd   : > { %509 = vmax.xlane.f32.xlu1 %v508_v33  ;;  %v504_v34 = vpop.f32.mrb[2].mxu1 }
 0x2fe   : > { %v716_v35 = vpop.f32.mrb[3].mxu1 }
 0x38a   : > { %v510_v36 = vpop.xlane.xlu1 %509 }
 0x38b   : > { %v511_v37 = vsub.f32 %v501_v31, %v510_v36 }
 0x38d   : > { %v512_v38 = vmul.f32 1.442695, %v511_v37 }
 0x38f   : > { %739 = vpow2.f32 %v512_v38 }
 0x399   : > { %v740_v39 = vpop.eup %739 }
 0x39a   : > { %v514_v40 = vsel %vm507_vm4, %v740_v39, 0.0 }
 0x39b   : > { %515 = vadd.xlane.f32.xlu1 %v514_v40 }
 0x428   : > { %v516_v46 = vpop.xlane.xlu1 %515 }
 0x429   : > { %741 = vrcp.f32 %v516_v46 }
 0x433   : > { %v742_v47 = vpop.eup %741 }
 0x434   : > { %v518_v48 = vmul.f32 %v742_v47, %v740_v39 }
 0x436   : > { %v519_v49 = vpack.c.bf16 %v518_v48, %v518_v48 }
 0x438   : > { %720 = vmatmul.mubr.msk.bf16.vlgmr.msra.gmra.mrb[4].mxu0 %vm507_vm4, %v519_v49 }
 0x50b   : > { %v562_v51 = vpop.f32.mrb[4].mxu0 }
 0x50c   : > { %v575_v52 = vsel %vm574_vm7, %v562_v51, 0.0  ;;  %v721_v53 = vpop.f32.mrb[5].mxu0 }
 0x50d   : > { %v578_v54 = vpack.c.bf16 %v575_v52, %v575_v52  ;;  %v565_v55 = vpop.f32.mrb[6].mxu0 }
 0x50e   : > { %v722_v56 = vpop.f32.mrb[7].mxu0 }
 0x50f   : > { %580 = vst.msk [vmem:[%s355_s19] sm:$0xf] %vm579_vm8, %v578_v54 }
 0x510 PF: > { %s20_s30 = sadd.s32 1, %s749_s30  }
 0x511   : > { %p17_p4 = scmp.ge.s32.totalorder %s20_s30, 4  }
 0x513   :  { %19 = sbr.rel (!%p17_p4) target bundleno = 1 (0x1), region = 97 }

// kernel: forward.5
= control target key start
LH: loop header
LB: loop body
LE: loop exit
PB: predicated region body
PF: predicated region fallthrough
CT: control target
= control target key end

     0   :  { %s3511_s6 = smov 2   ;;  %s3512_s10 = smov 3   ;;  %s4065_s0 = inlined_call_operand.smem [shape: u32[31], index: -1, kind: input, shape index: {}] }
   0x1   :  { %s3559_s5 = sld [smem:[%s4065_s0]]   ;;  %s3513_s14 = smov 4  }
   0x2   :  { %s3564_s9 = sld [smem:[%s4065_s0 + %s3511_s6]]   ;;  %s3514_s18 = smov 5  }
   0x3   :  { %s3569_s13 = sld [smem:[%s4065_s0 + %s3512_s10]]   ;;  %s3515_s22 = smov 6  }
   0x4   :  { %s3574_s17 = sld [smem:[%s4065_s0 + %s3513_s14]]   ;;  %s3516_s26 = smov 7  }
   0x5   :  { %s3579_s21 = sld [smem:[%s4065_s0 + %s3514_s18]]   ;;  %s3517_s30 = smov 8  }
   0x6   :  { %s3584_s25 = sld [smem:[%s4065_s0 + %s3515_s22]]   ;;  %s3518_s4 = smov 9  }
   0x7   :  { %s3589_s29 = sld [smem:[%s4065_s0 + %s3516_s26]]   ;;  %s3519_s10 = smov 10  }
   0x8   :  { %s3594_s3 = sld [smem:[%s4065_s0 + %s3517_s30]]   ;;  %s3520_s15 = smov 11  }
   0x9   :  { %s3599_s8 = sld [smem:[%s4065_s0 + %s3518_s4]]   ;;  %s3521_s20 = smov 12  }
   0xa   :  { %s3604_s14 = sld [smem:[%s4065_s0 + %s3519_s10]]   ;;  %s3522_s26 = smov 13  }
   0xb   :  { %s3609_s19 = sld [smem:[%s4065_s0 + %s3520_s15]]   ;;  %s3523_s1 = smov 14  }
   0xc   :  { %s3614_s24 = sld [smem:[%s4065_s0 + %s3521_s20]]   ;;  %s3524_s7 = smov 15  }
   0xd   :  { %s3619_s30 = sld [smem:[%s4065_s0 + %s3522_s26]]   ;;  %s3525_s15 = smov 16  }
   0xe   :  { %s3624_s6 = sld [smem:[%s4065_s0 + %s3523_s1]]   ;;  %s3526_s22 = smov 17  }
   0xf   :  { %s3629_s12 = sld [smem:[%s4065_s0 + %s3524_s7]]   ;;  %s3527_s28 = smov 18  }
  0x10   :  { %s3634_s20 = sld [smem:[%s4065_s0 + %s3525_s15]]   ;;  %s3528_s7 = smov 19  }
  0x11   :  { %s3639_s27 = sld [smem:[%s4065_s0 + %s3526_s22]]   ;;  %s3529_s15 = smov 20  }
  0x12   :  { %4073 = sst [smem:[#allocation10_spill]] %s3614_s24  ;;  %s3530_s22 = smov 21  }
  0x13   :  { %4074 = sst [smem:[#allocation11_spill]] %s3619_s30  ;;  %s3537_s30 = smov 28  }
  0x14   :  { %4075 = sst [smem:[#allocation12_spill]] %s3624_s6  ;;  %s3538_s24 = smov 29  }
  0x15   :  { %4076 = sst [smem:[#allocation13_spill]] %s3629_s12 }
  0x16   :  { %4077 = sst [smem:[#allocation14_spill]] %s3634_s20 }
  0x17   :  { %4078 = sst [smem:[#allocation15_spill]] %s3639_s27 }
  0x18   :  { %s3644_s4 = sld [smem:[%s4065_s0 + %s3527_s28]]   ;;  %s3531_s28 = smov 22  }
  0x19   :  { %s3649_s12 = sld [smem:[%s4065_s0 + %s3528_s7]]   ;;  %s3532_s7 = smov 23  }
  0x1a   :  { %s3654_s6 = sld [smem:[%s4065_s0 + %s3529_s15]]   ;;  %s3533_s15 = smov 24  }
  0x1b   :  { %s3659_s27 = sld [smem:[%s4065_s0 + %s3530_s22]]   ;;  %s3534_s22 = smov 25  }
  0x1c   :  { %s3664_s20 = sld [smem:[%s4065_s0 + %s3531_s28]]   ;;  %s3535_s28 = smov 26  }
  0x1d   :  { %s3669_s16 = sld [smem:[%s4065_s0 + %s3532_s7]]   ;;  %s3536_s7 = smov 27  }
  0x1e   :  { %s3674_s23 = sld [smem:[%s4065_s0 + %s3533_s15]]  }
  0x1f   :  { %s3679_s1 = sld [smem:[%s4065_s0 + %s3534_s22]]  }
  0x20   :  { %s3684_s10 = sld [smem:[%s4065_s0 + %s3535_s28]]  }
  0x21   :  { %4079 = sst [smem:[#allocation16_spill]] %s3659_s27 }
  0x22   :  { %4080 = sst [smem:[#allocation17_spill]] %s3664_s20  ;;  %s3539_s20 = smov 30  }
  0x23   :  { %4081 = sst [smem:[#allocation18_spill]] %s3669_s16  ;;  %s66_s16 = sshll.u32 %s3559_s5, 4  ;;  %s67_s16 = int_to_ptr.vmem [resolvable:$true] %s66_s16 }
  0x24   :  { %4082 = sst [smem:[#allocation19_spill]] %s3674_s23  ;;  %p3466_p1 = scmp.lt.s32.totalorder %s67_s16, %s67_s16 }
  0x25   :  { %4083 = sst [smem:[#allocation20_spill]] %s3679_s1 }
  0x26   :  { %4084 = sst [smem:[#allocation21_spill]] %s3684_s10 }
  0x27   :  { %s3689_s27 = sld [smem:[%s4065_s0 + %s3536_s7]]   ;;  %s3461_s7 = scalar_lea.vmem %s67_s16, 16 }
  0x28   :  { %s3694_s23 = sld [smem:[%s4065_s0 + %s3537_s30]]   ;;  %p3462_p0 = scmp.ne.s32.totalorder %s67_s16, %s3461_s7 }
  0x29   :  { %s3699_s1 = sld [smem:[%s4065_s0 + %s3538_s24]]   ;;  %p3467_p2 = scmp.lt.s32.totalorder %s3461_s7, %s3461_s7 }
  0x2a   :  { %s3704_s10 = sld [smem:[%s4065_s0 + %s3539_s20]]  }
  0x2b   :  { %p3468_p3 = por %p3467_p2, %p3466_p1 }
  0x2d   :  { %p3469_p4 = pnand %p3468_p3, %p3462_p0 }
  0x2f   :  { %3472 = shalt.err (!%p3469_p4)  }
  0x30   :  { %s3540_s11 = smov [#allocation7]   ;;  %s3541_s30 = smov 1  }
  0x31   :  { %69 = dma.vmem_to_smem %s67_s16, 16, %s3540_s11, [#allocation6] }
  0x32   :  { %s2944_s24 = sld [smem:[%s4065_s0 + %s3541_s30]]  }
  0x38   :  { %s70_s22 = sshll.u32 %s2944_s24, 4  ;;  %s71_s22 = int_to_ptr.vmem [resolvable:$true] %s70_s22 }
  0x39   :  { %s3473_s26 = scalar_lea.vmem %s71_s22, 16  ;;  %p3478_p6 = scmp.lt.s32.totalorder %s71_s22, %s71_s22 }
  0x3a   :  { %p3474_p5 = scmp.ne.s32.totalorder %s71_s22, %s3473_s26  ;;  %p3479_p7 = scmp.lt.s32.totalorder %s3473_s26, %s3473_s26 }
  0x3c   :  { %p3480_p8 = por %p3479_p7, %p3478_p6 }
  0x3e   :  { %p3481_p9 = pnand %p3480_p8, %p3474_p5 }
  0x40   :  { %3484 = shalt.err (!%p3481_p9)  }
  0x41   :  { %s3542_s5 = smov [#allocation8]  }
  0x42   :  { %73 = dma.vmem_to_smem %s71_s22, 16, %s3542_s5, [#allocation6] }
  0x43   :  { %3497 = dma.done.wait [#allocation6], 32 }
  0x44   :  { %3498 = vsyncadd [#allocation6], 4294967264 }
  0x45   :  { %75 = sfence }
  0x46   :  { %s3710_s20 = smov 0   ;;  %s3712_s28 = smov 0  }
  0x47   :  { %s3714_s2 = smov 0  }
  0x48 LB: > { %s93_s0 = sadd.s32 1, %s3505_s28  ;;  %p2977_p10 = scmp.ge.s32.totalorder %s3509_s2, 1  ;;  %s3509_s2 = sphi %s3714_s2, %s81_s2   ;;  %s3505_s28 = sphi %s3712_s28, %s4106_s28   ;;  %s3501_s20 = sphi %s3710_s20, %s4105_s20  }
  0x49   : > { %p95_p11 = scmp.ge.s32.totalorder %s93_s0, 2  ;;  %p828_p12 = scmp.lt.s32.totalorder %s3509_s2, 3 }
  0x4b   : > { %s4108_s0 = smov (%p95_p11, %s93_s0), 0  ;;  %p829_p13 = pnand %p2977_p10, %p828_p12 }
  0x4c   : > { %p908_p0 = scmp.lt.s32.totalorder (!%p829_p13), %s3501_s20, 1  ;;  %vm933_vm0 = vcmask (!%p829_p13), 261120   ;;  %v3391_v16 = vld [vmem:[%s3594_s3] sm:$0xff] (!%p829_p13)   ;;  %v3543_v18 = vmov (!%p829_p13), 0.0   ;;  %v3393_v19 = vld [vmem:[%s3594_s3 + $0x8] sm:$0xff] (!%p829_p13)   ;;  %vm3544_vm1 = vmmov (!%p829_p13), 0  }
  0x4d   : > { %832 = sbr.rel (%p829_p13) target bundleno = 4421 (0x1145), region = 132  ;;  %v3392_v17 = vld [vmem:[%s3604_s14] sm:$0xff] (!%p829_p13)   ;;  %3146 = vmatprep.subr.bf16.mxu0 (!%p829_p13), %v3543_v18  ;;  %3154 = vmatprep.subr.bf16.mxu1 (!%p829_p13), %v3543_v18  ;;  %v3394_v20 = vld [vmem:[%s3604_s14 + $0x8] sm:$0xff] (!%p829_p13)   ;;  %vm1104_vm2 = vcmask (!%p829_p13), 60416   ;;  %s3545_s18 = smov (!%p829_p13), 120   ;;  %vm1475_vm3 = vcmask (!%p829_p13), 64512  }
  0x4e   : > { %3147 = vmatpush3.bf16.msra.mxu0 (!%p829_p13), %v3391_v16  ;;  %3155 = vmatpush3.bf16.msra.mxu1 (!%p829_p13), %v3392_v17  ;;  %v2982_v28 = vld [vmem:[%s3574_s17] ss:$0 sm:$0xff] (!%p829_p13)  ;;  %v3396_v36 = vld [vmem:[%s3644_s4 + $0x8] sm:$0xff] (!%p829_p13)   ;;  %s3546_s24 = smov (!%p829_p13), 112   ;;  %s3547_s22 = smov (!%p829_p13), 104   ;;  %vm1295_vm4 = vcmask (!%p829_p13), 57344  }
  0x4f   : > { %3148 = vmatprep.subr.bf16.mxu0 (!%p829_p13), %v3543_v18  ;;  %3156 = vmatprep.subr.bf16.mxu1 (!%p829_p13), %v3543_v18  ;;  %v2983_v30 = vld [vmem:[%s3579_s21] ss:$0 sm:$0xff] (!%p829_p13)  ;;  %v3398_v41 = vld [vmem:[%s3584_s25 + $0x8] sm:$0xff] (!%p829_p13)   ;;  %s4085_s26 = sld [smem:[#allocation16_spill]] (!%p829_p13)  ;;  %vm1726_vm5 = vcmask (!%p829_p13), 1043456   ;;  %vm1921_vm9 = vcmask (!%p829_p13), 130048  }
  0x50   : > { %3150 = vmatprep.mubr.msk.bf16.mxu0 (!%p829_p13), %vm3544_vm1, %v3543_v18  ;;  %3158 = vmatprep.mubr.msk.bf16.mxu1 (!%p829_p13), %vm3544_vm1, %v3543_v18  ;;  %v3395_v33 = vld [vmem:[%s3644_s4] sm:$0xff] (!%p829_p13)   ;;  %v3400_v45 = vld [vmem:[%s3654_s6 + $0x8] sm:$0xff] (!%p829_p13)   ;;  %s1456_s5 = sld [smem:[#allocation7 + %s3501_s20]] (!%p829_p13)  ;;  %vm1923_vm10 = vcmask (!%p829_p13), 195584   ;;  %vm2393_vm11 = vcmask (!%p829_p13), 1044480   ;;  %vm2327_vm13 = vcmask (!%p829_p13), 80896  }
  0x51   : > { %v3397_v39 = vld [vmem:[%s3584_s25] sm:$0xff] (!%p829_p13)   ;;  %vm2810_vm14 = vcmask (!%p829_p13), 523264   ;;  %vm2856_vm15 = vcmask (!%p829_p13), 257024  }
  0x52   : > { %3149 = vmatpush3.bf16.msra.mxu0 (!%p829_p13), %v3393_v19  ;;  %3157 = vmatpush3.bf16.msra.mxu1 (!%p829_p13), %v3394_v20  ;;  %v3399_v44 = vld [vmem:[%s3654_s6] sm:$0xff] (!%p829_p13)  }
  0x53   : > { %3162 = vmatprep.subr.bf16.mxu0 (!%p829_p13), %v3543_v18  ;;  %3170 = vmatprep.subr.bf16.mxu1 (!%p829_p13), %v3543_v18  ;;  %v2984_v46 = vld [vmem:[%s3599_s8] ss:$0 sm:$0xff] (!%p829_p13) }
  0x54   : > { %s3732_s16 = scalar_select %p908_p0, %s3501_s20, 1  ;;  %v2988_v47 = vld [vmem:[%s3609_s19] ss:$0 sm:$0xff] }
  0x55   : > { %v2992_v60 = vld [vmem:[%s3649_s12] ss:$0 sm:$0xff] }
  0x56   : > { %s4070_s7 = sshll.u32 %s3732_s16, 2  ;;  %s3077_s11 = sshll.u32 %s3732_s16, 3  ;;  %v2997_v17 = vld [vmem:[%s4085_s26] ss:$0 sm:$0xff] }
  0x57   : > { %s911_s30 = scalar_lea.vmem %s3564_s9, %s4070_s7  ;;  %s3740_s15 = scalar_lea.vmem %s3569_s13, %s3077_s11 }
  0x58   : > { %v929_v0 = vld [vmem:[%s911_s30] sm:$0xf]  ;;  %s4088_s11 = sld [smem:[#allocation10_spill]]  ;;  %s4071_s26 = smov 24  }
  0x59   : > { %v930_v1 = vunpack.c.l.bf16 %v929_v0  ;;  %v1347_v2 = vld [vmem:[%s911_s30] sm:$0xf]  ;;  %s4072_s30 = smov 8   ;;  %s4091_s7 = sld [smem:[#allocation12_spill]] }
  0x5a   : > { %v3742_v3 = vunpack.c.l.bf16 %v1347_v2  ;;  %v3390_v38 = vld [vmem:[%s3740_s15] sm:$0x1f]   ;;  %s3549_s15 = smov 16  }
  0x5b   : > { %v934_v4 = vsel %vm933_vm0, %v930_v1, 0.0 }
  0x5c   : > { %935 = vadd.xlane.f32.xlu0 %v934_v4  ;;  %v1352_v5 = vsel %vm933_vm0, %v3742_v3, 0.0 }
  0x60   : > { %1353 = vadd.xlane.f32.xlu0 %v1352_v5 }
  0xe9   : > { %v936_v6 = vpop.xlane.xlu0 %935 }
  0xea   : > { %v938_v7 = vmul.f32 0.03125, %v936_v6 }
  0xec   : > { %v939_v8 = vsub.f32 %v930_v1, %v938_v7 }
  0xed   : > { %v1354_v9 = vpop.xlane.xlu0 %1353 }
  0xee   : > { %v1356_v10 = vmul.f32 0.03125, %v1354_v9  ;;  %v940_v11 = vmul.f32 %v939_v8, %v939_v8  ;;  %v3019_v9 = vld [vmem:[%s3589_s29] ss:$0 sm:$0xff] }
  0xf0   : > { %v1357_v12 = vsub.f32 %v3742_v3, %v1356_v10  ;;  %v941_v13 = vsel %vm933_vm0, %v940_v11, 0.0 }
  0xf1   : > { %942 = vadd.xlane.f32.xlu1 %v941_v13 }
  0xf2   : > { %v1358_v14 = vmul.f32 %v1357_v12, %v1357_v12 }
  0xf4   : > { %v1359_v15 = vsel %vm933_vm0, %v1358_v14, 0.0 }
  0xf5   : > { %1360 = vadd.xlane.f32.xlu1 %v1359_v15 }
 0x17e   : > { %v943_v21 = vpop.xlane.xlu1 %942 }
 0x17f   : > { %v944_v22 = vmul.f32 0.03125, %v943_v21 }
 0x181   : > { %v945_v23 = vadd.f32 1e-05, %v944_v22 }
 0x182   : > { %v1361_v24 = vpop.xlane.xlu1 %1360 }
 0x183   : > { %3421 = vrsqrt.f32 %v945_v23  ;;  %v1362_v25 = vmul.f32 0.03125, %v1361_v24 }
 0x185   : > { %v1363_v26 = vadd.f32 1e-05, %v1362_v25 }
 0x187   : > { %3423 = vrsqrt.f32 %v1363_v26 }
 0x18d   : > { %v3422_v27 = vpop.eup %3421 }
 0x18e   : > { %v947_v29 = vmul.f32 %v3422_v27, %v939_v8 }
 0x190   : > { %v954_v31 = vmul.f32 %v2982_v28, %v947_v29 }
 0x191   : > { %v3424_v35 = vpop.eup %3423 }
 0x192   : > { %v961_v32 = vadd.f32 %v2983_v30, %v954_v31  ;;  %v1365_v37 = vmul.f32 %v3424_v35, %v1357_v12 }
 0x194   : > { %v962_v34 = vpack.c.bf16 %v961_v32, %v961_v32  ;;  %v1372_v40 = vmul.f32 %v2982_v28, %v1365_v37 }
 0x196   : > { %3151 = vmatmul.mubr.msk.bf16.vlgmr.msra.gmra.mrb[0].mxu0 %vm933_vm0, %v962_v34  ;;  %3159 = vmatmul.mubr.msk.bf16.vlgmr.msra.gmra.mrb[0].mxu1 %vm933_vm0, %v962_v34  ;;  %v1379_v42 = vadd.f32 %v2983_v30, %v1372_v40 }
 0x197   : > { %3163 = vmatpush3.bf16.msra.mxu0 %v3395_v33  ;;  %3166 = vmatprep.mubr.msk.bf16.mxu0 %vm3544_vm1, %v3543_v18 }
 0x198   : > { %3164 = vmatprep.subr.bf16.mxu0 %v3543_v18  ;;  %3174 = vmatprep.mubr.msk.bf16.mxu1 %vm3544_vm1, %v3543_v18  ;;  %v1380_v43 = vpack.c.bf16 %v1379_v42, %v1379_v42  ;;  %v1457_v42 = vlaneseq }
 0x199   : > { %3171 = vmatpush3.bf16.msra.mxu1 %v3399_v44 }
 0x19a   : > { %3172 = vmatprep.subr.bf16.mxu1 %v3543_v18  ;;  %v3844_v44 = vand.u32 127, %v1457_v42 }
 0x19b   : > { %3165 = vmatpush3.bf16.msra.mxu0 %v3396_v36 }
 0x19c   : > { %3178 = vmatprep.subr.bf16.mxu0 %v3543_v18 }
 0x19d   : > { %3173 = vmatpush3.bf16.msra.mxu1 %v3400_v45  ;;  %v1464_v45 = vstv %s1456_s5  ;;  %s4089_s5 = sld [smem:[#allocation11_spill]] }
 0x19e   : > { %3167 = vmatmul.mubr.msk.bf16.vlgmr.msra.gmra.mrb[4].mxu0 %vm933_vm0, %v3390_v38  ;;  %3186 = vmatprep.subr.bf16.mxu1 %v3543_v18  ;;  %vm1465_vm7 = vcmp.lt.s32.totalorder %v3844_v44, %v1464_v45 }
 0x19f   : > { %3179 = vmatpush3.bf16.msra.mxu0 %v3397_v39  ;;  %3182 = vmatprep.mubr.msk.bf16.mxu0 %vm3544_vm1, %v3543_v18 }
 0x1a0   : > { %3180 = vmatprep.subr.bf16.mxu0 %v3543_v18  ;;  %3175 = vmatmul.mubr.msk.bf16.vlgmr.msra.gmra.mrb[4].mxu1 %vm933_vm0, %v3390_v38 }
 0x1a1   : > { %3188 = vmatprep.mubr.msk.bf16.mxu1 %vm3544_vm1, %v3543_v18 }
 0x1a3   : > { %3181 = vmatpush3.bf16.msra.mxu0 %v3398_v41 }
 0x1a4   : > { %3192 = vmatprep.subr.bf16.mxu0 %v3543_v18 }
 0x1a6   : > { %3183 = vmatmul.mubr.msk.bf16.vlgmr.msra.gmra.mrb[8].mxu0 %vm933_vm0, %v1380_v43  ;;  %v1458_v43 = vshrl.u32 %v1457_v42, 7 }
 0x1a7   : > { %3194 = vmatprep.mubr.msk.bf16.mxu0 %vm3544_vm1, %v3543_v18 }
 0x1a8   : > { %vm1463_vm6 = vcmp.le.s32.totalorder %v3844_v44, %v1458_v43 }
 0x1a9   : > { %vm3848_vm8 = vmand %vm1463_vm6, %vm1465_vm7 }
 0x269   : > { %v1023_v48 = vpop.f32.mrb[0].mxu0  ;;  %v1087_v49 = vpop.f32.mrb[0].mxu1 }
 0x26a   : > { %v1024_v50 = vadd.f32 %v2984_v46, %v1023_v48  ;;  %v1088_v51 = vadd.f32 %v2988_v47, %v1087_v49  ;;  %v3152_v52 = vpop.f32.mrb[1].mxu0  ;;  %v3160_v53 = vpop.f32.mrb[1].mxu1 }
 0x26b   : > { %v1026_v54 = vpop.f32.mrb[2].mxu0  ;;  %v1090_v55 = vpop.f32.mrb[2].mxu1 }
 0x26c   : > { %v1029_v56 = vpack.c.bf16 %v1024_v50, %v1024_v50  ;;  %v3796_v57 = vpack.c.bf16 %v1088_v51, %v1088_v51  ;;  %v3153_v58 = vpop.f32.mrb[3].mxu0  ;;  %v3161_v59 = vpop.f32.mrb[3].mxu1 }
 0x26e   : > { %1105 = vst.msk [vmem:[#allocation2] sm:$0xf] %vm1104_vm2, %v1029_v56  ;;  %1119 = vst.msk [vmem:[#allocation3] sm:$0xf] %vm1104_vm2, %v3796_v57  ;;  %1095 = vrot.lane.b32.xlu0 %v1029_v56, %s3545_s18  ;;  %1098 = vrot.lane.b32.xlu1 %v1029_v56, %s3546_s24 }
 0x271   : > { %v1190_v61 = vpop.f32.mrb[4].mxu0 }
 0x272   : > { %v1191_v62 = vadd.f32 %v2992_v60, %v1190_v61  ;;  %v3168_v63 = vpop.f32.mrb[5].mxu0  ;;  %1101 = vrot.lane.b32.xlu1 %v1029_v56, %s3547_s22 }
 0x273   : > { %v1193_v0 = vpop.f32.mrb[6].mxu0  ;;  %v1255_v19 = vpop.f32.mrb[4].mxu1 }
 0x274   : > { %v3078_v1 = vpack.c.bf16 %v1191_v62, %v1191_v62  ;;  %v1194_v2 = vadd.f32 %v2992_v60, %v1193_v0  ;;  %v3169_v4 = vpop.f32.mrb[7].mxu0  ;;  %v1256_v20 = vadd.f32 %v2997_v17, %v1255_v19  ;;  %v3176_v21 = vpop.f32.mrb[5].mxu1 }
 0x275   : > { %v1467_v5 = vld [vmem:[#allocation2] sm:$0xf]  ;;  %v1258_v22 = vpop.f32.mrb[6].mxu1  ;;  %v1471_v36 = vld [vmem:[#allocation3] sm:$0xf] }
 0x276   : > { %1294 = vst.msk [vmem:[#allocation4] sm:$0xf] %vm1104_vm2, %v3078_v1  ;;  %v3806_v6 = vpack.c.bf16 %v1194_v2, %v1191_v62  ;;  %v3079_v7 = vpack.c.bf16 %v1194_v2, %v1194_v2  ;;  %v1480_v8 = vsel %vm1475_vm3, %v1467_v5, 0  ;;  %v3080_v23 = vpack.c.bf16 %v1256_v20, %v1256_v20  ;;  %v3177_v25 = vpop.f32.mrb[7].mxu1 }
 0x277   : > { %3187 = vmatpush3.bf16.xpose.msra.mxu1 %v1480_v8  ;;  %v1259_v24 = vadd.f32 %v2997_v17, %v1258_v22  ;;  %v1728_v40 = vsel %vm1726_vm5, %v1471_v36, 0 }
 0x278   : > { %1296 = vst.msk [vmem:[#allocation4 + $0x4] sm:$0x1] %vm1295_vm4, %v3079_v7  ;;  %3198 = vmatprep.subr.bf16.mxu1 %v3543_v18 }
 0x279   : > { %v1441_v10 = vpop.f32.mrb[8].mxu0  ;;  %1334 = vst.msk [vmem:[#allocation5] sm:$0xf] %vm1104_vm2, %v3080_v23  ;;  %v3820_v26 = vpack.c.bf16 %v1259_v24, %v1256_v20  ;;  %v3081_v27 = vpack.c.bf16 %v1259_v24, %v1259_v24 }
 0x27a   : > { %v1442_v11 = vadd.f32 %v3019_v9, %v1441_v10  ;;  %v3184_v12 = vpop.f32.mrb[9].mxu0 }
 0x27b   : > { %v1444_v13 = vpop.f32.mrb[10].mxu0  ;;  %1335 = vst.msk [vmem:[#allocation5 + $0x4] sm:$0x1] %vm1295_vm4, %v3081_v27 }
 0x27c   : > { %v1447_v14 = vmul.f32 0.35355338, %v1442_v11  ;;  %v3185_v15 = vpop.f32.mrb[11].mxu0  ;;  %v3027_v13 = vsel %vm3848_vm8, 1.0, %v3543_v18 }
 0x27e   : > { %v1448_v16 = vpack.c.bf16 %v1447_v14, %v1447_v14 }
 0x280   : > { %1452 = vrot.lane.b32.xlu0 %v1448_v16, %s3546_s24  ;;  %1450 = vrot.lane.b32.xlu1 %v1448_v16, %s3545_s18 }
 0x281   : > { %3189 = vmatmul.mubr.msk.bf16.vlgmr.msra.gmra.mrb[8].mxu1 %vm1475_vm3, %v1448_v16 }
 0x282   : > { %3200 = vmatprep.mubr.msk.bf16.mxu1 %vm3544_vm1, %v3543_v18 }
 0x284   : > { %1454 = vrot.lane.b32.xlu1 %v1448_v16, %s3547_s22 }
 0x2e0   : > { %v1099_v28 = vpop.permute.xlu1 %1098  ;;  %v1096_v29 = vpop.permute.xlu0 %1095 }
 0x2e1   : > { %1107 = vst.msk [vmem:[#allocation2 + $0x8] sm:$0xf] %vm1104_vm2, %v1099_v28  ;;  %1106 = vst.msk [vmem:[#allocation2 + $0x4] sm:$0xf] %vm1104_vm2, %v1096_v29 }
 0x2e4   : > { %v1102_v30 = vpop.permute.xlu1 %1101 }
 0x2e5   : > { %1108 = vst.msk [vmem:[#allocation2 + $0xc] sm:$0xf] %vm1104_vm2, %v1102_v30 }
 0x2e8   : > { %v1468_v31 = vld [vmem:[#allocation2 + $0x4] sm:$0xf]  ;;  %v1469_v32 = vld [vmem:[#allocation2 + $0x8] sm:$0xf] }
 0x2e9   : > { %v1526_v33 = vsel %vm1475_vm3, %v1468_v31, 0  ;;  %v1572_v34 = vsel %vm1475_vm3, %v1469_v32, 0 }
 0x2ea   : > { %3193 = vmatpush3.bf16.xpose.msra.mxu0 %v1526_v33  ;;  %3199 = vmatpush3.bf16.xpose.msra.mxu1 %v1572_v34 }
 0x2eb   : > { %3210 = vmatprep.subr.bf16.mxu1 %v3543_v18  ;;  %3204 = vmatprep.subr.bf16.mxu0 %v3543_v18 }
 0x2ec   : > { %v1470_v35 = vld [vmem:[#allocation2 + $0xc] sm:$0xf] }
 0x2ed   : > { %v1618_v39 = vsel %vm1475_vm3, %v1470_v35, 0 }
 0x2f2   : > { %v1451_v37 = vpop.permute.xlu1 %1450  ;;  %v1453_v38 = vpop.permute.xlu0 %1452 }
 0x2f3   : > { %3195 = vmatmul.mubr.msk.bf16.vlgmr.msra.gmra.mrb[12].mxu0 %vm1475_vm3, %v1451_v37  ;;  %3201 = vmatmul.mubr.msk.bf16.vlgmr.msra.gmra.mrb[12].mxu1 %vm1475_vm3, %v1453_v38 }
 0x2f4   : > { %3205 = vmatpush3.bf16.xpose.msra.mxu0 %v1618_v39  ;;  %3211 = vmatpush3.bf16.msra.mxu1 %v1728_v40 }
 0x2f5   : > { %3206 = vmatprep.mubr.msk.bf16.mxu0 %vm3544_vm1, %v3543_v18  ;;  %3212 = vmatprep.mubr.msk.bf16.mxu1 %vm3544_vm1, %v3543_v18 }
 0x2f6   : > { %3216 = vmatprep.subr.bf16.mxu0 %v3543_v18  ;;  %3222 = vmatprep.subr.bf16.mxu1 %v3543_v18  ;;  %v1455_v41 = vpop.permute.xlu1 %1454 }
 0x2fb   : > { %3207 = vmatmul.mubr.msk.bf16.vlgmr.msra.gmra.mrb[16].mxu0 %vm1475_vm3, %v1455_v41 }
 0x2fc   : > { %3218 = vmatprep.mubr.msk.bf16.mxu0 %vm3544_vm1, %v3543_v18 }
 0x354   : > { %v1516_v47 = vpop.f32.mrb[8].mxu1 }
 0x355   : > { %v1662_v48 = vsel %vm3848_vm8, %v1516_v47, -1e+30  ;;  %v3190_v49 = vpop.f32.mrb[9].mxu1 }
 0x356   : > { %v1519_v50 = vpop.f32.mrb[10].mxu1  ;;  %v1666_v51 = vsel %vm1475_vm3, %v1662_v48, -inf }
 0x357   : > { %1667 = vmax.xlane.f32.xlu0 %v1666_v51  ;;  %v3191_v52 = vpop.f32.mrb[11].mxu1 }
 0x3c6   : > { %v1562_v53 = vpop.f32.mrb[12].mxu0  ;;  %v1608_v54 = vpop.f32.mrb[12].mxu1 }
 0x3c7   : > { %v1663_v55 = vsel %vm3848_vm8, %v1562_v53, -1e+30  ;;  %v1664_v56 = vsel %vm3848_vm8, %v1608_v54, -1e+30  ;;  %v3196_v58 = vpop.f32.mrb[13].mxu0  ;;  %v3202_v59 = vpop.f32.mrb[13].mxu1 }
 0x3c8   : > { %v1565_v60 = vpop.f32.mrb[14].mxu0  ;;  %v1611_v61 = vpop.f32.mrb[14].mxu1  ;;  %v1669_v62 = vsel %vm1475_vm3, %v1663_v55, -inf  ;;  %v1672_v63 = vsel %vm1475_vm3, %v1664_v56, -inf }
 0x3c9   : > { %1670 = vmax.xlane.f32.xlu1 %v1669_v62  ;;  %v3197_v0 = vpop.f32.mrb[15].mxu0  ;;  %1673 = vmax.xlane.f32.xlu0 %v1672_v63  ;;  %v3203_v1 = vpop.f32.mrb[15].mxu1 }
 0x3ce   : > { %v1654_v2 = vpop.f32.mrb[16].mxu0 }
 0x3cf   : > { %v1665_v4 = vsel %vm3848_vm8, %v1654_v2, -1e+30  ;;  %v3208_v5 = vpop.f32.mrb[17].mxu0 }
 0x3d0   : > { %v1657_v7 = vpop.f32.mrb[18].mxu0  ;;  %v1675_v8 = vsel %vm1475_vm3, %v1665_v4, -inf }
 0x3d1   : > { %v3209_v9 = vpop.f32.mrb[19].mxu0  ;;  %1676 = vmax.xlane.f32.xlu0 %v1675_v8 }
 0x3d2   : > { %v3401_v9 = vld [vmem:[%s4088_s11] sm:$0xff]  }
 0x3e4   : > { %v1668_v10 = vpop.xlane.xlu0 %1667 }
 0x3e5   : > { %v1678_v11 = vsub.f32 %v1662_v48, %v1668_v10  ;;  %v3402_v10 = vld [vmem:[%s4088_s11 + $0x8] sm:$0xff]  }
 0x3e7   : > { %v1682_v12 = vmul.f32 1.442695, %v1678_v11 }
 0x3e9   : > { %3425 = vpow2.f32 %v1682_v12 }
 0x3f3   : > { %v3426_v14 = vpop.eup %3425 }
 0x3f4   : > { %v1691_v15 = vmul.f32 %v3426_v14, %v3027_v13 }
 0x3f6   : > { %v1695_v16 = vsel %vm1475_vm3, %v1691_v15, 0.0 }
 0x3f7   : > { %1696 = vadd.xlane.f32.xlu0 %v1695_v16 }
 0x456   : > { %v1671_v17 = vpop.xlane.xlu1 %1670  ;;  %v1674_v19 = vpop.xlane.xlu0 %1673 }
 0x457   : > { %v1679_v20 = vsub.f32 %v1663_v55, %v1671_v17  ;;  %v1680_v21 = vsub.f32 %v1664_v56, %v1674_v19 }
 0x459   : > { %v1684_v22 = vmul.f32 1.442695, %v1679_v20  ;;  %v1686_v23 = vmul.f32 1.442695, %v1680_v21 }
 0x45b   : > { %3427 = vpow2.f32 %v1684_v22 }
 0x45c   : > { %3429 = vpow2.f32 %v1686_v23 }
 0x45e   : > { %v1677_v31 = vpop.xlane.xlu0 %1676 }
 0x45f   : > { %v1681_v32 = vsub.f32 %v1665_v4, %v1677_v31 }
 0x461   : > { %v1688_v35 = vmul.f32 1.442695, %v1681_v32 }
 0x465   : > { %v3428_v24 = vpop.eup %3427 }
 0x466   : > { %v3430_v25 = vpop.eup %3429  ;;  %v1692_v27 = vmul.f32 %v3428_v24, %v3027_v13 }
 0x467   : > { %v1693_v28 = vmul.f32 %v3430_v25, %v3027_v13 }
 0x468   : > { %v1698_v29 = vsel %vm1475_vm3, %v1692_v27, 0.0 }
 0x469   : > { %1699 = vadd.xlane.f32.xlu1 %v1698_v29  ;;  %v1701_v30 = vsel %vm1475_vm3, %v1693_v28, 0.0 }
 0x46a   : > { %1702 = vadd.xlane.f32.xlu0 %v1701_v30  ;;  %v3403_v30 = vld [vmem:[#allocation4] sm:$0x1f]  }
 0x47a   : > { %1113 = vrot.lane.b32.xlu1 %v3796_v57, %s3546_s24 }
 0x480   : > { %1110 = vrot.lane.b32.xlu0 %v3796_v57, %s3545_s18 }
 0x484   : > { %v1697_v33 = vpop.xlane.xlu0 %1696 }
 0x485   : > { %v1707_v34 = vadd.f32 1e-30, %v1697_v33  ;;  %v2126_v33 = vsel %vm1475_vm3, %v3403_v30, 0 }
 0x487   : > { %3431 = vrcp.f32 %v1707_v34  ;;  %v3032_v34 = vld [vmem:[%s4089_s5] ss:$0 sm:$0xff]  ;;  %s4090_s5 = sld [smem:[#allocation14_spill]] }
 0x488   : > { %3433 = vpow2.f32 %v1688_v35 }
 0x491   : > { %v3432_v36 = vpop.eup %3431 }
 0x492   : > { %v1715_v37 = vmul.f32 %v3432_v36, %v1691_v15  ;;  %v3434_v39 = vpop.eup %3433 }
 0x493   : > { %v1694_v40 = vmul.f32 %v3434_v39, %v3027_v13 }
 0x494   : > { %v1719_v38 = vpack.c.bf16 %v1715_v37, %v1715_v37 }
 0x495   : > { %v1704_v41 = vsel %vm1475_vm3, %v1694_v40, 0.0 }
 0x496   : > { %3213 = vmatmul.mubr.msk.bf16.vlgmr.msra.gmra.mrb[16].mxu1 %vm1475_vm3, %v1719_v38 }
 0x497   : > { %3224 = vmatprep.mubr.msk.bf16.mxu1 %vm3544_vm1, %v3543_v18 }
 0x49e   : > { %1705 = vadd.xlane.f32.xlu1 %v1704_v41 }
 0x4af   : > { %1116 = vrot.lane.b32.xlu1 %v3796_v57, %s3547_s22 }
 0x4f6   : > { %v1700_v42 = vpop.xlane.xlu1 %1699 }
 0x4f7   : > { %v1708_v43 = vadd.f32 1e-30, %v1700_v42  ;;  %v1703_v45 = vpop.xlane.xlu0 %1702 }
 0x4f8   : > { %v1709_v46 = vadd.f32 1e-30, %v1703_v45 }
 0x4f9   : > { %3435 = vrcp.f32 %v1708_v43 }
 0x4fa   : > { %3437 = vrcp.f32 %v1709_v46  ;;  %v1114_v47 = vpop.permute.xlu1 %1113 }
 0x4fb   : > { %1121 = vst.msk [vmem:[#allocation3 + $0x8] sm:$0xf] %vm1104_vm2, %v1114_v47  ;;  %v1111_v48 = vpop.permute.xlu0 %1110 }
 0x4fc   : > { %1120 = vst.msk [vmem:[#allocation3 + $0x4] sm:$0xf] %vm1104_vm2, %v1111_v48 }
 0x502   : > { %v1473_v49 = vld [vmem:[#allocation3 + $0x8] sm:$0xf] }
 0x503   : > { %v3436_v50 = vpop.eup %3435  ;;  %v1472_v51 = vld [vmem:[#allocation3 + $0x4] sm:$0xf]  ;;  %v1820_v52 = vsel %vm1726_vm5, %v1473_v49, 0 }
 0x504   : > { %v3438_v53 = vpop.eup %3437  ;;  %v1716_v54 = vmul.f32 %v3436_v50, %v1692_v27  ;;  %v1774_v57 = vsel %vm1726_vm5, %v1472_v51, 0  ;;  %3223 = vmatpush3.bf16.msra.mxu1 %v1820_v52 }
 0x505   : > { %v1717_v55 = vmul.f32 %v3438_v53, %v1693_v28  ;;  %3217 = vmatpush3.bf16.msra.mxu0 %v1774_v57  ;;  %3234 = vmatprep.subr.bf16.mxu1 %v3543_v18  ;;  %v3404_v53 = vld [vmem:[%s4090_s5] sm:$0xff]  }
 0x506   : > { %v1720_v56 = vpack.c.bf16 %v1716_v54, %v1716_v54  ;;  %3228 = vmatprep.subr.bf16.mxu0 %v3543_v18  ;;  %v3405_v54 = vld [vmem:[%s4090_s5 + $0x8] sm:$0xff]  }
 0x507   : > { %v1721_v58 = vpack.c.bf16 %v1717_v55, %v1717_v55 }
 0x508   : > { %3219 = vmatmul.mubr.msk.bf16.vlgmr.msra.gmra.mrb[20].mxu0 %vm1475_vm3, %v1720_v56 }
 0x509   : > { %3225 = vmatmul.mubr.msk.bf16.vlgmr.msra.gmra.mrb[20].mxu1 %vm1475_vm3, %v1721_v58  ;;  %3230 = vmatprep.mubr.msk.bf16.mxu0 %vm3544_vm1, %v3543_v18 }
 0x50a   : > { %3238 = vmatprep.mubr.msk.bf16.mxu1 %vm3544_vm1, %v3543_v18  ;;  %3235 = vmatpush3.bf16.msra.mxu1 %v3401_v9 }
 0x50b   : > { %3236 = vmatprep.subr.bf16.mxu1 %v3543_v18 }
 0x50e   : > { %3237 = vmatpush3.bf16.msra.mxu1 %v3402_v10 }
 0x50f   : > { %3250 = vmatprep.subr.bf16.mxu1 %v3543_v18 }
 0x52b   : > { %v1706_v59 = vpop.xlane.xlu1 %1705 }
 0x52c   : > { %v1710_v60 = vadd.f32 1e-30, %v1706_v59 }
 0x52e   : > { %3439 = vrcp.f32 %v1710_v60 }
 0x52f   : > { %v1117_v61 = vpop.permute.xlu1 %1116 }
 0x530   : > { %1122 = vst.msk [vmem:[#allocation3 + $0xc] sm:$0xf] %vm1104_vm2, %v1117_v61  ;;  %v3036_v61 = vld [vmem:[%s4091_s7] ss:$0 sm:$0xff]  ;;  %s2098_s7 = sld [smem:[#allocation8 + %s3501_s20]] }
 0x531   : > { %s4096_s20 = sld [smem:[#allocation17_spill]] }
 0x537   : > { %v1474_v62 = vld [vmem:[#allocation3 + $0xc] sm:$0xf] }
 0x538   : > { %v3440_v63 = vpop.eup %3439  ;;  %v1866_v0 = vsel %vm1726_vm5, %v1474_v62, 0 }
 0x539   : > { %v1718_v1 = vmul.f32 %v3440_v63, %v1694_v40  ;;  %3229 = vmatpush3.bf16.msra.mxu0 %v1866_v0 }
 0x53a   : > { %3242 = vmatprep.subr.bf16.mxu0 %v3543_v18 }
 0x53b   : > { %v1722_v2 = vpack.c.bf16 %v1718_v1, %v1718_v1 }
 0x53d   : > { %3231 = vmatmul.mubr.msk.bf16.vlgmr.msra.gmra.mrb[24].mxu0 %vm1475_vm3, %v1722_v2 }
 0x53e   : > { %3246 = vmatprep.mubr.msk.bf16.mxu0 %vm3544_vm1, %v3543_v18  ;;  %3243 = vmatpush3.bf16.msra.mxu0 %v3404_v53 }
 0x53f   : > { %3244 = vmatprep.subr.bf16.mxu0 %v3543_v18 }
 0x542   : > { %3245 = vmatpush3.bf16.msra.mxu0 %v3405_v54 }
 0x543   : > { %3256 = vmatprep.subr.bf16.mxu0 %v3543_v18 }
 0x569   : > { %v1764_v4 = vpop.f32.mrb[16].mxu1 }
 0x56a   : > { %v3214_v5 = vpop.f32.mrb[17].mxu1 }
 0x56b   : > { %v1767_v7 = vpop.f32.mrb[18].mxu1 }
 0x56c   : > { %v3215_v8 = vpop.f32.mrb[19].mxu1 }
 0x5db   : > { %v1810_v11 = vpop.f32.mrb[20].mxu0 }
 0x5dc   : > { %v1856_v12 = vpop.f32.mrb[20].mxu1  ;;  %1909 = vrot.lane.b32.xlu1 %v1810_v11, %s4072_s30  ;;  %v3220_v13 = vpop.f32.mrb[21].mxu0  ;;  %s4093_s30 = sld [smem:[#allocation15_spill]] }
 0x5dd   : > { %1913 = vrot.lane.b32.xlu0 %v1856_v12, %s3549_s15  ;;  %v3226_v14 = vpop.f32.mrb[21].mxu1  ;;  %v1813_v15 = vpop.f32.mrb[22].mxu0 }
 0x5de   : > { %v1859_v16 = vpop.f32.mrb[22].mxu1  ;;  %v3221_v17 = vpop.f32.mrb[23].mxu0 }
 0x5df   : > { %v3227_v19 = vpop.f32.mrb[23].mxu1 }
 0x5e0   : > { %v3409_v19 = vld [vmem:[#allocation5] sm:$0x1f]  }
 0x5e2   : > { %v3038_v7 = vld [vmem:[%s4093_s30] ss:$0 sm:$0xff]  ;;  %s4100_s30 = smov 24  }
 0x610   : > { %v1902_v20 = vpop.f32.mrb[24].mxu0 }
 0x611   : > { %1917 = vrot.lane.b32.xlu1 %v1902_v20, %s4071_s26  ;;  %v3232_v21 = vpop.f32.mrb[25].mxu0  ;;  %s4092_s26 = sld [smem:[#allocation13_spill]] }
 0x612   : > { %v1905_v22 = vpop.f32.mrb[26].mxu0 }
 0x613   : > { %v3233_v23 = vpop.f32.mrb[27].mxu0 }
 0x614   : > { %v2395_v23 = vsel %vm2393_vm11, %v3409_v19, 0 }
 0x617   : > { %v3037_v63 = vld [vmem:[%s4092_s26] ss:$0 sm:$0xff]  ;;  %s4102_s26 = sld [smem:[#allocation19_spill]] }
 0x64e   : > { %v1910_v24 = vpop.permute.xlu1 %1909 }
 0x64f   : > { %v1920_v25 = vsel %vm1475_vm3, %v1764_v4, %v1910_v24  ;;  %v1914_v27 = vpop.permute.xlu0 %1913 }
 0x650   : > { %v1922_v28 = vsel %vm1921_vm9, %v1920_v25, %v1914_v27  ;;  %v2099_v25 = vstv %s2098_s7  ;;  %s4103_s7 = sld [smem:[#allocation20_spill]] }
 0x651   : > { %vm3968_vm12 = vcmp.lt.s32.totalorder %v3844_v44, %v2099_v25 }
 0x683   : > { %v1918_v29 = vpop.permute.xlu1 %1917 }
 0x684   : > { %v1924_v31 = vsel %vm1923_vm10, %v1922_v28, %v1918_v29 }
 0x685   : > { %v1925_v32 = vpack.c.bf16 %v1924_v31, %v1924_v31 }
 0x687   : > { %3239 = vmatmul.mubr.msk.bf16.vlgmr.msra.gmra.mrb[24].mxu1 %vm933_vm0, %v1925_v32 }
 0x688   : > { %3251 = vmatpush3.bf16.xpose.msra.mxu1 %v2126_v33  ;;  %3252 = vmatprep.mubr.msk.bf16.mxu1 %vm3544_vm1, %v3543_v18 }
 0x689   : > { %3262 = vmatprep.subr.bf16.mxu1 %v3543_v18 }
 0x75a   : > { %v1986_v35 = vpop.f32.mrb[24].mxu1 }
 0x75b   : > { %v1987_v36 = vadd.f32 %v3032_v34, %v1986_v35  ;;  %v3240_v37 = vpop.f32.mrb[25].mxu1 }
 0x75c   : > { %v1989_v38 = vpop.f32.mrb[26].mxu1 }
 0x75d   : > { %v3915_v39 = vadd.f32 %v1987_v36, %v3742_v3  ;;  %v3241_v40 = vpop.f32.mrb[27].mxu1 }
 0x75f   : > { %v1995_v41 = vsel %vm933_vm0, %v3915_v39, 0.0 }
 0x760   : > { %1996 = vadd.xlane.f32.xlu0 %v1995_v41 }
 0x776   : > { %1264 = vrot.lane.b32.xlu0 %v3806_v6, %s3545_s18 }
 0x77a   : > { %1268 = vrot.lane.b32.xlu0 %v3806_v6, %s3547_s22 }
 0x7ed   : > { %v1997_v42 = vpop.xlane.xlu0 %1996 }
 0x7ee   : > { %v1998_v43 = vmul.f32 0.03125, %v1997_v42 }
 0x7f0   : > { %v1999_v45 = vsub.f32 %v3915_v39, %v1998_v43 }
 0x7f1   : > { %v1265_v46 = vpop.permute.xlu0 %1264 }
 0x7f2   : > { %v3003_v47 = vcombine.low %v1265_v46, %v1265_v46  ;;  %v3004_v3 = vcombine.high %v1265_v46, %v1265_v46  ;;  %v2000_v48 = vmul.f32 %v1999_v45, %v1999_v45 }
 0x7f4   : > { %1297 = vst.msk [vmem:[#allocation4 + $0x8] sm:$0xf] %vm1104_vm2, %v3003_v47  ;;  %v2001_v49 = vsel %vm933_vm0, %v2000_v48, 0.0 }
 0x7f5   : > { %1298 = vst.msk [vmem:[#allocation4 + $0xc] sm:$0x1] %vm1295_vm4, %v3004_v3  ;;  %2002 = vadd.xlane.f32.xlu1 %v2001_v49  ;;  %v1269_v50 = vpop.permute.xlu0 %1268 }
 0x7f6   : > { %v3007_v51 = vcombine.low %v1269_v50, %v1269_v50  ;;  %v3008_v52 = vcombine.high %v1269_v50, %v1269_v50 }
 0x7f8   : > { %1301 = vst.msk [vmem:[#allocation4 + $0x18] sm:$0xf] %vm1104_vm2, %v3007_v51 }
 0x7f9   : > { %1302 = vst.msk [vmem:[#allocation4 + $0x1c] sm:$0x1] %vm1295_vm4, %v3008_v52 }
 0x7fc   : > { %v3406_v2 = vld [vmem:[#allocation4 + $0x8] sm:$0x1f]  }
 0x7fd   : > { %v2177_v5 = vsel %vm1475_vm3, %v3406_v2, 0 }
 0x800   : > { %v3408_v17 = vld [vmem:[#allocation4 + $0x18] sm:$0x1f]  }
 0x801   : > { %v2279_v22 = vsel %vm1475_vm3, %v3408_v17, 0 }
 0x806   : > { %1266 = vrot.lane.b32.xlu1 %v3806_v6, %s3546_s24 }
 0x882   : > { %v2003_v57 = vpop.xlane.xlu1 %2002 }
 0x883   : > { %v2004_v55 = vmul.f32 0.03125, %v2003_v57  ;;  %v3050_v57 = vsel %vm3968_vm12, 1.0, %v3543_v18 }
 0x885   : > { %v2005_v56 = vadd.f32 1e-05, %v2004_v55 }
 0x886   : > { %v1267_v58 = vpop.permute.xlu1 %1266 }
 0x887   : > { %3441 = vrsqrt.f32 %v2005_v56  ;;  %v3005_v59 = vcombine.low %v1267_v58, %v1267_v58  ;;  %v3006_v60 = vcombine.high %v1267_v58, %v1267_v58 }
 0x889   : > { %1299 = vst.msk [vmem:[#allocation4 + $0x10] sm:$0xf] %vm1104_vm2, %v3005_v59 }
 0x88a   : > { %1300 = vst.msk [vmem:[#allocation4 + $0x14] sm:$0x1] %vm1295_vm4, %v3006_v60 }
 0x891   : > { %v3442_v6 = vpop.eup %3441  ;;  %v3407_v14 = vld [vmem:[#allocation4 + $0x10] sm:$0x1f]  }
 0x892   : > { %v2007_v62 = vmul.f32 %v3442_v6, %v1999_v45  ;;  %v2228_v16 = vsel %vm1475_vm3, %v3407_v14, 0 }
 0x894   : > { %v2014_v0 = vmul.f32 %v3036_v61, %v2007_v62 }
 0x896   : > { %v2021_v1 = vadd.f32 %v3037_v63, %v2014_v0 }
 0x898   : > { %v2022_v4 = vpack.c.bf16 %v2021_v1, %v2021_v1 }
 0x89a   : > { %3247 = vmatmul.mubr.msk.bf16.vlgmr.msra.gmra.mrb[28].mxu0 %vm933_vm0, %v2022_v4 }
 0x89b   : > { %3257 = vmatpush3.bf16.xpose.msra.mxu0 %v2177_v5  ;;  %3258 = vmatprep.mubr.msk.bf16.mxu0 %vm3544_vm1, %v3543_v18 }
 0x89c   : > { %3268 = vmatprep.subr.bf16.mxu0 %v3543_v18 }
 0x96d   : > { %v2083_v8 = vpop.f32.mrb[28].mxu0 }
 0x96e   : > { %v2084_v9 = vadd.f32 %v3038_v7, %v2083_v8  ;;  %v3248_v10 = vpop.f32.mrb[29].mxu0 }
 0x96f   : > { %v2086_v11 = vpop.f32.mrb[30].mxu0 }
 0x970   : > { %v2089_v12 = vmul.f32 0.35355338, %v2084_v9  ;;  %v3249_v13 = vpop.f32.mrb[31].mxu0 }
 0x972   : > { %v2090_v15 = vpack.c.bf16 %v2089_v12, %v2089_v12 }
 0x974   : > { %2094 = vrot.lane.b32.xlu0 %v2090_v15, %s3546_s24  ;;  %2092 = vrot.lane.b32.xlu1 %v2090_v15, %s3545_s18 }
 0x975   : > { %3253 = vmatmul.mubr.msk.bf16.vlgmr.msra.gmra.mrb[28].mxu1 %vm1475_vm3, %v2090_v15 }
 0x976   : > { %3263 = vmatpush3.bf16.xpose.msra.mxu1 %v2228_v16  ;;  %3264 = vmatprep.mubr.msk.bf16.mxu1 %vm3544_vm1, %v3543_v18 }
 0x977   : > { %3274 = vmatprep.subr.bf16.mxu1 %v3543_v18 }
 0x978   : > { %2096 = vrot.lane.b32.xlu1 %v2090_v15, %s3547_s22 }
 0x9e6   : > { %v2093_v20 = vpop.permute.xlu1 %2092  ;;  %v2095_v21 = vpop.permute.xlu0 %2094 }
 0x9e7   : > { %3259 = vmatmul.mubr.msk.bf16.vlgmr.msra.gmra.mrb[32].mxu0 %vm1475_vm3, %v2093_v20  ;;  %3265 = vmatmul.mubr.msk.bf16.vlgmr.msra.gmra.mrb[32].mxu1 %vm1475_vm3, %v2095_v21 }
 0x9e8   : > { %3269 = vmatpush3.bf16.xpose.msra.mxu0 %v2279_v22  ;;  %3275 = vmatpush3.bf16.msra.mxu1 %v2395_v23 }
 0x9e9   : > { %3270 = vmatprep.mubr.msk.bf16.mxu0 %vm3544_vm1, %v3543_v18  ;;  %3276 = vmatprep.mubr.msk.bf16.mxu1 %vm3544_vm1, %v3543_v18 }
 0x9ea   : > { %3280 = vmatprep.subr.bf16.mxu0 %v3543_v18  ;;  %3286 = vmatprep.subr.bf16.mxu1 %v3543_v18  ;;  %v2097_v24 = vpop.permute.xlu1 %2096 }
 0x9ef   : > { %3271 = vmatmul.mubr.msk.bf16.vlgmr.msra.gmra.mrb[36].mxu0 %vm1475_vm3, %v2097_v24 }
 0x9f0   : > { %3282 = vmatprep.mubr.msk.bf16.mxu0 %vm3544_vm1, %v3543_v18 }
 0xa48   : > { %v2162_v28 = vpop.f32.mrb[28].mxu1 }
 0xa49   : > { %v2323_v29 = vsel %vm3968_vm12, %v2162_v28, -1e+30  ;;  %v3254_v30 = vpop.f32.mrb[29].mxu1 }
 0xa4a   : > { %v2165_v31 = vpop.f32.mrb[30].mxu1  ;;  %v2328_v32 = vsel %vm2327_vm13, %v2323_v29, -inf }
 0xa4b   : > { %2329 = vmax.xlane.f32.xlu0 %v2328_v32  ;;  %v3255_v33 = vpop.f32.mrb[31].mxu1 }
 0xaba   : > { %v2213_v34 = vpop.f32.mrb[32].mxu0  ;;  %v2264_v35 = vpop.f32.mrb[32].mxu1 }
 0xabb   : > { %v2324_v36 = vsel %vm3968_vm12, %v2213_v34, -1e+30  ;;  %v2325_v44 = vsel %vm3968_vm12, %v2264_v35, -1e+30  ;;  %v3260_v37 = vpop.f32.mrb[33].mxu0  ;;  %v3266_v38 = vpop.f32.mrb[33].mxu1 }
 0xabc   : > { %v2216_v40 = vpop.f32.mrb[34].mxu0  ;;  %v2267_v41 = vpop.f32.mrb[34].mxu1  ;;  %v2331_v42 = vsel %vm2327_vm13, %v2324_v36, -inf  ;;  %v2334_v43 = vsel %vm2327_vm13, %v2325_v44, -inf }
 0xabd   : > { %2332 = vmax.xlane.f32.xlu1 %v2331_v42  ;;  %v3261_v45 = vpop.f32.mrb[35].mxu0  ;;  %2335 = vmax.xlane.f32.xlu0 %v2334_v43  ;;  %v3267_v46 = vpop.f32.mrb[35].mxu1 }
 0xac2   : > { %v2315_v47 = vpop.f32.mrb[36].mxu0 }
 0xac3   : > { %v2326_v3 = vsel %vm3968_vm12, %v2315_v47, -1e+30  ;;  %v3272_v48 = vpop.f32.mrb[37].mxu0 }
 0xac4   : > { %v2318_v49 = vpop.f32.mrb[38].mxu0  ;;  %v2337_v50 = vsel %vm2327_vm13, %v2326_v3, -inf }
 0xac5   : > { %v3273_v51 = vpop.f32.mrb[39].mxu0  ;;  %2338 = vmax.xlane.f32.xlu0 %v2337_v50 }
 0xad8   : > { %v2330_v52 = vpop.xlane.xlu0 %2329 }
 0xad9   : > { %v2340_v53 = vsub.f32 %v2323_v29, %v2330_v52 }
 0xadb   : > { %v2344_v54 = vmul.f32 1.442695, %v2340_v53 }
 0xadd   : > { %3443 = vpow2.f32 %v2344_v54  ;;  %v3413_v54 = vld [vmem:[%s4096_s20] sm:$0xff]  }
 0xae7   : > { %v3444_v55 = vpop.eup %3443 }
 0xae8   : > { %v2353_v56 = vmul.f32 %v3444_v55, %v3050_v57 }
 0xaea   : > { %v2357_v58 = vsel %vm2327_vm13, %v2353_v56, 0.0 }
 0xaeb   : > { %2358 = vadd.xlane.f32.xlu0 %v2357_v58 }
 0xb4a   : > { %v2333_v59 = vpop.xlane.xlu1 %2332  ;;  %v2336_v60 = vpop.xlane.xlu0 %2335 }
 0xb4b   : > { %v2341_v6 = vsub.f32 %v2324_v36, %v2333_v59  ;;  %v2342_v61 = vsub.f32 %v2325_v44, %v2336_v60 }
 0xb4d   : > { %v2346_v62 = vmul.f32 1.442695, %v2341_v6  ;;  %v2348_v63 = vmul.f32 1.442695, %v2342_v61 }
 0xb4f   : > { %3445 = vpow2.f32 %v2346_v62 }
 0xb50   : > { %3447 = vpow2.f32 %v2348_v63 }
 0xb52   : > { %v2339_v8 = vpop.xlane.xlu0 %2338 }
 0xb53   : > { %v2343_v9 = vsub.f32 %v2326_v3, %v2339_v8 }
 0xb55   : > { %v2350_v12 = vmul.f32 1.442695, %v2343_v9 }
 0xb59   : > { %v3446_v0 = vpop.eup %3445 }
 0xb5a   : > { %v3448_v1 = vpop.eup %3447  ;;  %v2354_v2 = vmul.f32 %v3446_v0, %v3050_v57 }
 0xb5b   : > { %v2355_v4 = vmul.f32 %v3448_v1, %v3050_v57 }
 0xb5c   : > { %v2360_v5 = vsel %vm2327_vm13, %v2354_v2, 0.0 }
 0xb5d   : > { %2361 = vadd.xlane.f32.xlu1 %v2360_v5  ;;  %v2363_v7 = vsel %vm2327_vm13, %v2355_v4, 0.0 }
 0xb5e   : > { %2364 = vadd.xlane.f32.xlu0 %v2363_v7 }
 0xb6e   : > { %1306 = vrot.lane.b32.xlu1 %v3820_v26, %s3546_s24  ;;  %s4098_s24 = smov 8  }
 0xb74   : > { %1304 = vrot.lane.b32.xlu0 %v3820_v26, %s3545_s18  ;;  %s4097_s18 = smov %s4096_s20  ;;  %s4104_s20 = sshll.u32 %s3732_s16, 2 }
 0xb75   : > { %v3414_v62 = vld [vmem:[%s4097_s18 + $0x8] sm:$0xff]  }
 0xb78   : > { %v2359_v10 = vpop.xlane.xlu0 %2358 }
 0xb79   : > { %v2369_v11 = vadd.f32 1e-30, %v2359_v10 }
 0xb7b   : > { %3449 = vrcp.f32 %v2369_v11 }
 0xb7c   : > { %3451 = vpow2.f32 %v2350_v12 }
 0xb85   : > { %v3450_v13 = vpop.eup %3449 }
 0xb86   : > { %v2377_v14 = vmul.f32 %v3450_v13, %v2353_v56  ;;  %v3452_v16 = vpop.eup %3451 }
 0xb87   : > { %v2356_v17 = vmul.f32 %v3452_v16, %v3050_v57 }
 0xb88   : > { %v2381_v15 = vpack.c.bf16 %v2377_v14, %v2377_v14 }
 0xb89   : > { %v2366_v19 = vsel %vm2327_vm13, %v2356_v17, 0.0 }
 0xb8a   : > { %3277 = vmatmul.mubr.msk.bf16.vlgmr.msra.gmra.mrb[36].mxu1 %vm2327_vm13, %v2381_v15 }
 0xb8b   : > { %3288 = vmatprep.mubr.msk.bf16.mxu1 %vm3544_vm1, %v3543_v18 }
 0xb92   : > { %2367 = vadd.xlane.f32.xlu1 %v2366_v19 }
 0xba3   : > { %1308 = vrot.lane.b32.xlu1 %v3820_v26, %s3547_s22  ;;  %s4099_s22 = sld [smem:[#allocation18_spill]] }
 0xba9   : > { %v3059_v12 = vld [vmem:[%s4099_s22] ss:$0 sm:$0xff] }
 0xbea   : > { %v2362_v20 = vpop.xlane.xlu1 %2361 }
 0xbeb   : > { %v2370_v21 = vadd.f32 1e-30, %v2362_v20  ;;  %v2365_v22 = vpop.xlane.xlu0 %2364 }
 0xbec   : > { %v2371_v23 = vadd.f32 1e-30, %v2365_v22 }
 0xbed   : > { %3453 = vrcp.f32 %v2370_v21 }
 0xbee   : > { %3455 = vrcp.f32 %v2371_v23  ;;  %v1307_v24 = vpop.permute.xlu1 %1306 }
 0xbef   : > { %v3013_v25 = vcombine.low %v1307_v24, %v1307_v24  ;;  %v3014_v27 = vcombine.high %v1307_v24, %v1307_v24  ;;  %v1305_v28 = vpop.permute.xlu0 %1304 }
 0xbf0   : > { %v3011_v29 = vcombine.low %v1305_v28, %v1305_v28  ;;  %v3012_v30 = vcombine.high %v1305_v28, %v1305_v28 }
 0xbf1   : > { %1338 = vst.msk [vmem:[#allocation5 + $0x10] sm:$0xf] %vm1104_vm2, %v3013_v25 }
 0xbf2   : > { %1339 = vst.msk [vmem:[#allocation5 + $0x14] sm:$0x1] %vm1295_vm4, %v3014_v27  ;;  %1337 = vst.msk [vmem:[#allocation5 + $0xc] sm:$0x1] %vm1295_vm4, %v3012_v30 }
 0xbf3   : > { %1336 = vst.msk [vmem:[#allocation5 + $0x8] sm:$0xf] %vm1104_vm2, %v3011_v29  ;;  %v3418_v29 = vld [vmem:[%s3694_s23 + $0x8] sm:$0xff]  }
 0xbf7   : > { %v3454_v26 = vpop.eup %3453 }
 0xbf8   : > { %v3456_v31 = vpop.eup %3455  ;;  %v2378_v33 = vmul.f32 %v3454_v26, %v2354_v2 }
 0xbf9   : > { %v3411_v32 = vld [vmem:[#allocation5 + $0x10] sm:$0x1f]   ;;  %v2379_v34 = vmul.f32 %v3456_v31, %v2355_v4 }
 0xbfa   : > { %v3410_v35 = vld [vmem:[#allocation5 + $0x8] sm:$0x1f]   ;;  %v2497_v36 = vsel %vm2393_vm11, %v3411_v32, 0  ;;  %v2382_v38 = vpack.c.bf16 %v2378_v33, %v2378_v33  ;;  %v3063_v33 = vld [vmem:[%s4102_s26] ss:$0 sm:$0xff] }
 0xbfb   : > { %v2446_v44 = vsel %vm2393_vm11, %v3410_v35, 0  ;;  %3287 = vmatpush3.bf16.msra.mxu1 %v2497_v36  ;;  %v2383_v37 = vpack.c.bf16 %v2379_v34, %v2379_v34  ;;  %v3064_v35 = vld [vmem:[%s4103_s7] ss:$0 sm:$0xff] }
 0xbfc   : > { %3281 = vmatpush3.bf16.msra.mxu0 %v2446_v44  ;;  %3298 = vmatprep.subr.bf16.mxu1 %v3543_v18 }
 0xbfd   : > { %3292 = vmatprep.subr.bf16.mxu0 %v3543_v18 }
 0xbfe   : > { %3289 = vmatmul.mubr.msk.bf16.vlgmr.msra.gmra.mrb[40].mxu1 %vm2327_vm13, %v2383_v37 }
 0xbff   : > { %3283 = vmatmul.mubr.msk.bf16.vlgmr.msra.gmra.mrb[40].mxu0 %vm2327_vm13, %v2382_v38  ;;  %3302 = vmatprep.mubr.msk.bf16.mxu1 %vm3544_vm1, %v3543_v18  ;;  %v3419_v38 = vld [vmem:[%s3694_s23 + $0x10] sm:$0xff]  }
 0xc00   : > { %3294 = vmatprep.mubr.msk.bf16.mxu0 %vm3544_vm1, %v3543_v18  ;;  %3299 = vmatpush3.bf16.msra.mxu1 %v3413_v54 }
 0xc01   : > { %3300 = vmatprep.subr.bf16.mxu1 %v3543_v18 }
 0xc04   : > { %3301 = vmatpush3.bf16.msra.mxu1 %v3414_v62 }
 0xc05   : > { %3314 = vmatprep.subr.bf16.mxu1 %v3543_v18 }
 0xc1f   : > { %v2368_v40 = vpop.xlane.xlu1 %2367 }
 0xc20   : > { %v2372_v41 = vadd.f32 1e-30, %v2368_v40  ;;  %v3420_v40 = vld [vmem:[%s3694_s23 + $0x18] sm:$0xff]  }
 0xc22   : > { %3457 = vrcp.f32 %v2372_v41  ;;  %v3065_v41 = vld [vmem:[%s3689_s27] ss:$0 sm:$0xff] }
 0xc23   : > { %v1309_v42 = vpop.permute.xlu1 %1308 }
 0xc24   : > { %v3015_v43 = vcombine.low %v1309_v42, %v1309_v42  ;;  %v3016_v45 = vcombine.high %v1309_v42, %v1309_v42 }
 0xc26   : > { %1340 = vst.msk [vmem:[#allocation5 + $0x18] sm:$0xf] %vm1104_vm2, %v3015_v43 }
 0xc27   : > { %1341 = vst.msk [vmem:[#allocation5 + $0x1c] sm:$0x1] %vm1295_vm4, %v3016_v45 }
 0xc2c   : > { %v3458_v46 = vpop.eup %3457 }
 0xc2d   : > { %v2380_v47 = vmul.f32 %v3458_v46, %v2356_v17 }
 0xc2e   : > { %v3412_v3 = vld [vmem:[#allocation5 + $0x18] sm:$0x1f]  }
 0xc2f   : > { %v2548_v48 = vsel %vm2393_vm11, %v3412_v3, 0  ;;  %v2384_v49 = vpack.c.bf16 %v2380_v47, %v2380_v47 }
 0xc30   : > { %3293 = vmatpush3.bf16.msra.mxu0 %v2548_v48 }
 0xc31   : > { %3306 = vmatprep.subr.bf16.mxu0 %v3543_v18 }
 0xc33   : > { %3295 = vmatmul.mubr.msk.bf16.vlgmr.msra.gmra.mrb[44].mxu0 %vm2327_vm13, %v2384_v49  ;;  %v3069_v49 = vld [vmem:[%s3699_s1] ss:$0 sm:$0xff] }
 0xc34   : > { %3310 = vmatprep.mubr.msk.bf16.mxu0 %vm3544_vm1, %v3543_v18 }
 0xc5d   : > { %v2431_v50 = vpop.f32.mrb[36].mxu1 }
 0xc5e   : > { %v3278_v51 = vpop.f32.mrb[37].mxu1 }
 0xc5f   : > { %v2434_v52 = vpop.f32.mrb[38].mxu1 }
 0xc60   : > { %v3279_v53 = vpop.f32.mrb[39].mxu1 }
 0xcd1   : > { %v2533_v57 = vpop.f32.mrb[40].mxu1 }
 0xcd2   : > { %v2482_v55 = vpop.f32.mrb[40].mxu0  ;;  %2595 = vrot.lane.b32.xlu0 %v2533_v57, %s3549_s15  ;;  %v3290_v56 = vpop.f32.mrb[41].mxu1  ;;  %s4101_s15 = sld [smem:[#allocation21_spill]] }
 0xcd3   : > { %2591 = vrot.lane.b32.xlu1 %v2482_v55, %s4098_s24  ;;  %v3284_v58 = vpop.f32.mrb[41].mxu0  ;;  %v2536_v59 = vpop.f32.mrb[42].mxu1  ;;  %s923_s24 = scalar_lea.vmem %s3704_s10, %s4104_s20 }
 0xcd4   : > { %v2485_v60 = vpop.f32.mrb[42].mxu0  ;;  %v3291_v6 = vpop.f32.mrb[43].mxu1 }
 0xcd5   : > { %v3285_v61 = vpop.f32.mrb[43].mxu0 }
 0xcd8   : > { %v3415_v27 = vld [vmem:[%s4101_s15] sm:$0xff]   ;;  %v3416_v28 = vld [vmem:[%s4101_s15 + $0x8] sm:$0xff]  }
 0xcd9   : > { %3307 = vmatpush3.bf16.msra.mxu0 %v3415_v27 }
 0xcda   : > { %3308 = vmatprep.subr.bf16.mxu0 %v3543_v18 }
 0xcdd   : > { %3309 = vmatpush3.bf16.msra.mxu0 %v3416_v28 }
 0xd06   : > { %v2584_v63 = vpop.f32.mrb[44].mxu0 }
 0xd07   : > { %2599 = vrot.lane.b32.xlu1 %v2584_v63, %s4100_s30  ;;  %v3296_v0 = vpop.f32.mrb[45].mxu0 }
 0xd08   : > { %v2587_v1 = vpop.f32.mrb[46].mxu0 }
 0xd09   : > { %v3297_v2 = vpop.f32.mrb[47].mxu0 }
 0xd44   : > { %v2596_v7 = vpop.permute.xlu0 %2595 }
 0xd45   : > { %v2592_v4 = vpop.permute.xlu1 %2591 }
 0xd46   : > { %v2602_v5 = vsel %vm1475_vm3, %v2431_v50, %v2592_v4 }
 0xd47   : > { %v2603_v8 = vsel %vm1921_vm9, %v2602_v5, %v2596_v7 }
 0xd79   : > { %v2600_v9 = vpop.permute.xlu1 %2599 }
 0xd7a   : > { %v2604_v10 = vsel %vm1923_vm10, %v2603_v8, %v2600_v9 }
 0xd7b   : > { %v2605_v11 = vpack.c.bf16 %v2604_v10, %v2604_v10 }
 0xd7d   : > { %3303 = vmatmul.mubr.msk.bf16.vlgmr.msra.gmra.mrb[44].mxu1 %vm933_vm0, %v2605_v11 }
 0xd7e   : > { %3322 = vmatprep.mubr.msk.bf16.mxu1 %vm3544_vm1, %v3543_v18 }
 0xe50   : > { %v2666_v13 = vpop.f32.mrb[44].mxu1 }
 0xe51   : > { %v2667_v14 = vadd.f32 %v3059_v12, %v2666_v13  ;;  %v3304_v15 = vpop.f32.mrb[45].mxu1 }
 0xe52   : > { %v2669_v16 = vpop.f32.mrb[46].mxu1 }
 0xe53   : > { %v2672_v17 = vadd.f32 %v2667_v14, %v3915_v39  ;;  %v3305_v19 = vpop.f32.mrb[47].mxu1  ;;  %v3417_v39 = vld [vmem:[%s3694_s23] sm:$0xff]  }
 0xe54   : > { %3315 = vmatpush3.bf16.msra.mxu1 %v3417_v39 }
 0xe55   : > { %v2675_v20 = vsel %vm933_vm0, %v2672_v17, 0.0  ;;  %3316 = vmatprep.subr.bf16.mxu1 %v3543_v18 }
 0xe56   : > { %2676 = vadd.xlane.f32.xlu0 %v2675_v20 }
 0xe58   : > { %3317 = vmatpush3.bf16.msra.mxu1 %v3418_v29 }
 0xe59   : > { %3318 = vmatprep.subr.bf16.mxu1 %v3543_v18 }
 0xe5c   : > { %3319 = vmatpush3.bf16.msra.mxu1 %v3419_v38 }
 0xe5d   : > { %3320 = vmatprep.subr.bf16.mxu1 %v3543_v18 }
 0xe60   : > { %3321 = vmatpush3.bf16.msra.mxu1 %v3420_v40 }
 0xee3   : > { %v2677_v21 = vpop.xlane.xlu0 %2676 }
 0xee4   : > { %v2678_v22 = vmul.f32 0.03125, %v2677_v21 }
 0xee6   : > { %v2679_v23 = vsub.f32 %v2672_v17, %v2678_v22 }
 0xee8   : > { %v2680_v24 = vmul.f32 %v2679_v23, %v2679_v23 }
 0xeea   : > { %v2681_v25 = vsel %vm933_vm0, %v2680_v24, 0.0 }
 0xeeb   : > { %2682 = vadd.xlane.f32.xlu1 %v2681_v25 }
 0xf78   : > { %v2683_v30 = vpop.xlane.xlu1 %2682 }
 0xf79   : > { %v2684_v26 = vmul.f32 0.03125, %v2683_v30 }
 0xf7b   : > { %v2685_v31 = vadd.f32 1e-05, %v2684_v26 }
 0xf7d   : > { %3459 = vrsqrt.f32 %v2685_v31 }
 0xf87   : > { %v3460_v32 = vpop.eup %3459 }
 0xf88   : > { %v2687_v34 = vmul.f32 %v3460_v32, %v2679_v23 }
 0xf8a   : > { %v2694_v36 = vmul.f32 %v3063_v33, %v2687_v34 }
 0xf8c   : > { %v2701_v44 = vadd.f32 %v3064_v35, %v2694_v36 }
 0xf8e   : > { %v2702_v37 = vpack.c.bf16 %v2701_v44, %v2701_v44 }
 0xf90   : > { %3311 = vmatmul.mubr.msk.bf16.vlgmr.msra.gmra.mrb[48].mxu0 %vm933_vm0, %v2702_v37 }
0x1063   : > { %v2763_v42 = vpop.f32.mrb[48].mxu0 }
0x1064   : > { %v2764_v43 = vadd.f32 %v3065_v41, %v2763_v42  ;;  %v3312_v45 = vpop.f32.mrb[49].mxu0 }
0x1065   : > { %v2766_v46 = vpop.f32.mrb[50].mxu0 }
0x1066   : > { %v2769_v47 = vmax.f32 %v2764_v43, 0.0  ;;  %v3313_v3 = vpop.f32.mrb[51].mxu0 }
0x1068   : > { %v2770_v48 = vpack.c.bf16 %v2769_v47, %v2769_v47 }
0x106a   : > { %3323 = vmatmul.mubr.msk.bf16.vlgmr.msra.gmra.mrb[48].mxu1 %vm2810_vm14, %v2770_v48 }
0x113d   : > { %v2848_v50 = vpop.f32.mrb[48].mxu1 }
0x113e   : > { %v2849_v51 = vadd.f32 %v3069_v49, %v2848_v50  ;;  %v3324_v52 = vpop.f32.mrb[49].mxu1 }
0x113f   : > { %v2851_v53 = vpop.f32.mrb[50].mxu1 }
0x1140   : > { %v2854_v18 = vadd.f32 %v2849_v51, %v2672_v17  ;;  %v3325_v54 = vpop.f32.mrb[51].mxu1 }
0x1142   : > { %v2855_v57 = vpack.c.bf16 %v2854_v18, %v2854_v18 }
0x1144   : > { %2857 = vst.msk [vmem:[%s923_s24] sm:$0xf] %vm2856_vm15, %v2855_v57 }
0x1145 PF: > { %s81_s2 = sadd.s32 1, %s3509_s2   ;;  %s4105_s20 = smov %s3505_s28 }
0x1146   : > { %p78_p1 = scmp.ge.s32.totalorder %s81_s2, 4   ;;  %s4106_s28 = smov %s4108_s0 }
0x1148   :  { %80 = sbr.rel (!%p78_p1) target bundleno = 72 (0x48), region = 200 }

// kernel: forward.6
= control target key start
LH: loop header
LB: loop body
LE: loop exit
PB: predicated region body
PF: predicated region fallthrough
CT: control target
= control target key end

     0   :  { %s4417_s6 = smov 2   ;;  %s4418_s10 = smov 3   ;;  %s5230_s0 = inlined_call_operand.smem [shape: u32[31], index: -1, kind: input, shape index: {}] }
   0x1   :  { %s4479_s5 = sld [smem:[%s5230_s0]]   ;;  %s4419_s14 = smov 4  }
   0x2   :  { %s4484_s9 = sld [smem:[%s5230_s0 + %s4417_s6]]   ;;  %s4420_s18 = smov 5  }
   0x3   :  { %s4489_s13 = sld [smem:[%s5230_s0 + %s4418_s10]]   ;;  %s4421_s22 = smov 6  }
   0x4   :  { %s4494_s17 = sld [smem:[%s5230_s0 + %s4419_s14]]   ;;  %s4422_s26 = smov 7  }
   0x5   :  { %s4499_s21 = sld [smem:[%s5230_s0 + %s4420_s18]]   ;;  %s4423_s30 = smov 8  }
   0x6   :  { %s4504_s25 = sld [smem:[%s5230_s0 + %s4421_s22]]   ;;  %s4424_s4 = smov 9  }
   0x7   :  { %s4509_s29 = sld [smem:[%s5230_s0 + %s4422_s26]]   ;;  %s4425_s10 = smov 10  }
   0x8   :  { %s4514_s3 = sld [smem:[%s5230_s0 + %s4423_s30]]   ;;  %s4426_s15 = smov 11  }
   0x9   :  { %5251 = sst [smem:[#allocation40_spill]] %s4489_s13  ;;  %s4427_s20 = smov 12  }
   0xa   :  { %5252 = sst [smem:[#allocation41_spill]] %s4494_s17  ;;  %s4428_s26 = smov 13  }
   0xb   :  { %5253 = sst [smem:[#allocation42_spill]] %s4499_s21  ;;  %s4429_s1 = smov 14  }
   0xc   :  { %5254 = sst [smem:[#allocation43_spill]] %s4504_s25  ;;  %s4430_s7 = smov 15  }
   0xd   :  { %s4519_s8 = sld [smem:[%s5230_s0 + %s4424_s4]]   ;;  %s4432_s22 = smov 17  }
   0xe   :  { %5255 = sst [smem:[#allocation44_spill]] %s4514_s3  ;;  %s4433_s28 = smov 18  }
   0xf   :  { %s4524_s14 = sld [smem:[%s5230_s0 + %s4425_s10]]   ;;  %s4444_s21 = smov 29  }
  0x10   :  { %s4529_s19 = sld [smem:[%s5230_s0 + %s4426_s15]]   ;;  %s4431_s15 = smov 16  }
  0x11   :  { %s4534_s24 = sld [smem:[%s5230_s0 + %s4427_s20]]   ;;  %s66_s17 = sshll.u32 %s4479_s5, 4  ;;  %s67_s17 = int_to_ptr.vmem [resolvable:$true] %s66_s17 }
  0x12   :  { %s4539_s30 = sld [smem:[%s5230_s0 + %s4428_s26]]   ;;  %p3948_p1 = scmp.lt.s32.totalorder %s67_s17, %s67_s17 }
  0x13   :  { %5256 = sst [smem:[#allocation45_spill]] %s4519_s8 }
  0x14   :  { %s4544_s6 = sld [smem:[%s5230_s0 + %s4429_s1]]  }
  0x15   :  { %5257 = sst [smem:[#allocation46_spill]] %s4524_s14 }
  0x16   :  { %s4549_s12 = sld [smem:[%s5230_s0 + %s4430_s7]]   ;;  %s4434_s7 = smov 19  }
  0x17   :  { %5258 = sst [smem:[#allocation47_spill]] %s4534_s24 }
  0x18   :  { %s4554_s20 = sld [smem:[%s5230_s0 + %s4431_s15]]   ;;  %s4435_s15 = smov 20  }
  0x19   :  { %s4559_s27 = sld [smem:[%s5230_s0 + %s4432_s22]]   ;;  %s4436_s22 = smov 21  }
  0x1a   :  { %s4564_s4 = sld [smem:[%s5230_s0 + %s4433_s28]]   ;;  %s4437_s28 = smov 22  }
  0x1b   :  { %s4569_s24 = sld [smem:[%s5230_s0 + %s4434_s7]]   ;;  %s4438_s7 = smov 23  }
  0x1c   :  { %s4579_s25 = sld [smem:[%s5230_s0 + %s4436_s22]]   ;;  %s4440_s22 = smov 25  }
  0x1d   :  { %s4589_s16 = sld [smem:[%s5230_s0 + %s4438_s7]]   ;;  %s4442_s7 = smov 27  }
  0x1e   :  { %5259 = sst [smem:[#allocation48_spill]] %s4554_s20 }
  0x1f   :  { %s4574_s20 = sld [smem:[%s5230_s0 + %s4435_s15]]   ;;  %s4439_s15 = smov 24  }
  0x20   :  { %5260 = sst [smem:[#allocation49_spill]] %s4564_s4 }
  0x21   :  { %s4584_s4 = sld [smem:[%s5230_s0 + %s4437_s28]]   ;;  %s4441_s28 = smov 26  }
  0x22   :  { %s4594_s23 = sld [smem:[%s5230_s0 + %s4439_s15]]  }
  0x23   :  { %s4599_s1 = sld [smem:[%s5230_s0 + %s4440_s22]]  }
  0x24   :  { %s4604_s10 = sld [smem:[%s5230_s0 + %s4441_s28]]  }
  0x25   :  { %5261 = sst [smem:[#allocation50_spill]] %s4574_s20  ;;  %s4443_s20 = smov 28  }
  0x26   :  { %s4609_s14 = sld [smem:[%s5230_s0 + %s4442_s7]]   ;;  %s3943_s7 = scalar_lea.vmem %s67_s17, 16 }
  0x27   :  { %5262 = sst [smem:[#allocation51_spill]] %s4584_s4  ;;  %s4445_s4 = smov 30  }
  0x28   :  { %s4614_s3 = sld [smem:[%s5230_s0 + %s4443_s20]]   ;;  %p3944_p0 = scmp.ne.s32.totalorder %s67_s17, %s3943_s7 }
  0x29   :  { %5263 = sst [smem:[#allocation52_spill]] %s4599_s1  ;;  %p3949_p2 = scmp.lt.s32.totalorder %s3943_s7, %s3943_s7 }
  0x2a   :  { %5264 = sst [smem:[#allocation53_spill]] %s4604_s10 }
  0x2b   :  { %s4619_s13 = sld [smem:[%s5230_s0 + %s4444_s21]]   ;;  %p3950_p3 = por %p3949_p2, %p3948_p1 }
  0x2c   :  { %s4624_s10 = sld [smem:[%s5230_s0 + %s4445_s4]]  }
  0x2d   :  { %p3951_p4 = pnand %p3950_p3, %p3944_p0 }
  0x2f   :  { %3954 = shalt.err (!%p3951_p4)  }
  0x30   :  { %s4446_s11 = smov [#allocation7]   ;;  %s4447_s20 = smov 1  }
  0x31   :  { %69 = dma.vmem_to_smem %s67_s17, 16, %s4446_s11, [#allocation6] }
  0x32   :  { %s3256_s21 = sld [smem:[%s5230_s0 + %s4447_s20]]  }
  0x38   :  { %s70_s22 = sshll.u32 %s3256_s21, 4  ;;  %s71_s22 = int_to_ptr.vmem [resolvable:$true] %s70_s22 }
  0x39   :  { %s3955_s26 = scalar_lea.vmem %s71_s22, 16  ;;  %p3960_p6 = scmp.lt.s32.totalorder %s71_s22, %s71_s22 }
  0x3a   :  { %p3956_p5 = scmp.ne.s32.totalorder %s71_s22, %s3955_s26  ;;  %p3961_p7 = scmp.lt.s32.totalorder %s3955_s26, %s3955_s26 }
  0x3c   :  { %p3962_p8 = por %p3961_p7, %p3960_p6 }
  0x3e   :  { %p3963_p9 = pnand %p3962_p8, %p3956_p5 }
  0x40   :  { %3966 = shalt.err (!%p3963_p9)  }
  0x41   :  { %s4448_s5 = smov [#allocation8]  }
  0x42   :  { %73 = dma.vmem_to_smem %s71_s22, 16, %s4448_s5, [#allocation6] }
  0x43   :  { %4371 = dma.done.wait [#allocation6], 32 }
  0x44   :  { %4372 = vsyncadd [#allocation6], 4294967264 }
  0x45   :  { %75 = sfence }
  0x46   :  { %76 = vsyncpa [#allocation10], 0 }
  0x47   :  { %77 = vsyncpa [#allocation12], 0 }
  0x48   :  { %78 = vsyncpa [#allocation15], 0 }
  0x49   :  { %79 = vsyncpa [#allocation18], 0 }
  0x4a   :  { %80 = vsyncpa [#allocation21], 0 }
  0x4b   :  { %81 = vsyncpa [#allocation24], 0 }
  0x4c   :  { %82 = vsyncpa [#allocation27], 0 }
  0x4d   :  { %83 = vsyncpa [#allocation30], 0  ;;  %s4630_s0 = smov 0   ;;  %s4632_s4 = smov 0  }
  0x4e   :  { %s4634_s28 = smov 0  }
  0x4f LB: > { %s5265_s1 = sld [smem:[#allocation52_spill]]  ;;  %s5266_s8 = sld [smem:[#allocation45_spill]]  ;;  %s4411_s4 = sphi %s4632_s4, %s5299_s4   ;;  %s4407_s0 = sphi %s4630_s0, %s5298_s0   ;;  %s4415_s28 = sphi %s4634_s28, %s89_s28  }
  0x50   : > { %s4449_s2 = smov [#allocation11]   ;;  %s3286_s7 = sadd.s32 4294967295, %s4415_s28  }
  0x51   : > { %s768_s17 = sshll.u32 %s4449_s2, 4  ;;  %p3288_p10 = scmp.ge.s32.totalorder %s4415_s28, 1  ;;  %s4652_s17 = int_to_ptr.vmem [resolvable:$true] %s768_s17 }
  0x52   : > { %p732_p11 = scmp.lt.s32.totalorder %s4415_s28, 3  ;;  %p4648_p12 = scmp.eq.s32.totalorder %s3286_s7, 0 }
  0x53   : > { %s4450_s15 = smov [#allocation14]   ;;  %s4451_s21 = smov [#allocation17]  }
  0x54   : > { %s5267_s11 = scalar_select %p4648_p12, 1, 0 }
  0x55   : > { %p4654_p13 = pnand %p3288_p10, %p732_p11  ;;  %s796_s18 = sshll.u32 %s4450_s15, 4  ;;  %s4660_s18 = int_to_ptr.vmem [resolvable:$true] %s796_s18 }
  0x56   : > { %s818_s22 = sshll.u32 %s4451_s21, 4  ;;  %s4452_s5 = smov [#allocation20]   ;;  %s4668_s22 = int_to_ptr.vmem [resolvable:$true] %s818_s22 }
  0x57   : > { %s5268_s20 = scalar_select %p4654_p13, 1, 0 }
  0x58   : > { %p3723_p0 = pneg %p4654_p13  ;;  %s846_s2 = sshll.u32 %s4452_s5, 4  ;;  %s4670_s2 = int_to_ptr.vmem [resolvable:$true] %s846_s2 }
  0x59   : > { %s3967_s7 = scalar_lea.hbm %s5266_s8, 16 }
  0x5a   : > { %p4664_p1 = pnand %p4648_p12, %p3723_p0  ;;  %p3968_p2 = scmp.ne.s32.totalorder %s5266_s8, %s3967_s7 }
  0x5b   : > { %p3974_p6 = scmp.lt.u32.totalorder %s3967_s7, %s5266_s8 }
  0x5c   : > { %p4676_p3 = pneg %p4664_p1 }
  0x5e   : > { %p3970_p4 = pnand %p4676_p3, %p3968_p2 }
  0x60   : > { %p3971_p5 = pneg %p3970_p4 }
  0x62   : > { %p3976_p7 = pnand %p3974_p6, %p3971_p5 }
  0x64   : > { %3979 = shalt.err (!%p3976_p7)
}
  0x65   : > { %s3980_s21 = scalar_lea.vmem %s4652_s17, 16  ;;  %s3987_s5 = scalar_lea.vmem %s4652_s17, 32 }
  0x66   : > { %p3981_p8 = scmp.ne.s32.totalorder %s4652_s17, %s3980_s21  ;;  %p3988_p11 = scmp.lt.s32.totalorder %s4652_s17, %s4652_s17 }
  0x67   : > { %p3989_p0 = scmp.lt.s32.totalorder %s3987_s5, %s3980_s21 }
  0x68   : > { %p3983_p9 = pnand %p3981_p8, %p4676_p3 }
  0x69   : > { %p3990_p12 = por %p3989_p0, %p3988_p11 }
  0x6a   : > { %p3984_p10 = pneg %p3983_p9 }
  0x6c   : > { %p3991_p2 = pnand %p3990_p12, %p3984_p10 }
  0x6e   : > { %3994 = shalt.err (!%p3991_p2)
}
  0x6f   : > { %3729 = dma.hbm_to_vmem [thread:$0]  (!%p4664_p1), %s5266_s8, 16, %s4652_s17, [#allocation12]  }
  0x70   : > { %s3995_s7 = scalar_lea.hbm %s4539_s30, 16 }
  0x71   : > { %p3996_p4 = scmp.ne.s32.totalorder %s4539_s30, %s3995_s7  ;;  %p4002_p7 = scmp.lt.u32.totalorder %s3995_s7, %s4539_s30 }
  0x73   : > { %p3998_p5 = pnand %p3996_p4, %p4676_p3 }
  0x75   : > { %p3999_p6 = pneg %p3998_p5 }
  0x77   : > { %p4004_p8 = pnand %p4002_p7, %p3999_p6 }
  0x79   : > { %4007 = shalt.err (!%p4004_p8)
}
  0x7a   : > { %s4008_s21 = scalar_lea.vmem %s4660_s18, 16  ;;  %s4015_s5 = scalar_lea.vmem %s4660_s18, 32 }
  0x7b   : > { %p4009_p12 = scmp.ne.s32.totalorder %s4660_s18, %s4008_s21  ;;  %p4016_p11 = scmp.lt.s32.totalorder %s4660_s18, %s4660_s18 }
  0x7c   : > { %p4017_p0 = scmp.lt.s32.totalorder %s4015_s5, %s4008_s21 }
  0x7d   : > { %p4011_p9 = pnand %p4009_p12, %p4676_p3 }
  0x7e   : > { %p4018_p2 = por %p4017_p0, %p4016_p11 }
  0x7f   : > { %p4012_p10 = pneg %p4011_p9 }
  0x81   : > { %p4019_p4 = pnand %p4018_p2, %p4012_p10 }
  0x83   : > { %4022 = shalt.err (!%p4019_p4)
}
  0x84   : > { %3735 = dma.hbm_to_vmem [thread:$0]  (!%p4664_p1), %s4539_s30, 16, %s4660_s18, [#allocation15]  }
  0x85   : > { %s4023_s17 = scalar_lea.hbm %s4549_s12, 16 }
  0x86   : > { %p4024_p5 = scmp.ne.s32.totalorder %s4549_s12, %s4023_s17  ;;  %p4030_p8 = scmp.lt.u32.totalorder %s4023_s17, %s4549_s12 }
  0x88   : > { %p4026_p6 = pnand %p4024_p5, %p4676_p3 }
  0x8a   : > { %p4027_p7 = pneg %p4026_p6 }
  0x8c   : > { %p4032_p12 = pnand %p4030_p8, %p4027_p7 }
  0x8e   : > { %4035 = shalt.err (!%p4032_p12)
}
  0x8f   : > { %s4036_s7 = scalar_lea.vmem %s4668_s22, 16  ;;  %s4043_s21 = scalar_lea.vmem %s4668_s22, 32 }
  0x90   : > { %p4037_p9 = scmp.ne.s32.totalorder %s4668_s22, %s4036_s7  ;;  %p4044_p0 = scmp.lt.s32.totalorder %s4668_s22, %s4668_s22 }
  0x91   : > { %p4045_p2 = scmp.lt.s32.totalorder %s4043_s21, %s4036_s7 }
  0x92   : > { %p4039_p10 = pnand %p4037_p9, %p4676_p3 }
  0x93   : > { %p4046_p4 = por %p4045_p2, %p4044_p0 }
  0x94   : > { %p4040_p11 = pneg %p4039_p10 }
  0x96   : > { %p4047_p5 = pnand %p4046_p4, %p4040_p11 }
  0x98   : > { %4050 = shalt.err (!%p4047_p5)
}
  0x99   : > { %3741 = dma.hbm_to_vmem [thread:$0]  (!%p4664_p1), %s4549_s12, 16, %s4668_s22, [#allocation18]  }
  0x9a   : > { %s4051_s18 = scalar_lea.hbm %s4569_s24, 16 }
  0x9b   : > { %p4052_p6 = scmp.ne.s32.totalorder %s4569_s24, %s4051_s18  ;;  %p4058_p12 = scmp.lt.u32.totalorder %s4051_s18, %s4569_s24 }
  0x9d   : > { %p4054_p7 = pnand %p4052_p6, %p4676_p3 }
  0x9f   : > { %p4055_p8 = pneg %p4054_p7 }
  0xa1   : > { %p4060_p9 = pnand %p4058_p12, %p4055_p8 }
  0xa3   : > { %4063 = shalt.err (!%p4060_p9)
}
  0xa4   : > { %s4064_s5 = scalar_lea.vmem %s4670_s2, 16  ;;  %s4071_s17 = scalar_lea.vmem %s4670_s2, 32 }
  0xa5   : > { %p4065_p10 = scmp.ne.s32.totalorder %s4670_s2, %s4064_s5  ;;  %p4072_p2 = scmp.lt.s32.totalorder %s4670_s2, %s4670_s2 }
  0xa6   : > { %p4073_p4 = scmp.lt.s32.totalorder %s4071_s17, %s4064_s5 }
  0xa7   : > { %p4067_p11 = pnand %p4065_p10, %p4676_p3 }
  0xa8   : > { %p4074_p5 = por %p4073_p4, %p4072_p2 }
  0xa9   : > { %p4068_p0 = pneg %p4067_p11 }
  0xab   : > { %p4075_p6 = pnand %p4074_p5, %p4068_p0 }
  0xad   : > { %4078 = shalt.err (!%p4075_p6)
}
  0xae   : > { %3747 = dma.hbm_to_vmem [thread:$0]  (!%p4664_p1), %s4569_s24, 16, %s4670_s2, [#allocation21]  }
  0xaf   : > { %s4453_s22 = smov [#allocation23]   ;;  %s4454_s21 = smov [#allocation26]  }
  0xb0   : > { %s874_s7 = sshll.u32 %s4453_s22, 4  ;;  %s896_s18 = sshll.u32 %s4454_s21, 4  ;;  %s875_s7 = int_to_ptr.vmem [resolvable:$true] %s874_s7  ;;  %s897_s18 = int_to_ptr.vmem [resolvable:$true] %s896_s18 }
  0xb1   : > { %s4079_s8 = scalar_lea.hbm %s4589_s16, 16 }
  0xb2   : > { %p4080_p7 = scmp.ne.s32.totalorder %s4589_s16, %s4079_s8  ;;  %p4086_p9 = scmp.lt.u32.totalorder %s4079_s8, %s4589_s16 }
  0xb4   : > { %p4082_p8 = pnand %p4080_p7, %p4676_p3 }
  0xb6   : > { %p4083_p12 = pneg %p4082_p8 }
  0xb8   : > { %p4088_p10 = pnand %p4086_p9, %p4083_p12 }
  0xba   : > { %4091 = shalt.err (!%p4088_p10)
}
  0xbb   : > { %s4092_s5 = scalar_lea.vmem %s875_s7, 16  ;;  %s4099_s2 = scalar_lea.vmem %s875_s7, 32 }
  0xbc   : > { %p4093_p11 = scmp.ne.s32.totalorder %s875_s7, %s4092_s5  ;;  %p4100_p4 = scmp.lt.s32.totalorder %s875_s7, %s875_s7 }
  0xbd   : > { %p4101_p5 = scmp.lt.s32.totalorder %s4099_s2, %s4092_s5 }
  0xbe   : > { %p4095_p0 = pnand %p4093_p11, %p4676_p3 }
  0xbf   : > { %p4102_p6 = por %p4101_p5, %p4100_p4 }
  0xc0   : > { %p4096_p2 = pneg %p4095_p0 }
  0xc2   : > { %p4103_p13 = pnand %p4102_p6, %p4096_p2 }
  0xc4   : > { %4106 = shalt.err (!%p4103_p13)
}
  0xc5   : > { %3753 = dma.hbm_to_vmem [thread:$0]  (!%p4664_p1), %s4589_s16, 16, %s875_s7, [#allocation24]  }
  0xc6   : > { %s4107_s8 = scalar_lea.hbm %s5265_s1, 16 }
  0xc7   : > { %p4108_p7 = scmp.ne.s32.totalorder %s5265_s1, %s4107_s8  ;;  %p4114_p9 = scmp.lt.u32.totalorder %s4107_s8, %s5265_s1 }
  0xc9   : > { %p4110_p8 = pnand %p4108_p7, %p4676_p3 }
  0xcb   : > { %p4111_p12 = pneg %p4110_p8 }
  0xcd   : > { %p4116_p10 = pnand %p4114_p9, %p4111_p12 }
  0xcf   : > { %4119 = shalt.err (!%p4116_p10)
}
  0xd0   : > { %s4120_s17 = scalar_lea.vmem %s897_s18, 16  ;;  %s4127_s22 = scalar_lea.vmem %s897_s18, 32 }
  0xd1   : > { %p4121_p13 = scmp.ne.s32.totalorder %s897_s18, %s4120_s17  ;;  %p4128_p2 = scmp.lt.s32.totalorder %s897_s18, %s897_s18 }
  0xd2   : > { %p4129_p4 = scmp.lt.s32.totalorder %s4127_s22, %s4120_s17 }
  0xd3   : > { %p4123_p11 = pnand %p4121_p13, %p4676_p3 }
  0xd4   : > { %p4130_p5 = por %p4129_p4, %p4128_p2 }
  0xd5   : > { %p4124_p0 = pneg %p4123_p11 }
  0xd7   : > { %p4131_p6 = pnand %p4130_p5, %p4124_p0 }
  0xd9   : > { %4134 = shalt.err (!%p4131_p6)
}
  0xda   : > { %3759 = dma.hbm_to_vmem [thread:$0]  (!%p4664_p1), %s5265_s1, 16, %s897_s18, [#allocation27]  }
  0xdb   : > { %s101_s7 = sadd.s32 1, %s4411_s4  ;;  %s4455_s21 = smov [#allocation9]  }
  0xdc   : > { %s754_s5 = sshll.u32 %s4455_s21, 4  ;;  %p4763_p7 = scmp.ge.s32.totalorder %s101_s7, 2  ;;  %s755_s5 = int_to_ptr.vmem [resolvable:$true] %s754_s5 }
  0xdd   : > { %s4135_s8 = scalar_lea.hbm %s4509_s29, 16 }
  0xde   : > { %s5271_s2 = scalar_select %p4763_p7, 1, 0 }
  0xdf   : > { %p4136_p8 = scmp.ne.s32.totalorder %s4509_s29, %s4135_s8  ;;  %p4142_p10 = scmp.lt.u32.totalorder %s4135_s8, %s4509_s29 }
  0xe1   : > { %p4138_p12 = pnand %p4136_p8, %p4676_p3 }
  0xe3   : > { %p4139_p9 = pneg %p4138_p12 }
  0xe5   : > { %p4144_p13 = pnand %p4142_p10, %p4139_p9 }
  0xe7   : > { %4147 = shalt.err (!%p4144_p13)
}
  0xe8   : > { %s4148_s17 = scalar_lea.vmem %s755_s5, 16  ;;  %s4155_s18 = scalar_lea.vmem %s755_s5, 32 }
  0xe9   : > { %p4149_p11 = scmp.ne.s32.totalorder %s755_s5, %s4148_s17  ;;  %p4156_p4 = scmp.lt.s32.totalorder %s755_s5, %s755_s5 }
  0xea   : > { %p4157_p5 = scmp.lt.s32.totalorder %s4155_s18, %s4148_s17 }
  0xeb   : > { %p4151_p0 = pnand %p4149_p11, %p4676_p3 }
  0xec   : > { %p4158_p6 = por %p4157_p5, %p4156_p4 }
  0xed   : > { %p4152_p2 = pneg %p4151_p0 }
  0xef   : > { %p4159_p7 = pnand %p4158_p6, %p4152_p2 }
  0xf1   : > { %4162 = shalt.err (!%p4159_p7)
}
  0xf2   : > { %3726 = dma.hbm_to_vmem [thread:$0]  (!%p4664_p1), %s4509_s29, 16, %s755_s5, [#allocation10]  }
  0xf3   : > { %p5272_p8 = scmp.ne.s32.totalorder %s5271_s2, 0  ;;  %s4456_s22 = smov [#allocation13]  }
  0xf4   : > { %s782_s21 = sshll.u32 %s4456_s22, 4  ;;  %s4457_s8 = smov [#allocation16]   ;;  %s783_s21 = int_to_ptr.vmem [resolvable:$true] %s782_s21 }
  0xf5   : > { %s5301_s7 = smov (%p5272_p8, %s101_s7), 0  ;;  %s807_s1 = sshll.u32 %s4457_s8, 4  ;;  %s4781_s1 = int_to_ptr.vmem [resolvable:$true] %s807_s1 }
  0xf6   : > { %s4163_s17 = scalar_lea.hbm %s4529_s19, 16 }
  0xf7   : > { %p4164_p7 = scmp.ne.s32.totalorder %s4529_s19, %s4163_s17  ;;  %p4170_p10 = scmp.lt.u32.totalorder %s4163_s17, %s4529_s19 }
  0xf9   : > { %p4166_p12 = pnand %p4164_p7, %p4676_p3 }
  0xfb   : > { %p4167_p9 = pneg %p4166_p12 }
  0xfd   : > { %p4172_p13 = pnand %p4170_p10, %p4167_p9 }
  0xff   : > { %4175 = shalt.err (!%p4172_p13)
}
 0x100   : > { %s4176_s18 = scalar_lea.vmem %s783_s21, 16  ;;  %s4183_s5 = scalar_lea.vmem %s783_s21, 32 }
 0x101   : > { %p4177_p11 = scmp.ne.s32.totalorder %s783_s21, %s4176_s18  ;;  %p4184_p4 = scmp.lt.s32.totalorder %s783_s21, %s783_s21 }
 0x102   : > { %p4185_p5 = scmp.lt.s32.totalorder %s4183_s5, %s4176_s18 }
 0x103   : > { %p4179_p0 = pnand %p4177_p11, %p4676_p3 }
 0x104   : > { %p4186_p6 = por %p4185_p5, %p4184_p4 }
 0x105   : > { %p4180_p2 = pneg %p4179_p0 }
 0x107   : > { %p4187_p8 = pnand %p4186_p6, %p4180_p2 }
 0x109   : > { %4190 = shalt.err (!%p4187_p8)
}
 0x10a   : > { %3732 = dma.hbm_to_vmem [thread:$0]  (!%p4664_p1), %s4529_s19, 16, %s783_s21, [#allocation12]  }
 0x10b   : > { %s4191_s2 = scalar_lea.hbm %s4544_s6, 16 }
 0x10c   : > { %p4192_p7 = scmp.ne.s32.totalorder %s4544_s6, %s4191_s2  ;;  %p4198_p10 = scmp.lt.u32.totalorder %s4191_s2, %s4544_s6 }
 0x10e   : > { %p4194_p12 = pnand %p4192_p7, %p4676_p3 }
 0x110   : > { %p4195_p9 = pneg %p4194_p12 }
 0x112   : > { %p4200_p13 = pnand %p4198_p10, %p4195_p9 }
 0x114   : > { %4203 = shalt.err (!%p4200_p13)
}
 0x115   : > { %s4204_s22 = scalar_lea.vmem %s4781_s1, 16  ;;  %s4211_s8 = scalar_lea.vmem %s4781_s1, 32 }
 0x116   : > { %p4205_p11 = scmp.ne.s32.totalorder %s4781_s1, %s4204_s22  ;;  %p4212_p4 = scmp.lt.s32.totalorder %s4781_s1, %s4781_s1 }
 0x117   : > { %p4213_p5 = scmp.lt.s32.totalorder %s4211_s8, %s4204_s22 }
 0x118   : > { %p4207_p0 = pnand %p4205_p11, %p4676_p3 }
 0x119   : > { %p4214_p6 = por %p4213_p5, %p4212_p4 }
 0x11a   : > { %p4208_p2 = pneg %p4207_p0 }
 0x11c   : > { %p4215_p8 = pnand %p4214_p6, %p4208_p2 }
 0x11e   : > { %4218 = shalt.err (!%p4215_p8)
}
 0x11f   : > { %3738 = dma.hbm_to_vmem [thread:$0]  (!%p4664_p1), %s4544_s6, 16, %s4781_s1, [#allocation15]  }
 0x120   : > { %s4458_s21 = smov [#allocation19]   ;;  %s4459_s18 = smov [#allocation22]  }
 0x121   : > { %s832_s17 = sshll.u32 %s4458_s21, 4  ;;  %s860_s5 = sshll.u32 %s4459_s18, 4  ;;  %s833_s17 = int_to_ptr.vmem [resolvable:$true] %s832_s17  ;;  %s4809_s5 = int_to_ptr.vmem [resolvable:$true] %s860_s5 }
 0x122   : > { %s4219_s2 = scalar_lea.hbm %s4559_s27, 16 }
 0x123   : > { %p4220_p7 = scmp.ne.s32.totalorder %s4559_s27, %s4219_s2  ;;  %p4226_p10 = scmp.lt.u32.totalorder %s4219_s2, %s4559_s27 }
 0x125   : > { %p4222_p12 = pnand %p4220_p7, %p4676_p3 }
 0x127   : > { %p4223_p9 = pneg %p4222_p12 }
 0x129   : > { %p4228_p13 = pnand %p4226_p10, %p4223_p9 }
 0x12b   : > { %4231 = shalt.err (!%p4228_p13)
}
 0x12c   : > { %s4232_s22 = scalar_lea.vmem %s833_s17, 16  ;;  %s4239_s1 = scalar_lea.vmem %s833_s17, 32 }
 0x12d   : > { %p4233_p11 = scmp.ne.s32.totalorder %s833_s17, %s4232_s22  ;;  %p4240_p4 = scmp.lt.s32.totalorder %s833_s17, %s833_s17 }
 0x12e   : > { %p4241_p5 = scmp.lt.s32.totalorder %s4239_s1, %s4232_s22 }
 0x12f   : > { %p4235_p0 = pnand %p4233_p11, %p4676_p3 }
 0x130   : > { %p4242_p6 = por %p4241_p5, %p4240_p4 }
 0x131   : > { %p4236_p2 = pneg %p4235_p0 }
 0x133   : > { %p4243_p8 = pnand %p4242_p6, %p4236_p2 }
 0x135   : > { %4246 = shalt.err (!%p4243_p8)
}
 0x136   : > { %3744 = dma.hbm_to_vmem [thread:$0]  (!%p4664_p1), %s4559_s27, 16, %s833_s17, [#allocation18]  }
 0x137   : > { %s4247_s8 = scalar_lea.hbm %s4579_s25, 16 }
 0x138   : > { %p4248_p7 = scmp.ne.s32.totalorder %s4579_s25, %s4247_s8  ;;  %p4254_p10 = scmp.lt.u32.totalorder %s4247_s8, %s4579_s25 }
 0x13a   : > { %p4250_p12 = pnand %p4248_p7, %p4676_p3 }
 0x13c   : > { %p4251_p9 = pneg %p4250_p12 }
 0x13e   : > { %p4256_p13 = pnand %p4254_p10, %p4251_p9 }
 0x140   : > { %4259 = shalt.err (!%p4256_p13)
}
 0x141   : > { %s4260_s21 = scalar_lea.vmem %s4809_s5, 16  ;;  %s4267_s18 = scalar_lea.vmem %s4809_s5, 32 }
 0x142   : > { %p4261_p11 = scmp.ne.s32.totalorder %s4809_s5, %s4260_s21  ;;  %p4268_p4 = scmp.lt.s32.totalorder %s4809_s5, %s4809_s5 }
 0x143   : > { %p4269_p5 = scmp.lt.s32.totalorder %s4267_s18, %s4260_s21 }
 0x144   : > { %p4263_p0 = pnand %p4261_p11, %p4676_p3 }
 0x145   : > { %p4270_p6 = por %p4269_p5, %p4268_p4 }
 0x146   : > { %p4264_p2 = pneg %p4263_p0 }
 0x148   : > { %p4271_p8 = pnand %p4270_p6, %p4264_p2 }
 0x14a   : > { %4274 = shalt.err (!%p4271_p8)
}
 0x14b   : > { %3750 = dma.hbm_to_vmem [thread:$0]  (!%p4664_p1), %s4579_s25, 16, %s4809_s5, [#allocation21]  }
 0x14c   : > { %s4460_s17 = smov [#allocation25]   ;;  %s4461_s22 = smov [#allocation28]  }
 0x14d   : > { %s885_s2 = sshll.u32 %s4460_s17, 4  ;;  %s910_s1 = sshll.u32 %s4461_s22, 4  ;;  %s886_s2 = int_to_ptr.vmem [resolvable:$true] %s885_s2  ;;  %s4837_s1 = int_to_ptr.vmem [resolvable:$true] %s910_s1 }
 0x14e   : > { %s4275_s8 = scalar_lea.hbm %s4594_s23, 16 }
 0x14f   : > { %p4276_p7 = scmp.ne.s32.totalorder %s4594_s23, %s4275_s8  ;;  %p4282_p10 = scmp.lt.u32.totalorder %s4275_s8, %s4594_s23 }
 0x151   : > { %p4278_p12 = pnand %p4276_p7, %p4676_p3 }
 0x153   : > { %p4279_p9 = pneg %p4278_p12 }
 0x155   : > { %p4284_p13 = pnand %p4282_p10, %p4279_p9 }
 0x157   : > { %4287 = shalt.err (!%p4284_p13)
}
 0x158   : > { %s4288_s21 = scalar_lea.vmem %s886_s2, 16  ;;  %s4295_s5 = scalar_lea.vmem %s886_s2, 32 }
 0x159   : > { %p4289_p11 = scmp.ne.s32.totalorder %s886_s2, %s4288_s21  ;;  %p4296_p4 = scmp.lt.s32.totalorder %s886_s2, %s886_s2 }
 0x15a   : > { %p4297_p5 = scmp.lt.s32.totalorder %s4295_s5, %s4288_s21 }
 0x15b   : > { %p4291_p0 = pnand %p4289_p11, %p4676_p3 }
 0x15c   : > { %p4298_p6 = por %p4297_p5, %p4296_p4 }
 0x15d   : > { %p4292_p2 = pneg %p4291_p0 }
 0x15f   : > { %p4299_p8 = pnand %p4298_p6, %p4292_p2 }
 0x161   : > { %4302 = shalt.err (!%p4299_p8)
}
 0x162   : > { %3756 = dma.hbm_to_vmem [thread:$0]  (!%p4664_p1), %s4594_s23, 16, %s886_s2, [#allocation24]  }
 0x163   : > { %s4303_s18 = scalar_lea.hbm %s4609_s14, 16 }
 0x164   : > { %p4304_p7 = scmp.ne.s32.totalorder %s4609_s14, %s4303_s18  ;;  %p4310_p10 = scmp.lt.u32.totalorder %s4303_s18, %s4609_s14 }
 0x166   : > { %p4306_p12 = pnand %p4304_p7, %p4676_p3 }
 0x168   : > { %p4307_p9 = pneg %p4306_p12 }
 0x16a   : > { %p4312_p13 = pnand %p4310_p10, %p4307_p9 }
 0x16c   : > { %4315 = shalt.err (!%p4312_p13)
}
 0x16d   : > { %s4316_s17 = scalar_lea.vmem %s4837_s1, 16  ;;  %s4323_s22 = scalar_lea.vmem %s4837_s1, 32 }
 0x16e   : > { %p4317_p11 = scmp.ne.s32.totalorder %s4837_s1, %s4316_s17  ;;  %p4324_p4 = scmp.lt.s32.totalorder %s4837_s1, %s4837_s1 }
 0x16f   : > { %p4325_p5 = scmp.lt.s32.totalorder %s4323_s22, %s4316_s17 }
 0x170   : > { %p4319_p0 = pnand %p4317_p11, %p4676_p3 }
 0x171   : > { %p4326_p6 = por %p4325_p5, %p4324_p4 }
 0x172   : > { %p4320_p2 = pneg %p4319_p0 }
 0x174   : > { %p4327_p8 = pnand %p4326_p6, %p4320_p2 }
 0x176   : > { %4330 = shalt.err (!%p4327_p8)
}
 0x177   : > { %3762 = dma.hbm_to_vmem [thread:$0]  (!%p4664_p1), %s4609_s14, 16, %s4837_s1, [#allocation27]  }
 0x178   : > { %s4462_s2 = smov [#allocation29]   ;;  %s4331_s21 = scalar_lea.hbm %s4619_s13, 16 }
 0x179   : > { %s924_s8 = sshll.u32 %s4462_s2, 4  ;;  %p4332_p7 = scmp.ne.s32.totalorder %s4619_s13, %s4331_s21  ;;  %s925_s8 = int_to_ptr.vmem [resolvable:$true] %s924_s8 }
 0x17a   : > { %p4338_p10 = scmp.lt.u32.totalorder %s4331_s21, %s4619_s13 }
 0x17b   : > { %p4334_p12 = pnand %p4332_p7, %p4676_p3 }
 0x17d   : > { %p4335_p9 = pneg %p4334_p12 }
 0x17f   : > { %p4340_p13 = pnand %p4338_p10, %p4335_p9 }
 0x181   : > { %4343 = shalt.err (!%p4340_p13)
}
 0x182   : > { %s4344_s5 = scalar_lea.vmem %s925_s8, 16  ;;  %s4351_s18 = scalar_lea.vmem %s925_s8, 32 }
 0x183   : > { %p4345_p11 = scmp.ne.s32.totalorder %s925_s8, %s4344_s5  ;;  %p4352_p4 = scmp.lt.s32.totalorder %s925_s8, %s925_s8 }
 0x184   : > { %p4353_p5 = scmp.lt.s32.totalorder %s4351_s18, %s4344_s5 }
 0x185   : > { %p4347_p0 = pnand %p4345_p11, %p4676_p3 }
 0x186   : > { %p4354_p6 = por %p4353_p5, %p4352_p4 }
 0x187   : > { %p4348_p2 = pneg %p4347_p0 }
 0x189   : > { %p4355_p8 = pnand %p4354_p6, %p4348_p2 }
 0x18b   : > { %4358 = shalt.err (!%p4355_p8)
}
 0x18c   : > { %3765 = dma.hbm_to_vmem [thread:$0]  (!%p4664_p1), %s4619_s13, 16, %s925_s8, [#allocation30]  }
 0x18d   : > { %p5273_p7 = scmp.ne.s32.totalorder %s5268_s20, 0 }
 0x18e   : > { %p5274_p12 = scmp.ne.s32.totalorder (!%p5273_p7), %s5267_s11, 0 }
 0x18f   : > { %952 = sbr.rel (%p5273_p7) target bundleno = 4760 (0x1298), region = 132 }
 0x196   : > { %4374 = dma.done.wait (%p5274_p12), [#allocation10], 16  }
 0x197   : > { %4376 = vsyncadd (%p5274_p12), [#allocation10], 4294967280 }
 0x198   : > { %4378 = dma.done.wait (%p5274_p12), [#allocation12], 32  }
 0x199   : > { %4380 = vsyncadd (%p5274_p12), [#allocation12], 4294967264 }
 0x19a   : > { %4382 = dma.done.wait (%p5274_p12), [#allocation15], 32  }
 0x19b   : > { %4384 = vsyncadd (%p5274_p12), [#allocation15], 4294967264 }
 0x19c   : > { %4386 = dma.done.wait (%p5274_p12), [#allocation18], 32  }
 0x19d   : > { %4388 = vsyncadd (%p5274_p12), [#allocation18], 4294967264 }
 0x19e   : > { %4390 = dma.done.wait (%p5274_p12), [#allocation21], 32  }
 0x19f   : > { %4392 = vsyncadd (%p5274_p12), [#allocation21], 4294967264 }
 0x1a0   : > { %4394 = dma.done.wait (%p5274_p12), [#allocation24], 32  }
 0x1a1   : > { %4396 = vsyncadd (%p5274_p12), [#allocation24], 4294967264 }
 0x1a2   : > { %4398 = dma.done.wait (%p5274_p12), [#allocation27], 32  }
 0x1a3   : > { %4400 = vsyncadd (%p5274_p12), [#allocation27], 4294967264 }
 0x1a4   : > { %4402 = dma.done.wait (%p5274_p12), [#allocation30], 16  }
 0x1a5   : > { %4404 = vsyncadd (%p5274_p12), [#allocation30], 4294967280  ;;  %s5275_s20 = sld [smem:[#allocation40_spill]]  ;;  %p1084_p1 = scmp.lt.s32.totalorder %s4407_s0, 1  ;;  %vm1109_vm0 = vcmask 261120   ;;  %v4463_v18 = vmov 0.0  }
 0x1a6   : > { %s5276_s11 = sld [smem:[#allocation44_spill]]  ;;  %s5277_s2 = sld [smem:[#allocation46_spill]]  ;;  %3487 = vmatprep.subr.bf16.mxu0 %v4463_v18  ;;  %3495 = vmatprep.subr.bf16.mxu1 %v4463_v18  ;;  %vm4464_vm1 = vmmov 0   ;;  %v3325_v46 = vld [vmem:[#allocation11] ss:$0 sm:$0xff]  ;;  %vm1280_vm2 = vcmask 60416  }
 0x1a7   : > { %s4911_s26 = scalar_select %p1084_p1, %s4407_s0, 1  ;;  %3491 = vmatprep.mubr.msk.bf16.mxu0 %vm4464_vm1, %v4463_v18  ;;  %3499 = vmatprep.mubr.msk.bf16.mxu1 %vm4464_vm1, %v4463_v18  ;;  %v3329_v47 = vld [vmem:[#allocation13] ss:$0 sm:$0xff]  ;;  %v3333_v60 = vld [vmem:[#allocation20] ss:$0 sm:$0xff]  ;;  %vm1651_vm3 = vcmask 64512  }
 0x1a8   : > { %s5278_s8 = sld [smem:[#allocation41_spill]]  ;;  %s5279_s21 = sld [smem:[#allocation42_spill]]  ;;  %vm1471_vm4 = vcmask 57344   ;;  %vm1902_vm5 = vcmask 1043456   ;;  %vm2097_vm9 = vcmask 130048   ;;  %vm2099_vm10 = vcmask 195584  }
 0x1a9   : > { %s5245_s15 = sshll.u32 %s4911_s26, 2  ;;  %s3418_s1 = sshll.u32 %s4911_s26, 3  ;;  %vm2569_vm11 = vcmask 1044480   ;;  %vm2503_vm13 = vcmask 80896   ;;  %vm2986_vm14 = vcmask 523264   ;;  %vm3032_vm15 = vcmask 257024  }
 0x1aa   : > { %s1087_s17 = scalar_lea.vmem %s4484_s9, %s5245_s15  ;;  %s5280_s5 = sld [smem:[#allocation49_spill]] }
 0x1ab   : > { %s4919_s22 = scalar_lea.vmem %s5275_s20, %s3418_s1  ;;  %v1105_v0 = vld [vmem:[%s1087_s17] sm:$0xf]  ;;  %s5281_s18 = sld [smem:[#allocation43_spill]] }
 0x1ac   : > { %v1106_v1 = vunpack.c.l.bf16 %v1105_v0  ;;  %v1523_v2 = vld [vmem:[%s1087_s17] sm:$0xf]  ;;  %v3875_v19 = vld [vmem:[%s5276_s11 + $0x8] sm:$0xff]   ;;  %s5282_s20 = sld [smem:[#allocation50_spill]]  ;;  %s4465_s1 = smov 120  }
 0x1ad   : > { %v4921_v3 = vunpack.c.l.bf16 %v1523_v2  ;;  %v3873_v16 = vld [vmem:[%s5276_s11] sm:$0xff]   ;;  %v3876_v20 = vld [vmem:[%s5277_s2 + $0x8] sm:$0xff]   ;;  %s5246_s17 = smov 112   ;;  %s5250_s15 = smov 16  }
 0x1ae   : > { %v1110_v4 = vsel %vm1109_vm0, %v1106_v1, 0.0  ;;  %v3874_v17 = vld [vmem:[%s5277_s2] sm:$0xff]   ;;  %3488 = vmatpush3.bf16.msra.mxu0 %v3873_v16 }
 0x1af   : > { %1111 = vadd.xlane.f32.xlu0 %v1110_v4  ;;  %v1528_v5 = vsel %vm1109_vm0, %v4921_v3, 0.0  ;;  %3496 = vmatpush3.bf16.msra.mxu1 %v3874_v17  ;;  %v3323_v28 = vld [vmem:[%s5278_s8] ss:$0 sm:$0xff]  ;;  %v3338_v17 = vld [vmem:[#allocation22] ss:$0 sm:$0xff]  ;;  %s1632_s8 = sld [smem:[#allocation7 + %s4407_s0]] }
 0x1b0   : > { %3489 = vmatprep.subr.bf16.mxu0 %v4463_v18  ;;  %3497 = vmatprep.subr.bf16.mxu1 %v4463_v18  ;;  %v3324_v30 = vld [vmem:[%s5279_s21] ss:$0 sm:$0xff]  ;;  %v3878_v36 = vld [vmem:[%s5280_s5 + $0x8] sm:$0xff]   ;;  %s5285_s21 = sld [smem:[#allocation47_spill]] }
 0x1b1   : > { %v3877_v33 = vld [vmem:[%s5280_s5] sm:$0xff]   ;;  %v3880_v41 = vld [vmem:[%s5281_s18 + $0x8] sm:$0xff]  }
 0x1b2   : > { %3490 = vmatpush3.bf16.msra.mxu0 %v3875_v19  ;;  %v3872_v38 = vld [vmem:[%s4919_s22] sm:$0x1f]   ;;  %v3882_v45 = vld [vmem:[%s5282_s20 + $0x8] sm:$0xff]   ;;  %s4467_s22 = smov 104  }
 0x1b3   : > { %1529 = vadd.xlane.f32.xlu0 %v1528_v5  ;;  %3498 = vmatpush3.bf16.msra.mxu1 %v3876_v20  ;;  %v3879_v39 = vld [vmem:[%s5281_s18] sm:$0xff]  }
 0x1b4   : > { %3503 = vmatprep.subr.bf16.mxu0 %v4463_v18  ;;  %3511 = vmatprep.subr.bf16.mxu1 %v4463_v18  ;;  %v3881_v44 = vld [vmem:[%s5282_s20] sm:$0xff]  }
 0x23c   : > { %v1112_v6 = vpop.xlane.xlu0 %1111 }
 0x23d   : > { %v1114_v7 = vmul.f32 0.03125, %v1112_v6 }
 0x23f   : > { %v1115_v8 = vsub.f32 %v1106_v1, %v1114_v7 }
 0x240   : > { %v1530_v9 = vpop.xlane.xlu0 %1529 }
 0x241   : > { %v1532_v10 = vmul.f32 0.03125, %v1530_v9  ;;  %v1116_v11 = vmul.f32 %v1115_v8, %v1115_v8  ;;  %v3360_v9 = vld [vmem:[#allocation9] ss:$0 sm:$0xff] }
 0x243   : > { %v1533_v12 = vsub.f32 %v4921_v3, %v1532_v10  ;;  %v1117_v13 = vsel %vm1109_vm0, %v1116_v11, 0.0 }
 0x244   : > { %1118 = vadd.xlane.f32.xlu1 %v1117_v13 }
 0x245   : > { %v1534_v14 = vmul.f32 %v1533_v12, %v1533_v12 }
 0x247   : > { %v1535_v15 = vsel %vm1109_vm0, %v1534_v14, 0.0 }
 0x248   : > { %1536 = vadd.xlane.f32.xlu1 %v1535_v15 }
 0x2d1   : > { %v1119_v21 = vpop.xlane.xlu1 %1118 }
 0x2d2   : > { %v1120_v22 = vmul.f32 0.03125, %v1119_v21 }
 0x2d4   : > { %v1121_v23 = vadd.f32 1e-05, %v1120_v22 }
 0x2d5   : > { %v1537_v24 = vpop.xlane.xlu1 %1536 }
 0x2d6   : > { %3903 = vrsqrt.f32 %v1121_v23  ;;  %v1538_v25 = vmul.f32 0.03125, %v1537_v24 }
 0x2d8   : > { %v1539_v26 = vadd.f32 1e-05, %v1538_v25 }
 0x2da   : > { %3905 = vrsqrt.f32 %v1539_v26 }
 0x2e0   : > { %v3904_v27 = vpop.eup %3903 }
 0x2e1   : > { %v1123_v29 = vmul.f32 %v3904_v27, %v1115_v8 }
 0x2e3   : > { %v1130_v31 = vmul.f32 %v3323_v28, %v1123_v29 }
 0x2e4   : > { %v3906_v35 = vpop.eup %3905 }
 0x2e5   : > { %v1137_v32 = vadd.f32 %v3324_v30, %v1130_v31  ;;  %v1541_v37 = vmul.f32 %v3906_v35, %v1533_v12 }
 0x2e7   : > { %v1138_v34 = vpack.c.bf16 %v1137_v32, %v1137_v32  ;;  %v1548_v40 = vmul.f32 %v3323_v28, %v1541_v37 }
 0x2e9   : > { %3492 = vmatmul.mubr.msk.bf16.vlgmr.msra.gmra.mrb[0].mxu0 %vm1109_vm0, %v1138_v34  ;;  %3500 = vmatmul.mubr.msk.bf16.vlgmr.msra.gmra.mrb[0].mxu1 %vm1109_vm0, %v1138_v34  ;;  %v1555_v42 = vadd.f32 %v3324_v30, %v1548_v40 }
 0x2ea   : > { %3504 = vmatpush3.bf16.msra.mxu0 %v3877_v33  ;;  %3507 = vmatprep.mubr.msk.bf16.mxu0 %vm4464_vm1, %v4463_v18 }
 0x2eb   : > { %3505 = vmatprep.subr.bf16.mxu0 %v4463_v18  ;;  %3515 = vmatprep.mubr.msk.bf16.mxu1 %vm4464_vm1, %v4463_v18  ;;  %v1556_v43 = vpack.c.bf16 %v1555_v42, %v1555_v42  ;;  %v1633_v42 = vlaneseq }
 0x2ec   : > { %3512 = vmatpush3.bf16.msra.mxu1 %v3881_v44 }
 0x2ed   : > { %3513 = vmatprep.subr.bf16.mxu1 %v4463_v18  ;;  %v5018_v44 = vand.u32 127, %v1633_v42 }
 0x2ee   : > { %3506 = vmatpush3.bf16.msra.mxu0 %v3878_v36 }
 0x2ef   : > { %3519 = vmatprep.subr.bf16.mxu0 %v4463_v18 }
 0x2f0   : > { %3514 = vmatpush3.bf16.msra.mxu1 %v3882_v45  ;;  %v1640_v45 = vstv %s1632_s8  ;;  %s5249_s8 = smov 8  }
 0x2f1   : > { %3508 = vmatmul.mubr.msk.bf16.vlgmr.msra.gmra.mrb[4].mxu0 %vm1109_vm0, %v3872_v38  ;;  %3527 = vmatprep.subr.bf16.mxu1 %v4463_v18  ;;  %vm1641_vm7 = vcmp.lt.s32.totalorder %v5018_v44, %v1640_v45 }
 0x2f2   : > { %3520 = vmatpush3.bf16.msra.mxu0 %v3879_v39  ;;  %3523 = vmatprep.mubr.msk.bf16.mxu0 %vm4464_vm1, %v4463_v18 }
 0x2f3   : > { %3521 = vmatprep.subr.bf16.mxu0 %v4463_v18  ;;  %3516 = vmatmul.mubr.msk.bf16.vlgmr.msra.gmra.mrb[4].mxu1 %vm1109_vm0, %v3872_v38 }
 0x2f4   : > { %3529 = vmatprep.mubr.msk.bf16.mxu1 %vm4464_vm1, %v4463_v18 }
 0x2f6   : > { %3522 = vmatpush3.bf16.msra.mxu0 %v3880_v41 }
 0x2f7   : > { %3533 = vmatprep.subr.bf16.mxu0 %v4463_v18 }
 0x2f9   : > { %3524 = vmatmul.mubr.msk.bf16.vlgmr.msra.gmra.mrb[8].mxu0 %vm1109_vm0, %v1556_v43  ;;  %v1634_v43 = vshrl.u32 %v1633_v42, 7 }
 0x2fa   : > { %3535 = vmatprep.mubr.msk.bf16.mxu0 %vm4464_vm1, %v4463_v18 }
 0x2fb   : > { %vm1639_vm6 = vcmp.le.s32.totalorder %v5018_v44, %v1634_v43 }
 0x2fc   : > { %vm5022_vm8 = vmand %vm1639_vm6, %vm1641_vm7 }
 0x3bc   : > { %v1199_v48 = vpop.f32.mrb[0].mxu0  ;;  %v1263_v49 = vpop.f32.mrb[0].mxu1 }
 0x3bd   : > { %v1200_v50 = vadd.f32 %v3325_v46, %v1199_v48  ;;  %v1264_v51 = vadd.f32 %v3329_v47, %v1263_v49  ;;  %v3493_v52 = vpop.f32.mrb[1].mxu0  ;;  %v3501_v53 = vpop.f32.mrb[1].mxu1 }
 0x3be   : > { %v1202_v54 = vpop.f32.mrb[2].mxu0  ;;  %v1266_v55 = vpop.f32.mrb[2].mxu1 }
 0x3bf   : > { %v1205_v56 = vpack.c.bf16 %v1200_v50, %v1200_v50  ;;  %v4973_v57 = vpack.c.bf16 %v1264_v51, %v1264_v51  ;;  %v3494_v58 = vpop.f32.mrb[3].mxu0  ;;  %v3502_v59 = vpop.f32.mrb[3].mxu1 }
 0x3c1   : > { %1281 = vst.msk [vmem:[#allocation2] sm:$0xf] %vm1280_vm2, %v1205_v56  ;;  %1295 = vst.msk [vmem:[#allocation3] sm:$0xf] %vm1280_vm2, %v4973_v57  ;;  %1271 = vrot.lane.b32.xlu0 %v1205_v56, %s4465_s1  ;;  %1274 = vrot.lane.b32.xlu1 %v1205_v56, %s5246_s17 }
 0x3c4   : > { %v1366_v61 = vpop.f32.mrb[4].mxu0 }
 0x3c5   : > { %v1367_v62 = vadd.f32 %v3333_v60, %v1366_v61  ;;  %v3509_v63 = vpop.f32.mrb[5].mxu0  ;;  %1277 = vrot.lane.b32.xlu1 %v1205_v56, %s4467_s22 }
 0x3c6   : > { %v1369_v0 = vpop.f32.mrb[6].mxu0  ;;  %v1431_v19 = vpop.f32.mrb[4].mxu1 }
 0x3c7   : > { %v3419_v1 = vpack.c.bf16 %v1367_v62, %v1367_v62  ;;  %v1370_v2 = vadd.f32 %v3333_v60, %v1369_v0  ;;  %v3510_v4 = vpop.f32.mrb[7].mxu0  ;;  %v1432_v20 = vadd.f32 %v3338_v17, %v1431_v19  ;;  %v3517_v21 = vpop.f32.mrb[5].mxu1 }
 0x3c8   : > { %v1643_v5 = vld [vmem:[#allocation2] sm:$0xf]  ;;  %v1434_v22 = vpop.f32.mrb[6].mxu1  ;;  %v1647_v36 = vld [vmem:[#allocation3] sm:$0xf] }
 0x3c9   : > { %1470 = vst.msk [vmem:[#allocation4] sm:$0xf] %vm1280_vm2, %v3419_v1  ;;  %v4982_v6 = vpack.c.bf16 %v1370_v2, %v1367_v62  ;;  %v3420_v7 = vpack.c.bf16 %v1370_v2, %v1370_v2  ;;  %v1656_v8 = vsel %vm1651_vm3, %v1643_v5, 0  ;;  %v3421_v23 = vpack.c.bf16 %v1432_v20, %v1432_v20  ;;  %v3518_v25 = vpop.f32.mrb[7].mxu1 }
 0x3ca   : > { %3528 = vmatpush3.bf16.xpose.msra.mxu1 %v1656_v8  ;;  %v1435_v24 = vadd.f32 %v3338_v17, %v1434_v22  ;;  %v1904_v40 = vsel %vm1902_vm5, %v1647_v36, 0 }
 0x3cb   : > { %1472 = vst.msk [vmem:[#allocation4 + $0x4] sm:$0x1] %vm1471_vm4, %v3420_v7  ;;  %3539 = vmatprep.subr.bf16.mxu1 %v4463_v18 }
 0x3cc   : > { %v1617_v10 = vpop.f32.mrb[8].mxu0  ;;  %1510 = vst.msk [vmem:[#allocation5] sm:$0xf] %vm1280_vm2, %v3421_v23  ;;  %v4994_v26 = vpack.c.bf16 %v1435_v24, %v1432_v20  ;;  %v3422_v27 = vpack.c.bf16 %v1435_v24, %v1435_v24 }
 0x3cd   : > { %v1618_v11 = vadd.f32 %v3360_v9, %v1617_v10  ;;  %v3525_v12 = vpop.f32.mrb[9].mxu0 }
 0x3ce   : > { %v1620_v13 = vpop.f32.mrb[10].mxu0  ;;  %1511 = vst.msk [vmem:[#allocation5 + $0x4] sm:$0x1] %vm1471_vm4, %v3422_v27 }
 0x3cf   : > { %v1623_v14 = vmul.f32 0.35355338, %v1618_v11  ;;  %v3526_v15 = vpop.f32.mrb[11].mxu0  ;;  %v3368_v13 = vsel %vm5022_vm8, 1.0, %v4463_v18 }
 0x3d1   : > { %v1624_v16 = vpack.c.bf16 %v1623_v14, %v1623_v14 }
 0x3d3   : > { %1628 = vrot.lane.b32.xlu0 %v1624_v16, %s5246_s17  ;;  %1626 = vrot.lane.b32.xlu1 %v1624_v16, %s4465_s1 }
 0x3d4   : > { %3530 = vmatmul.mubr.msk.bf16.vlgmr.msra.gmra.mrb[8].mxu1 %vm1651_vm3, %v1624_v16 }
 0x3d5   : > { %3541 = vmatprep.mubr.msk.bf16.mxu1 %vm4464_vm1, %v4463_v18 }
 0x3d7   : > { %1630 = vrot.lane.b32.xlu1 %v1624_v16, %s4467_s22 }
 0x433   : > { %v1275_v28 = vpop.permute.xlu1 %1274  ;;  %v1272_v29 = vpop.permute.xlu0 %1271 }
 0x434   : > { %1283 = vst.msk [vmem:[#allocation2 + $0x8] sm:$0xf] %vm1280_vm2, %v1275_v28  ;;  %1282 = vst.msk [vmem:[#allocation2 + $0x4] sm:$0xf] %vm1280_vm2, %v1272_v29 }
 0x437   : > { %v1278_v30 = vpop.permute.xlu1 %1277 }
 0x438   : > { %1284 = vst.msk [vmem:[#allocation2 + $0xc] sm:$0xf] %vm1280_vm2, %v1278_v30 }
 0x43b   : > { %v1644_v31 = vld [vmem:[#allocation2 + $0x4] sm:$0xf]  ;;  %v1645_v32 = vld [vmem:[#allocation2 + $0x8] sm:$0xf] }
 0x43c   : > { %v1702_v33 = vsel %vm1651_vm3, %v1644_v31, 0  ;;  %v1748_v34 = vsel %vm1651_vm3, %v1645_v32, 0 }
 0x43d   : > { %3534 = vmatpush3.bf16.xpose.msra.mxu0 %v1702_v33  ;;  %3540 = vmatpush3.bf16.xpose.msra.mxu1 %v1748_v34 }
 0x43e   : > { %3551 = vmatprep.subr.bf16.mxu1 %v4463_v18  ;;  %3545 = vmatprep.subr.bf16.mxu0 %v4463_v18 }
 0x43f   : > { %v1646_v35 = vld [vmem:[#allocation2 + $0xc] sm:$0xf] }
 0x440   : > { %v1794_v39 = vsel %vm1651_vm3, %v1646_v35, 0 }
 0x445   : > { %v1627_v37 = vpop.permute.xlu1 %1626  ;;  %v1629_v38 = vpop.permute.xlu0 %1628 }
 0x446   : > { %3536 = vmatmul.mubr.msk.bf16.vlgmr.msra.gmra.mrb[12].mxu0 %vm1651_vm3, %v1627_v37  ;;  %3542 = vmatmul.mubr.msk.bf16.vlgmr.msra.gmra.mrb[12].mxu1 %vm1651_vm3, %v1629_v38 }
 0x447   : > { %3546 = vmatpush3.bf16.xpose.msra.mxu0 %v1794_v39  ;;  %3552 = vmatpush3.bf16.msra.mxu1 %v1904_v40 }
 0x448   : > { %3547 = vmatprep.mubr.msk.bf16.mxu0 %vm4464_vm1, %v4463_v18  ;;  %3553 = vmatprep.mubr.msk.bf16.mxu1 %vm4464_vm1, %v4463_v18 }
 0x449   : > { %3557 = vmatprep.subr.bf16.mxu0 %v4463_v18  ;;  %3563 = vmatprep.subr.bf16.mxu1 %v4463_v18  ;;  %v1631_v41 = vpop.permute.xlu1 %1630 }
 0x44e   : > { %3548 = vmatmul.mubr.msk.bf16.vlgmr.msra.gmra.mrb[16].mxu0 %vm1651_vm3, %v1631_v41 }
 0x44f   : > { %3559 = vmatprep.mubr.msk.bf16.mxu0 %vm4464_vm1, %v4463_v18 }
 0x4a7   : > { %v1692_v47 = vpop.f32.mrb[8].mxu1 }
 0x4a8   : > { %v1838_v48 = vsel %vm5022_vm8, %v1692_v47, -1e+30  ;;  %v3531_v49 = vpop.f32.mrb[9].mxu1 }
 0x4a9   : > { %v1695_v50 = vpop.f32.mrb[10].mxu1  ;;  %v1842_v51 = vsel %vm1651_vm3, %v1838_v48, -inf }
 0x4aa   : > { %1843 = vmax.xlane.f32.xlu0 %v1842_v51  ;;  %v3532_v52 = vpop.f32.mrb[11].mxu1 }
 0x519   : > { %v1738_v53 = vpop.f32.mrb[12].mxu0  ;;  %v1784_v54 = vpop.f32.mrb[12].mxu1 }
 0x51a   : > { %v1839_v55 = vsel %vm5022_vm8, %v1738_v53, -1e+30  ;;  %v1840_v56 = vsel %vm5022_vm8, %v1784_v54, -1e+30  ;;  %v3537_v58 = vpop.f32.mrb[13].mxu0  ;;  %v3543_v59 = vpop.f32.mrb[13].mxu1 }
 0x51b   : > { %v1741_v60 = vpop.f32.mrb[14].mxu0  ;;  %v1787_v61 = vpop.f32.mrb[14].mxu1  ;;  %v1845_v62 = vsel %vm1651_vm3, %v1839_v55, -inf  ;;  %v1848_v63 = vsel %vm1651_vm3, %v1840_v56, -inf }
 0x51c   : > { %1846 = vmax.xlane.f32.xlu1 %v1845_v62  ;;  %v3538_v0 = vpop.f32.mrb[15].mxu0  ;;  %1849 = vmax.xlane.f32.xlu0 %v1848_v63  ;;  %v3544_v1 = vpop.f32.mrb[15].mxu1 }
 0x521   : > { %v1830_v2 = vpop.f32.mrb[16].mxu0 }
 0x522   : > { %v1841_v4 = vsel %vm5022_vm8, %v1830_v2, -1e+30  ;;  %v3549_v5 = vpop.f32.mrb[17].mxu0 }
 0x523   : > { %v1833_v7 = vpop.f32.mrb[18].mxu0  ;;  %v1851_v8 = vsel %vm1651_vm3, %v1841_v4, -inf }
 0x524   : > { %v3550_v9 = vpop.f32.mrb[19].mxu0  ;;  %1852 = vmax.xlane.f32.xlu0 %v1851_v8 }
 0x525   : > { %v3883_v9 = vld [vmem:[%s5285_s21] sm:$0xff]  }
 0x537   : > { %v1844_v10 = vpop.xlane.xlu0 %1843 }
 0x538   : > { %v1854_v11 = vsub.f32 %v1838_v48, %v1844_v10  ;;  %v3884_v10 = vld [vmem:[%s5285_s21 + $0x8] sm:$0xff]  }
 0x53a   : > { %v1858_v12 = vmul.f32 1.442695, %v1854_v11 }
 0x53c   : > { %3907 = vpow2.f32 %v1858_v12 }
 0x546   : > { %v3908_v14 = vpop.eup %3907 }
 0x547   : > { %v1867_v15 = vmul.f32 %v3908_v14, %v3368_v13 }
 0x549   : > { %v1871_v16 = vsel %vm1651_vm3, %v1867_v15, 0.0 }
 0x54a   : > { %1872 = vadd.xlane.f32.xlu0 %v1871_v16 }
 0x5a9   : > { %v1847_v17 = vpop.xlane.xlu1 %1846  ;;  %v1850_v19 = vpop.xlane.xlu0 %1849 }
 0x5aa   : > { %v1855_v20 = vsub.f32 %v1839_v55, %v1847_v17  ;;  %v1856_v21 = vsub.f32 %v1840_v56, %v1850_v19 }
 0x5ac   : > { %v1860_v22 = vmul.f32 1.442695, %v1855_v20  ;;  %v1862_v23 = vmul.f32 1.442695, %v1856_v21 }
 0x5ae   : > { %3909 = vpow2.f32 %v1860_v22 }
 0x5af   : > { %3911 = vpow2.f32 %v1862_v23 }
 0x5b1   : > { %v1853_v31 = vpop.xlane.xlu0 %1852 }
 0x5b2   : > { %v1857_v32 = vsub.f32 %v1841_v4, %v1853_v31 }
 0x5b4   : > { %v1864_v35 = vmul.f32 1.442695, %v1857_v32 }
 0x5b8   : > { %v3910_v24 = vpop.eup %3909 }
 0x5b9   : > { %v3912_v25 = vpop.eup %3911  ;;  %v1868_v27 = vmul.f32 %v3910_v24, %v3368_v13 }
 0x5ba   : > { %v1869_v28 = vmul.f32 %v3912_v25, %v3368_v13 }
 0x5bb   : > { %v1874_v29 = vsel %vm1651_vm3, %v1868_v27, 0.0 }
 0x5bc   : > { %1875 = vadd.xlane.f32.xlu1 %v1874_v29  ;;  %v1877_v30 = vsel %vm1651_vm3, %v1869_v28, 0.0 }
 0x5bd   : > { %1878 = vadd.xlane.f32.xlu0 %v1877_v30  ;;  %v3885_v30 = vld [vmem:[#allocation4] sm:$0x1f]  }
 0x5cd   : > { %1289 = vrot.lane.b32.xlu1 %v4973_v57, %s5246_s17  ;;  %s5248_s17 = smov 24  }
 0x5d3   : > { %1286 = vrot.lane.b32.xlu0 %v4973_v57, %s4465_s1 }
 0x5d7   : > { %v1873_v33 = vpop.xlane.xlu0 %1872 }
 0x5d8   : > { %v1883_v34 = vadd.f32 1e-30, %v1873_v33  ;;  %v2302_v33 = vsel %vm1651_vm3, %v3885_v30, 0 }
 0x5da   : > { %3913 = vrcp.f32 %v1883_v34  ;;  %v3373_v34 = vld [vmem:[#allocation14] ss:$0 sm:$0xff] }
 0x5db   : > { %3915 = vpow2.f32 %v1864_v35 }
 0x5e4   : > { %v3914_v36 = vpop.eup %3913 }
 0x5e5   : > { %v1891_v37 = vmul.f32 %v3914_v36, %v1867_v15  ;;  %v3916_v39 = vpop.eup %3915 }
 0x5e6   : > { %v1870_v40 = vmul.f32 %v3916_v39, %v3368_v13 }
 0x5e7   : > { %v1895_v38 = vpack.c.bf16 %v1891_v37, %v1891_v37 }
 0x5e8   : > { %v1880_v41 = vsel %vm1651_vm3, %v1870_v40, 0.0 }
 0x5e9   : > { %3554 = vmatmul.mubr.msk.bf16.vlgmr.msra.gmra.mrb[16].mxu1 %vm1651_vm3, %v1895_v38 }
 0x5ea   : > { %3565 = vmatprep.mubr.msk.bf16.mxu1 %vm4464_vm1, %v4463_v18 }
 0x5f1   : > { %1881 = vadd.xlane.f32.xlu1 %v1880_v41 }
 0x602   : > { %1292 = vrot.lane.b32.xlu1 %v4973_v57, %s4467_s22 }
 0x649   : > { %v1876_v42 = vpop.xlane.xlu1 %1875 }
 0x64a   : > { %v1884_v43 = vadd.f32 1e-30, %v1876_v42  ;;  %v1879_v45 = vpop.xlane.xlu0 %1878 }
 0x64b   : > { %v1885_v46 = vadd.f32 1e-30, %v1879_v45 }
 0x64c   : > { %3917 = vrcp.f32 %v1884_v43 }
 0x64d   : > { %3919 = vrcp.f32 %v1885_v46  ;;  %v1290_v47 = vpop.permute.xlu1 %1289 }
 0x64e   : > { %1297 = vst.msk [vmem:[#allocation3 + $0x8] sm:$0xf] %vm1280_vm2, %v1290_v47  ;;  %v1287_v48 = vpop.permute.xlu0 %1286 }
 0x64f   : > { %1296 = vst.msk [vmem:[#allocation3 + $0x4] sm:$0xf] %vm1280_vm2, %v1287_v48 }
 0x655   : > { %v1649_v49 = vld [vmem:[#allocation3 + $0x8] sm:$0xf] }
 0x656   : > { %v3918_v50 = vpop.eup %3917  ;;  %v1648_v51 = vld [vmem:[#allocation3 + $0x4] sm:$0xf]  ;;  %v1996_v52 = vsel %vm1902_vm5, %v1649_v49, 0 }
 0x657   : > { %v3920_v53 = vpop.eup %3919  ;;  %v1892_v54 = vmul.f32 %v3918_v50, %v1868_v27  ;;  %v1950_v57 = vsel %vm1902_vm5, %v1648_v51, 0  ;;  %3564 = vmatpush3.bf16.msra.mxu1 %v1996_v52 }
 0x658   : > { %v1893_v55 = vmul.f32 %v3920_v53, %v1869_v28  ;;  %3558 = vmatpush3.bf16.msra.mxu0 %v1950_v57  ;;  %3575 = vmatprep.subr.bf16.mxu1 %v4463_v18 }
 0x659   : > { %v1896_v56 = vpack.c.bf16 %v1892_v54, %v1892_v54  ;;  %3569 = vmatprep.subr.bf16.mxu0 %v4463_v18 }
 0x65a   : > { %v1897_v58 = vpack.c.bf16 %v1893_v55, %v1893_v55 }
 0x65b   : > { %3560 = vmatmul.mubr.msk.bf16.vlgmr.msra.gmra.mrb[20].mxu0 %vm1651_vm3, %v1896_v56 }
 0x65c   : > { %3566 = vmatmul.mubr.msk.bf16.vlgmr.msra.gmra.mrb[20].mxu1 %vm1651_vm3, %v1897_v58  ;;  %3571 = vmatprep.mubr.msk.bf16.mxu0 %vm4464_vm1, %v4463_v18 }
 0x65d   : > { %3579 = vmatprep.mubr.msk.bf16.mxu1 %vm4464_vm1, %v4463_v18  ;;  %3576 = vmatpush3.bf16.msra.mxu1 %v3883_v9 }
 0x65e   : > { %3577 = vmatprep.subr.bf16.mxu1 %v4463_v18 }
 0x661   : > { %3578 = vmatpush3.bf16.msra.mxu1 %v3884_v10 }
 0x662   : > { %3591 = vmatprep.subr.bf16.mxu1 %v4463_v18 }
 0x67e   : > { %v1882_v59 = vpop.xlane.xlu1 %1881 }
 0x67f   : > { %v1886_v60 = vadd.f32 1e-30, %v1882_v59 }
 0x681   : > { %3921 = vrcp.f32 %v1886_v60 }
 0x682   : > { %v1293_v61 = vpop.permute.xlu1 %1292 }
 0x683   : > { %1298 = vst.msk [vmem:[#allocation3 + $0xc] sm:$0xf] %vm1280_vm2, %v1293_v61  ;;  %v3377_v61 = vld [vmem:[#allocation16] ss:$0 sm:$0xff] }
 0x68a   : > { %v1650_v62 = vld [vmem:[#allocation3 + $0xc] sm:$0xf] }
 0x68b   : > { %v3922_v63 = vpop.eup %3921  ;;  %v2042_v0 = vsel %vm1902_vm5, %v1650_v62, 0 }
 0x68c   : > { %v1894_v1 = vmul.f32 %v3922_v63, %v1870_v40  ;;  %3570 = vmatpush3.bf16.msra.mxu0 %v2042_v0  ;;  %v3378_v63 = vld [vmem:[#allocation17] ss:$0 sm:$0xff] }
 0x68d   : > { %3583 = vmatprep.subr.bf16.mxu0 %v4463_v18 }
 0x68e   : > { %v1898_v2 = vpack.c.bf16 %v1894_v1, %v1894_v1 }
 0x690   : > { %3572 = vmatmul.mubr.msk.bf16.vlgmr.msra.gmra.mrb[24].mxu0 %vm1651_vm3, %v1898_v2 }
 0x691   : > { %3587 = vmatprep.mubr.msk.bf16.mxu0 %vm4464_vm1, %v4463_v18 }
 0x6bc   : > { %v1940_v4 = vpop.f32.mrb[16].mxu1 }
 0x6bd   : > { %v3555_v5 = vpop.f32.mrb[17].mxu1 }
 0x6be   : > { %v1943_v7 = vpop.f32.mrb[18].mxu1 }
 0x6bf   : > { %v3556_v8 = vpop.f32.mrb[19].mxu1  ;;  %v3379_v7 = vld [vmem:[#allocation19] ss:$0 sm:$0xff] }
 0x72e   : > { %v1986_v11 = vpop.f32.mrb[20].mxu0 }
 0x72f   : > { %v2032_v12 = vpop.f32.mrb[20].mxu1  ;;  %2085 = vrot.lane.b32.xlu1 %v1986_v11, %s5249_s8  ;;  %v3561_v13 = vpop.f32.mrb[21].mxu0  ;;  %s5287_s8 = smov 112  }
 0x730   : > { %2089 = vrot.lane.b32.xlu0 %v2032_v12, %s5250_s15  ;;  %v3567_v14 = vpop.f32.mrb[21].mxu1  ;;  %v1989_v15 = vpop.f32.mrb[22].mxu0  ;;  %s2274_s15 = sld [smem:[#allocation8 + %s4407_s0]] }
 0x731   : > { %v2035_v16 = vpop.f32.mrb[22].mxu1  ;;  %v3562_v17 = vpop.f32.mrb[23].mxu0  ;;  %s5290_s0 = sld [smem:[#allocation51_spill]] }
 0x732   : > { %v3568_v19 = vpop.f32.mrb[23].mxu1 }
 0x733   : > { %v3891_v19 = vld [vmem:[#allocation5] sm:$0x1f]  }
 0x763   : > { %v2078_v20 = vpop.f32.mrb[24].mxu0 }
 0x764   : > { %2093 = vrot.lane.b32.xlu1 %v2078_v20, %s5248_s17  ;;  %v3573_v21 = vpop.f32.mrb[25].mxu0  ;;  %s5286_s17 = sld [smem:[#allocation48_spill]] }
 0x765   : > { %v2081_v22 = vpop.f32.mrb[26].mxu0 }
 0x766   : > { %v3574_v23 = vpop.f32.mrb[27].mxu0 }
 0x767   : > { %v2571_v23 = vsel %vm2569_vm11, %v3891_v19, 0 }
 0x76a   : > { %v3886_v53 = vld [vmem:[%s5286_s17] sm:$0xff]   ;;  %v3887_v54 = vld [vmem:[%s5286_s17 + $0x8] sm:$0xff]  }
 0x76b   : > { %3584 = vmatpush3.bf16.msra.mxu0 %v3886_v53 }
 0x76c   : > { %3585 = vmatprep.subr.bf16.mxu0 %v4463_v18 }
 0x76f   : > { %3586 = vmatpush3.bf16.msra.mxu0 %v3887_v54 }
 0x770   : > { %3597 = vmatprep.subr.bf16.mxu0 %v4463_v18 }
 0x7a1   : > { %v2086_v24 = vpop.permute.xlu1 %2085 }
 0x7a2   : > { %v2096_v25 = vsel %vm1651_vm3, %v1940_v4, %v2086_v24  ;;  %v2090_v27 = vpop.permute.xlu0 %2089 }
 0x7a3   : > { %v2098_v28 = vsel %vm2097_vm9, %v2096_v25, %v2090_v27  ;;  %v2275_v25 = vstv %s2274_s15  ;;  %s5291_s15 = smov %s5290_s0 }
 0x7a4   : > { %vm5138_vm12 = vcmp.lt.s32.totalorder %v5018_v44, %v2275_v25 }
 0x7d6   : > { %v2094_v29 = vpop.permute.xlu1 %2093 }
 0x7d7   : > { %v2100_v31 = vsel %vm2099_vm10, %v2098_v28, %v2094_v29 }
 0x7d8   : > { %v2101_v32 = vpack.c.bf16 %v2100_v31, %v2100_v31 }
 0x7da   : > { %3580 = vmatmul.mubr.msk.bf16.vlgmr.msra.gmra.mrb[24].mxu1 %vm1109_vm0, %v2101_v32 }
 0x7db   : > { %3592 = vmatpush3.bf16.xpose.msra.mxu1 %v2302_v33  ;;  %3593 = vmatprep.mubr.msk.bf16.mxu1 %vm4464_vm1, %v4463_v18 }
 0x7dc   : > { %3603 = vmatprep.subr.bf16.mxu1 %v4463_v18 }
 0x8ad   : > { %v2162_v35 = vpop.f32.mrb[24].mxu1 }
 0x8ae   : > { %v2163_v36 = vadd.f32 %v3373_v34, %v2162_v35  ;;  %v3581_v37 = vpop.f32.mrb[25].mxu1 }
 0x8af   : > { %v2165_v38 = vpop.f32.mrb[26].mxu1 }
 0x8b0   : > { %v5088_v39 = vadd.f32 %v2163_v36, %v4921_v3  ;;  %v3582_v40 = vpop.f32.mrb[27].mxu1 }
 0x8b2   : > { %v2171_v41 = vsel %vm1109_vm0, %v5088_v39, 0.0 }
 0x8b3   : > { %2172 = vadd.xlane.f32.xlu0 %v2171_v41 }
 0x8c9   : > { %1440 = vrot.lane.b32.xlu0 %v4982_v6, %s4465_s1 }
 0x8cd   : > { %1444 = vrot.lane.b32.xlu0 %v4982_v6, %s4467_s22 }
 0x940   : > { %v2173_v42 = vpop.xlane.xlu0 %2172 }
 0x941   : > { %v2174_v43 = vmul.f32 0.03125, %v2173_v42 }
 0x943   : > { %v2175_v45 = vsub.f32 %v5088_v39, %v2174_v43 }
 0x944   : > { %v1441_v46 = vpop.permute.xlu0 %1440 }
 0x945   : > { %v3344_v47 = vcombine.low %v1441_v46, %v1441_v46  ;;  %v3345_v3 = vcombine.high %v1441_v46, %v1441_v46  ;;  %v2176_v48 = vmul.f32 %v2175_v45, %v2175_v45 }
 0x947   : > { %1473 = vst.msk [vmem:[#allocation4 + $0x8] sm:$0xf] %vm1280_vm2, %v3344_v47  ;;  %v2177_v49 = vsel %vm1109_vm0, %v2176_v48, 0.0 }
 0x948   : > { %1474 = vst.msk [vmem:[#allocation4 + $0xc] sm:$0x1] %vm1471_vm4, %v3345_v3  ;;  %2178 = vadd.xlane.f32.xlu1 %v2177_v49  ;;  %v1445_v50 = vpop.permute.xlu0 %1444 }
 0x949   : > { %v3348_v51 = vcombine.low %v1445_v50, %v1445_v50  ;;  %v3349_v52 = vcombine.high %v1445_v50, %v1445_v50 }
 0x94b   : > { %1477 = vst.msk [vmem:[#allocation4 + $0x18] sm:$0xf] %vm1280_vm2, %v3348_v51 }
 0x94c   : > { %1478 = vst.msk [vmem:[#allocation4 + $0x1c] sm:$0x1] %vm1471_vm4, %v3349_v52 }
 0x94f   : > { %v3888_v2 = vld [vmem:[#allocation4 + $0x8] sm:$0x1f]  }
 0x950   : > { %v2353_v5 = vsel %vm1651_vm3, %v3888_v2, 0 }
 0x953   : > { %v3890_v17 = vld [vmem:[#allocation4 + $0x18] sm:$0x1f]  }
 0x954   : > { %v2455_v22 = vsel %vm1651_vm3, %v3890_v17, 0 }
 0x959   : > { %1442 = vrot.lane.b32.xlu1 %v4982_v6, %s5287_s8 }
 0x9d5   : > { %v2179_v57 = vpop.xlane.xlu1 %2178 }
 0x9d6   : > { %v2180_v55 = vmul.f32 0.03125, %v2179_v57  ;;  %v3391_v57 = vsel %vm5138_vm12, 1.0, %v4463_v18 }
 0x9d8   : > { %v2181_v56 = vadd.f32 1e-05, %v2180_v55 }
 0x9d9   : > { %v1443_v58 = vpop.permute.xlu1 %1442 }
 0x9da   : > { %3923 = vrsqrt.f32 %v2181_v56  ;;  %v3346_v59 = vcombine.low %v1443_v58, %v1443_v58  ;;  %v3347_v60 = vcombine.high %v1443_v58, %v1443_v58 }
 0x9dc   : > { %1475 = vst.msk [vmem:[#allocation4 + $0x10] sm:$0xf] %vm1280_vm2, %v3346_v59 }
 0x9dd   : > { %1476 = vst.msk [vmem:[#allocation4 + $0x14] sm:$0x1] %vm1471_vm4, %v3347_v60 }
 0x9e4   : > { %v3924_v6 = vpop.eup %3923  ;;  %v3889_v14 = vld [vmem:[#allocation4 + $0x10] sm:$0x1f]  }
 0x9e5   : > { %v2183_v62 = vmul.f32 %v3924_v6, %v2175_v45  ;;  %v2404_v16 = vsel %vm1651_vm3, %v3889_v14, 0 }
 0x9e7   : > { %v2190_v0 = vmul.f32 %v3377_v61, %v2183_v62 }
 0x9e9   : > { %v2197_v1 = vadd.f32 %v3378_v63, %v2190_v0 }
 0x9eb   : > { %v2198_v4 = vpack.c.bf16 %v2197_v1, %v2197_v1 }
 0x9ed   : > { %3588 = vmatmul.mubr.msk.bf16.vlgmr.msra.gmra.mrb[28].mxu0 %vm1109_vm0, %v2198_v4 }
 0x9ee   : > { %3598 = vmatpush3.bf16.xpose.msra.mxu0 %v2353_v5  ;;  %3599 = vmatprep.mubr.msk.bf16.mxu0 %vm4464_vm1, %v4463_v18 }
 0x9ef   : > { %3609 = vmatprep.subr.bf16.mxu0 %v4463_v18 }
 0xac0   : > { %v2259_v8 = vpop.f32.mrb[28].mxu0 }
 0xac1   : > { %v2260_v9 = vadd.f32 %v3379_v7, %v2259_v8  ;;  %v3589_v10 = vpop.f32.mrb[29].mxu0 }
 0xac2   : > { %v2262_v11 = vpop.f32.mrb[30].mxu0 }
 0xac3   : > { %v2265_v12 = vmul.f32 0.35355338, %v2260_v9  ;;  %v3590_v13 = vpop.f32.mrb[31].mxu0 }
 0xac5   : > { %v2266_v15 = vpack.c.bf16 %v2265_v12, %v2265_v12 }
 0xac7   : > { %2270 = vrot.lane.b32.xlu0 %v2266_v15, %s5287_s8  ;;  %2268 = vrot.lane.b32.xlu1 %v2266_v15, %s4465_s1 }
 0xac8   : > { %3594 = vmatmul.mubr.msk.bf16.vlgmr.msra.gmra.mrb[28].mxu1 %vm1651_vm3, %v2266_v15 }
 0xac9   : > { %3604 = vmatpush3.bf16.xpose.msra.mxu1 %v2404_v16  ;;  %3605 = vmatprep.mubr.msk.bf16.mxu1 %vm4464_vm1, %v4463_v18 }
 0xaca   : > { %3615 = vmatprep.subr.bf16.mxu1 %v4463_v18 }
 0xacb   : > { %2272 = vrot.lane.b32.xlu1 %v2266_v15, %s4467_s22 }
 0xb39   : > { %v2269_v20 = vpop.permute.xlu1 %2268  ;;  %v2271_v21 = vpop.permute.xlu0 %2270 }
 0xb3a   : > { %3600 = vmatmul.mubr.msk.bf16.vlgmr.msra.gmra.mrb[32].mxu0 %vm1651_vm3, %v2269_v20  ;;  %3606 = vmatmul.mubr.msk.bf16.vlgmr.msra.gmra.mrb[32].mxu1 %vm1651_vm3, %v2271_v21 }
 0xb3b   : > { %3610 = vmatpush3.bf16.xpose.msra.mxu0 %v2455_v22  ;;  %3616 = vmatpush3.bf16.msra.mxu1 %v2571_v23 }
 0xb3c   : > { %3611 = vmatprep.mubr.msk.bf16.mxu0 %vm4464_vm1, %v4463_v18  ;;  %3617 = vmatprep.mubr.msk.bf16.mxu1 %vm4464_vm1, %v4463_v18 }
 0xb3d   : > { %3621 = vmatprep.subr.bf16.mxu0 %v4463_v18  ;;  %3627 = vmatprep.subr.bf16.mxu1 %v4463_v18  ;;  %v2273_v24 = vpop.permute.xlu1 %2272 }
 0xb42   : > { %3612 = vmatmul.mubr.msk.bf16.vlgmr.msra.gmra.mrb[36].mxu0 %vm1651_vm3, %v2273_v24 }
 0xb43   : > { %3623 = vmatprep.mubr.msk.bf16.mxu0 %vm4464_vm1, %v4463_v18 }
 0xb9b   : > { %v2338_v28 = vpop.f32.mrb[28].mxu1 }
 0xb9c   : > { %v2499_v29 = vsel %vm5138_vm12, %v2338_v28, -1e+30  ;;  %v3595_v30 = vpop.f32.mrb[29].mxu1 }
 0xb9d   : > { %v2341_v31 = vpop.f32.mrb[30].mxu1  ;;  %v2504_v32 = vsel %vm2503_vm13, %v2499_v29, -inf }
 0xb9e   : > { %2505 = vmax.xlane.f32.xlu0 %v2504_v32  ;;  %v3596_v33 = vpop.f32.mrb[31].mxu1 }
 0xc0d   : > { %v2389_v34 = vpop.f32.mrb[32].mxu0  ;;  %v2440_v35 = vpop.f32.mrb[32].mxu1 }
 0xc0e   : > { %v2500_v36 = vsel %vm5138_vm12, %v2389_v34, -1e+30  ;;  %v2501_v44 = vsel %vm5138_vm12, %v2440_v35, -1e+30  ;;  %v3601_v37 = vpop.f32.mrb[33].mxu0  ;;  %v3607_v38 = vpop.f32.mrb[33].mxu1 }
 0xc0f   : > { %v2392_v40 = vpop.f32.mrb[34].mxu0  ;;  %v2443_v41 = vpop.f32.mrb[34].mxu1  ;;  %v2507_v42 = vsel %vm2503_vm13, %v2500_v36, -inf  ;;  %v2510_v43 = vsel %vm2503_vm13, %v2501_v44, -inf }
 0xc10   : > { %2508 = vmax.xlane.f32.xlu1 %v2507_v42  ;;  %v3602_v45 = vpop.f32.mrb[35].mxu0  ;;  %2511 = vmax.xlane.f32.xlu0 %v2510_v43  ;;  %v3608_v46 = vpop.f32.mrb[35].mxu1 }
 0xc15   : > { %v2491_v47 = vpop.f32.mrb[36].mxu0 }
 0xc16   : > { %v2502_v3 = vsel %vm5138_vm12, %v2491_v47, -1e+30  ;;  %v3613_v48 = vpop.f32.mrb[37].mxu0 }
 0xc17   : > { %v2494_v49 = vpop.f32.mrb[38].mxu0  ;;  %v2513_v50 = vsel %vm2503_vm13, %v2502_v3, -inf }
 0xc18   : > { %v3614_v51 = vpop.f32.mrb[39].mxu0  ;;  %2514 = vmax.xlane.f32.xlu0 %v2513_v50 }
 0xc2b   : > { %v2506_v52 = vpop.xlane.xlu0 %2505 }
 0xc2c   : > { %v2516_v53 = vsub.f32 %v2499_v29, %v2506_v52 }
 0xc2e   : > { %v2520_v54 = vmul.f32 1.442695, %v2516_v53 }
 0xc30   : > { %3925 = vpow2.f32 %v2520_v54  ;;  %v3895_v54 = vld [vmem:[%s5290_s0] sm:$0xff]   ;;  %s5295_s0 = sld [smem:[#allocation53_spill]] }
 0xc3a   : > { %v3926_v55 = vpop.eup %3925 }
 0xc3b   : > { %v2529_v56 = vmul.f32 %v3926_v55, %v3391_v57 }
 0xc3d   : > { %v2533_v58 = vsel %vm2503_vm13, %v2529_v56, 0.0 }
 0xc3e   : > { %2534 = vadd.xlane.f32.xlu0 %v2533_v58 }
 0xc9d   : > { %v2509_v59 = vpop.xlane.xlu1 %2508  ;;  %v2512_v60 = vpop.xlane.xlu0 %2511 }
 0xc9e   : > { %v2517_v6 = vsub.f32 %v2500_v36, %v2509_v59  ;;  %v2518_v61 = vsub.f32 %v2501_v44, %v2512_v60 }
 0xca0   : > { %v2522_v62 = vmul.f32 1.442695, %v2517_v6  ;;  %v2524_v63 = vmul.f32 1.442695, %v2518_v61 }
 0xca2   : > { %3927 = vpow2.f32 %v2522_v62  ;;  %v3896_v62 = vld [vmem:[%s5291_s15 + $0x8] sm:$0xff]  }
 0xca3   : > { %3929 = vpow2.f32 %v2524_v63 }
 0xca5   : > { %v2515_v8 = vpop.xlane.xlu0 %2514 }
 0xca6   : > { %v2519_v9 = vsub.f32 %v2502_v3, %v2515_v8 }
 0xca8   : > { %v2526_v12 = vmul.f32 1.442695, %v2519_v9 }
 0xcac   : > { %v3928_v0 = vpop.eup %3927 }
 0xcad   : > { %v3930_v1 = vpop.eup %3929  ;;  %v2530_v2 = vmul.f32 %v3928_v0, %v3391_v57 }
 0xcae   : > { %v2531_v4 = vmul.f32 %v3930_v1, %v3391_v57 }
 0xcaf   : > { %v2536_v5 = vsel %vm2503_vm13, %v2530_v2, 0.0 }
 0xcb0   : > { %2537 = vadd.xlane.f32.xlu1 %v2536_v5  ;;  %v2539_v7 = vsel %vm2503_vm13, %v2531_v4, 0.0 }
 0xcb1   : > { %2540 = vadd.xlane.f32.xlu0 %v2539_v7 }
 0xcc1   : > { %1482 = vrot.lane.b32.xlu1 %v4994_v26, %s5287_s8  ;;  %s5294_s8 = smov 24  }
 0xcc7   : > { %1480 = vrot.lane.b32.xlu0 %v4994_v26, %s4465_s1  ;;  %s5292_s1 = smov 16  }
 0xccb   : > { %v2535_v10 = vpop.xlane.xlu0 %2534 }
 0xccc   : > { %v2545_v11 = vadd.f32 1e-30, %v2535_v10 }
 0xcce   : > { %3931 = vrcp.f32 %v2545_v11 }
 0xccf   : > { %3933 = vpow2.f32 %v2526_v12  ;;  %v3400_v12 = vld [vmem:[#allocation23] ss:$0 sm:$0xff] }
 0xcd8   : > { %v3932_v13 = vpop.eup %3931 }
 0xcd9   : > { %v2553_v14 = vmul.f32 %v3932_v13, %v2529_v56  ;;  %v3934_v16 = vpop.eup %3933 }
 0xcda   : > { %v2532_v17 = vmul.f32 %v3934_v16, %v3391_v57 }
 0xcdb   : > { %v2557_v15 = vpack.c.bf16 %v2553_v14, %v2553_v14 }
 0xcdc   : > { %v2542_v19 = vsel %vm2503_vm13, %v2532_v17, 0.0 }
 0xcdd   : > { %3618 = vmatmul.mubr.msk.bf16.vlgmr.msra.gmra.mrb[36].mxu1 %vm2503_vm13, %v2557_v15 }
 0xcde   : > { %3629 = vmatprep.mubr.msk.bf16.mxu1 %vm4464_vm1, %v4463_v18 }
 0xce5   : > { %2543 = vadd.xlane.f32.xlu1 %v2542_v19 }
 0xcf6   : > { %1484 = vrot.lane.b32.xlu1 %v4994_v26, %s4467_s22  ;;  %s5293_s22 = smov 8  }
 0xd3d   : > { %v2538_v20 = vpop.xlane.xlu1 %2537 }
 0xd3e   : > { %v2546_v21 = vadd.f32 1e-30, %v2538_v20  ;;  %v2541_v22 = vpop.xlane.xlu0 %2540 }
 0xd3f   : > { %v2547_v23 = vadd.f32 1e-30, %v2541_v22 }
 0xd40   : > { %3935 = vrcp.f32 %v2546_v21 }
 0xd41   : > { %3937 = vrcp.f32 %v2547_v23  ;;  %v1483_v24 = vpop.permute.xlu1 %1482 }
 0xd42   : > { %v3354_v25 = vcombine.low %v1483_v24, %v1483_v24  ;;  %v3355_v27 = vcombine.high %v1483_v24, %v1483_v24  ;;  %v1481_v28 = vpop.permute.xlu0 %1480 }
 0xd43   : > { %v3352_v29 = vcombine.low %v1481_v28, %v1481_v28  ;;  %v3353_v30 = vcombine.high %v1481_v28, %v1481_v28 }
 0xd44   : > { %1514 = vst.msk [vmem:[#allocation5 + $0x10] sm:$0xf] %vm1280_vm2, %v3354_v25 }
 0xd45   : > { %1515 = vst.msk [vmem:[#allocation5 + $0x14] sm:$0x1] %vm1471_vm4, %v3355_v27  ;;  %1513 = vst.msk [vmem:[#allocation5 + $0xc] sm:$0x1] %vm1471_vm4, %v3353_v30  ;;  %v3897_v27 = vld [vmem:[%s5295_s0] sm:$0xff]  }
 0xd46   : > { %1512 = vst.msk [vmem:[#allocation5 + $0x8] sm:$0xf] %vm1280_vm2, %v3352_v29  ;;  %v3899_v29 = vld [vmem:[%s4614_s3] sm:$0xff]  }
 0xd4a   : > { %v3936_v26 = vpop.eup %3935 }
 0xd4b   : > { %v3938_v31 = vpop.eup %3937  ;;  %v2554_v33 = vmul.f32 %v3936_v26, %v2530_v2 }
 0xd4c   : > { %v3893_v32 = vld [vmem:[#allocation5 + $0x10] sm:$0x1f]   ;;  %v2555_v34 = vmul.f32 %v3938_v31, %v2531_v4 }
 0xd4d   : > { %v3892_v35 = vld [vmem:[#allocation5 + $0x8] sm:$0x1f]   ;;  %v2673_v36 = vsel %vm2569_vm11, %v3893_v32, 0  ;;  %v2558_v38 = vpack.c.bf16 %v2554_v33, %v2554_v33  ;;  %v3404_v33 = vld [vmem:[#allocation25] ss:$0 sm:$0xff] }
 0xd4e   : > { %v2622_v44 = vsel %vm2569_vm11, %v3892_v35, 0  ;;  %3628 = vmatpush3.bf16.msra.mxu1 %v2673_v36  ;;  %v2559_v37 = vpack.c.bf16 %v2555_v34, %v2555_v34  ;;  %v3405_v35 = vld [vmem:[#allocation26] ss:$0 sm:$0xff] }
 0xd4f   : > { %3622 = vmatpush3.bf16.msra.mxu0 %v2622_v44  ;;  %3639 = vmatprep.subr.bf16.mxu1 %v4463_v18 }
 0xd50   : > { %3633 = vmatprep.subr.bf16.mxu0 %v4463_v18 }
 0xd51   : > { %3630 = vmatmul.mubr.msk.bf16.vlgmr.msra.gmra.mrb[40].mxu1 %vm2503_vm13, %v2559_v37 }
 0xd52   : > { %3624 = vmatmul.mubr.msk.bf16.vlgmr.msra.gmra.mrb[40].mxu0 %vm2503_vm13, %v2558_v38  ;;  %3643 = vmatprep.mubr.msk.bf16.mxu1 %vm4464_vm1, %v4463_v18  ;;  %v3901_v38 = vld [vmem:[%s4614_s3 + $0x10] sm:$0xff]  }
 0xd53   : > { %3635 = vmatprep.mubr.msk.bf16.mxu0 %vm4464_vm1, %v4463_v18  ;;  %3640 = vmatpush3.bf16.msra.mxu1 %v3895_v54 }
 0xd54   : > { %3641 = vmatprep.subr.bf16.mxu1 %v4463_v18 }
 0xd57   : > { %3642 = vmatpush3.bf16.msra.mxu1 %v3896_v62 }
 0xd58   : > { %3655 = vmatprep.subr.bf16.mxu1 %v4463_v18 }
 0xd72   : > { %v2544_v40 = vpop.xlane.xlu1 %2543 }
 0xd73   : > { %v2548_v41 = vadd.f32 1e-30, %v2544_v40  ;;  %v3902_v40 = vld [vmem:[%s4614_s3 + $0x18] sm:$0xff]  }
 0xd75   : > { %3939 = vrcp.f32 %v2548_v41  ;;  %v3406_v41 = vld [vmem:[#allocation28] ss:$0 sm:$0xff] }
 0xd76   : > { %v1485_v42 = vpop.permute.xlu1 %1484 }
 0xd77   : > { %v3356_v43 = vcombine.low %v1485_v42, %v1485_v42  ;;  %v3357_v45 = vcombine.high %v1485_v42, %v1485_v42 }
 0xd79   : > { %1516 = vst.msk [vmem:[#allocation5 + $0x18] sm:$0xf] %vm1280_vm2, %v3356_v43 }
 0xd7a   : > { %1517 = vst.msk [vmem:[#allocation5 + $0x1c] sm:$0x1] %vm1471_vm4, %v3357_v45 }
 0xd7f   : > { %v3940_v46 = vpop.eup %3939 }
 0xd80   : > { %v2556_v47 = vmul.f32 %v3940_v46, %v2532_v17 }
 0xd81   : > { %v3894_v3 = vld [vmem:[#allocation5 + $0x18] sm:$0x1f]  }
 0xd82   : > { %v2724_v48 = vsel %vm2569_vm11, %v3894_v3, 0  ;;  %v2560_v49 = vpack.c.bf16 %v2556_v47, %v2556_v47 }
 0xd83   : > { %3634 = vmatpush3.bf16.msra.mxu0 %v2724_v48 }
 0xd84   : > { %3647 = vmatprep.subr.bf16.mxu0 %v4463_v18 }
 0xd86   : > { %3636 = vmatmul.mubr.msk.bf16.vlgmr.msra.gmra.mrb[44].mxu0 %vm2503_vm13, %v2560_v49  ;;  %v3410_v49 = vld [vmem:[#allocation29] ss:$0 sm:$0xff] }
 0xd87   : > { %3651 = vmatprep.mubr.msk.bf16.mxu0 %vm4464_vm1, %v4463_v18  ;;  %3648 = vmatpush3.bf16.msra.mxu0 %v3897_v27 }
 0xd88   : > { %3649 = vmatprep.subr.bf16.mxu0 %v4463_v18 }
 0xdb0   : > { %v2607_v50 = vpop.f32.mrb[36].mxu1 }
 0xdb1   : > { %v3619_v51 = vpop.f32.mrb[37].mxu1 }
 0xdb2   : > { %v2610_v52 = vpop.f32.mrb[38].mxu1 }
 0xdb3   : > { %v3620_v53 = vpop.f32.mrb[39].mxu1 }
 0xe24   : > { %v2709_v57 = vpop.f32.mrb[40].mxu1 }
 0xe25   : > { %v2658_v55 = vpop.f32.mrb[40].mxu0  ;;  %2771 = vrot.lane.b32.xlu0 %v2709_v57, %s5292_s1  ;;  %v3631_v56 = vpop.f32.mrb[41].mxu1  ;;  %s5296_s1 = smov %s5295_s0 }
 0xe26   : > { %2767 = vrot.lane.b32.xlu1 %v2658_v55, %s5293_s22  ;;  %v3625_v58 = vpop.f32.mrb[41].mxu0  ;;  %v2712_v59 = vpop.f32.mrb[42].mxu1  ;;  %v3898_v28 = vld [vmem:[%s5296_s1 + $0x8] sm:$0xff]   ;;  %s5297_s22 = sshll.u32 %s4911_s26, 2 }
 0xe27   : > { %v2661_v60 = vpop.f32.mrb[42].mxu0  ;;  %v3632_v6 = vpop.f32.mrb[43].mxu1  ;;  %3650 = vmatpush3.bf16.msra.mxu0 %v3898_v28 }
 0xe28   : > { %v3626_v61 = vpop.f32.mrb[43].mxu0 }
 0xe59   : > { %v2760_v63 = vpop.f32.mrb[44].mxu0 }
 0xe5a   : > { %2775 = vrot.lane.b32.xlu1 %v2760_v63, %s5294_s8  ;;  %v3637_v0 = vpop.f32.mrb[45].mxu0  ;;  %s1099_s8 = scalar_lea.vmem %s4624_s10, %s5297_s22 }
 0xe5b   : > { %v2763_v1 = vpop.f32.mrb[46].mxu0 }
 0xe5c   : > { %v3638_v2 = vpop.f32.mrb[47].mxu0 }
 0xe97   : > { %v2772_v7 = vpop.permute.xlu0 %2771 }
 0xe98   : > { %v2768_v4 = vpop.permute.xlu1 %2767 }
 0xe99   : > { %v2778_v5 = vsel %vm1651_vm3, %v2607_v50, %v2768_v4 }
 0xe9a   : > { %v2779_v8 = vsel %vm2097_vm9, %v2778_v5, %v2772_v7 }
 0xecc   : > { %v2776_v9 = vpop.permute.xlu1 %2775 }
 0xecd   : > { %v2780_v10 = vsel %vm2099_vm10, %v2779_v8, %v2776_v9 }
 0xece   : > { %v2781_v11 = vpack.c.bf16 %v2780_v10, %v2780_v10 }
 0xed0   : > { %3644 = vmatmul.mubr.msk.bf16.vlgmr.msra.gmra.mrb[44].mxu1 %vm1109_vm0, %v2781_v11 }
 0xed1   : > { %3663 = vmatprep.mubr.msk.bf16.mxu1 %vm4464_vm1, %v4463_v18  ;;  %3656 = vmatpush3.bf16.msra.mxu1 %v3899_v29 }
 0xed2   : > { %3657 = vmatprep.subr.bf16.mxu1 %v4463_v18 }
 0xfa3   : > { %v2842_v13 = vpop.f32.mrb[44].mxu1 }
 0xfa4   : > { %v2843_v14 = vadd.f32 %v3400_v12, %v2842_v13  ;;  %v3645_v15 = vpop.f32.mrb[45].mxu1 }
 0xfa5   : > { %v2845_v16 = vpop.f32.mrb[46].mxu1 }
 0xfa6   : > { %v2848_v17 = vadd.f32 %v2843_v14, %v5088_v39  ;;  %v3646_v19 = vpop.f32.mrb[47].mxu1  ;;  %v3900_v39 = vld [vmem:[%s4614_s3 + $0x8] sm:$0xff]  }
 0xfa7   : > { %3658 = vmatpush3.bf16.msra.mxu1 %v3900_v39 }
 0xfa8   : > { %v2851_v20 = vsel %vm1109_vm0, %v2848_v17, 0.0  ;;  %3659 = vmatprep.subr.bf16.mxu1 %v4463_v18 }
 0xfa9   : > { %2852 = vadd.xlane.f32.xlu0 %v2851_v20 }
 0xfab   : > { %3660 = vmatpush3.bf16.msra.mxu1 %v3901_v38 }
 0xfac   : > { %3661 = vmatprep.subr.bf16.mxu1 %v4463_v18 }
 0xfaf   : > { %3662 = vmatpush3.bf16.msra.mxu1 %v3902_v40 }
0x1036   : > { %v2853_v21 = vpop.xlane.xlu0 %2852 }
0x1037   : > { %v2854_v22 = vmul.f32 0.03125, %v2853_v21 }
0x1039   : > { %v2855_v23 = vsub.f32 %v2848_v17, %v2854_v22 }
0x103b   : > { %v2856_v24 = vmul.f32 %v2855_v23, %v2855_v23 }
0x103d   : > { %v2857_v25 = vsel %vm1109_vm0, %v2856_v24, 0.0 }
0x103e   : > { %2858 = vadd.xlane.f32.xlu1 %v2857_v25 }
0x10cb   : > { %v2859_v30 = vpop.xlane.xlu1 %2858 }
0x10cc   : > { %v2860_v26 = vmul.f32 0.03125, %v2859_v30 }
0x10ce   : > { %v2861_v31 = vadd.f32 1e-05, %v2860_v26 }
0x10d0   : > { %3941 = vrsqrt.f32 %v2861_v31 }
0x10da   : > { %v3942_v32 = vpop.eup %3941 }
0x10db   : > { %v2863_v34 = vmul.f32 %v3942_v32, %v2855_v23 }
0x10dd   : > { %v2870_v36 = vmul.f32 %v3404_v33, %v2863_v34 }
0x10df   : > { %v2877_v44 = vadd.f32 %v3405_v35, %v2870_v36 }
0x10e1   : > { %v2878_v37 = vpack.c.bf16 %v2877_v44, %v2877_v44 }
0x10e3   : > { %3652 = vmatmul.mubr.msk.bf16.vlgmr.msra.gmra.mrb[48].mxu0 %vm1109_vm0, %v2878_v37 }
0x11b6   : > { %v2939_v42 = vpop.f32.mrb[48].mxu0 }
0x11b7   : > { %v2940_v43 = vadd.f32 %v3406_v41, %v2939_v42  ;;  %v3653_v45 = vpop.f32.mrb[49].mxu0 }
0x11b8   : > { %v2942_v46 = vpop.f32.mrb[50].mxu0 }
0x11b9   : > { %v2945_v47 = vmax.f32 %v2940_v43, 0.0  ;;  %v3654_v3 = vpop.f32.mrb[51].mxu0 }
0x11bb   : > { %v2946_v48 = vpack.c.bf16 %v2945_v47, %v2945_v47 }
0x11bd   : > { %3664 = vmatmul.mubr.msk.bf16.vlgmr.msra.gmra.mrb[48].mxu1 %vm2986_vm14, %v2946_v48 }
0x1290   : > { %v3024_v50 = vpop.f32.mrb[48].mxu1 }
0x1291   : > { %v3025_v51 = vadd.f32 %v3410_v49, %v3024_v50  ;;  %v3665_v52 = vpop.f32.mrb[49].mxu1 }
0x1292   : > { %v3027_v53 = vpop.f32.mrb[50].mxu1 }
0x1293   : > { %v3030_v18 = vadd.f32 %v3025_v51, %v2848_v17  ;;  %v3666_v54 = vpop.f32.mrb[51].mxu1 }
0x1295   : > { %v3031_v57 = vpack.c.bf16 %v3030_v18, %v3030_v18 }
0x1297   : > { %3033 = vst.msk [vmem:[%s1099_s8] sm:$0xf] %vm3032_vm15, %v3031_v57 }
0x1298 PF: > { %s89_s28 = sadd.s32 1, %s4415_s28   ;;  %s5298_s0 = smov %s4411_s4 }
0x1299   : > { %p86_p3 = scmp.ge.s32.totalorder %s89_s28, 4   ;;  %s5299_s4 = smov %s5301_s7 }
0x129b   :  { %88 = sbr.rel (!%p86_p3) target bundleno = 79 (0x4f), region = 257 }
0x12a2   :  { %3059 = vsyncpa [#allocation10], 1 }
0x12a3   :  { %3061 = vsyncpa [#allocation10 + $0x1], 1 }
0x12a4   :  { %3062 = vsyncpa [#allocation12], 1 }
0x12a5   :  { %3063 = vsyncpa [#allocation15], 1 }
0x12a6   :  { %3064 = vsyncpa [#allocation18], 1 }
0x12a7   :  { %3065 = vsyncpa [#allocation21], 1 }
0x12a8   :  { %3066 = vsyncpa [#allocation24], 1 }
0x12a9   :  { %3067 = vsyncpa [#allocation27], 1 }
0x12aa   :  { %3068 = vsyncpa [#allocation30], 1 }

// kernel: forward.9
= control target key start
LH: loop header
LB: loop body
LE: loop exit
PB: predicated region body
PF: predicated region fallthrough
CT: control target
= control target key end

     0   :  { %v211_v0 = vmov 0.0   ;;  %vm50_vm0 = vcmask 1043456   ;;  %vm212_vm1 = vmmov 0   ;;  %vm46_vm2 = vcmask 195584   ;;  %s270_s3 = inlined_call_operand.vmem [shape: bf16[24,128], index: 3, kind: input, shape index: {}]   ;;  %s271_s2 = inlined_call_operand.vmem [shape: bf16[32,128], index: 2, kind: input, shape index: {}]   ;;  %s272_s1 = inlined_call_operand.vmem [shape: bf16[16,24], index: 1, kind: input, shape index: {}]   ;;  %s273_s0 = inlined_call_operand.vmem [shape: bf16[16,32], index: 0, kind: input, shape index: {}]   ;;  %s274_s4 = inlined_call_operand.vmem [shape: f32[1,128], index: 4, kind: input, shape index: {}]   ;;  %s275_s5 = inlined_call_operand.vmem [shape: f32[16,128], index: 5, kind: output, shape index: {}]  }
   0x1   :  { %187 = vmatprep.subr.bf16.mxu0 %v211_v0  ;;  %195 = vmatprep.subr.bf16.mxu1 %v211_v0  ;;  %v205_v1 = vld [vmem:[%s270_s3] sm:$0xff]   ;;  %v207_v3 = vld [vmem:[%s270_s3 + $0x8] ss:$0 sps:$4 sm:$0xff]   ;;  %vm112_vm3 = vcmask 261120  }
   0x2   :  { %v206_v2 = vld [vmem:[%s271_s2] sm:$0xff]   ;;  %191 = vmatprep.mubr.msk.bf16.mxu0 %vm212_vm1, %v211_v0  ;;  %199 = vmatprep.mubr.msk.bf16.mxu1 %vm212_vm1, %v211_v0  ;;  %v208_v4 = vld [vmem:[%s271_s2 + $0x8] sm:$0xff]   ;;  %v52_v5 = vsel %vm50_vm0, %v207_v3, 0 }
   0x3   :  { %188 = vmatpush3.bf16.msra.mxu0 %v205_v1  ;;  %196 = vmatpush3.bf16.msra.mxu1 %v206_v2  ;;  %v209_v6 = vld [vmem:[%s272_s1] sm:$0xff]  }
   0x4   :  { %189 = vmatprep.subr.bf16.mxu0 %v211_v0  ;;  %197 = vmatprep.subr.bf16.mxu1 %v211_v0  ;;  %v210_v7 = vld [vmem:[%s273_s0] sm:$0xff]  }
   0x5   :  { %v180_v10 = vld [vmem:[%s274_s4] ss:$0 sm:$0xff] }
   0x7   :  { %190 = vmatpush3.bf16.msra.mxu0 %v52_v5  ;;  %198 = vmatpush3.bf16.msra.mxu1 %v208_v4 }
   0xa   :  { %192 = vmatmul.mubr.msk.bf16.vlgmr.msra.gmra.mrb[0].mxu0 %vm46_vm2, %v209_v6  ;;  %200 = vmatmul.mubr.msk.bf16.vlgmr.msra.gmra.mrb[0].mxu1 %vm112_vm3, %v210_v7 }
  0xdd   :  { %v88_v8 = vpop.f32.mrb[0].mxu0  ;;  %v150_v9 = vpop.f32.mrb[0].mxu1 }
  0xde   :  { %v193_v11 = vpop.f32.mrb[1].mxu0  ;;  %v151_v12 = vadd.f32 %v150_v9, %v88_v8  ;;  %v201_v13 = vpop.f32.mrb[1].mxu1 }
  0xdf   :  { %v91_v14 = vpop.f32.mrb[2].mxu0  ;;  %v153_v15 = vpop.f32.mrb[2].mxu1 }
  0xe0   :  { %v194_v16 = vpop.f32.mrb[3].mxu0  ;;  %v164_v17 = vadd.f32 %v180_v10, %v151_v12  ;;  %v154_v18 = vadd.f32 %v153_v15, %v91_v14  ;;  %v202_v19 = vpop.f32.mrb[3].mxu1 }
  0xe2   :  { %166 = vst [vmem:[%s275_s5] sm:$0xff] %v164_v17  ;;  %v165_v20 = vadd.f32 %v180_v10, %v154_v18 }
  0xe4   :  { %167 = vst [vmem:[%s275_s5 + $0x8] sm:$0xff] %v165_v20 }

</bundles_post_ra>
